<compile_context>
chip_gen: v5e
topology: v5e:2x2
jax: 0.10.0
libtpu: 0.0.40
codegen_flags: <defaults>
</compile_context>

<pallas_src>
import functools

import numpy as np
import jax
import jax.numpy as jnp
from jax.experimental import pallas as pl
from jax.experimental.pallas import tpu as pltpu


# ----------------------------------------------------------------------------
# Fused kernel: conv1 -> pool -> conv2 -> pool -> fc1 -> fc2 for `tb` images.
# ----------------------------------------------------------------------------
def _cnn_fused_kernel(xq_ref, B1_ref, b1_ref, B2_ref, b2_ref,
                      wf1_ref, bf1_ref, wf2_ref, bf2_ref, o_ref, *, tb):
    f32, bf16 = jnp.float32, jnp.bfloat16
    M8 = tb * 8                      # rows per conv phase: 8 row-groups / image

    # ---------------- conv1 (1->16, 3x3 SAME) + bias + ReLU + 2x2 max-pool ---
    # xq_ref[u] holds padded input rows r with r % 4 == u as (tb*8, 32) f32,
    # so every (output-row phase t, tap dh) is a contiguous uniformly-shifted
    # slice (no strided access).  8 zero rows are appended for the +1 shift.
    xv = [jnp.concatenate([xq_ref[u], jnp.zeros((8, 32), f32)], axis=0)
          for u in range(4)]                                     # (M8+8, 32)

    lhs_parts = []
    for t in range(4):                       # t = output row h mod 4
        taps = []
        for dh in range(3):
            v, c = (t + dh) % 4, (t + dh) // 4
            taps.append(xv[v][c:c + M8, :])                      # (M8, 32)
        lhs_parts.append(jnp.concatenate(taps, axis=1))          # (M8, 96)
    lhs1 = jnp.concatenate(lhs_parts, axis=0).astype(bf16)       # (4*M8, 96)

    # Banded weight matmul, K = 3 taps x 32 padded cols.  Output columns are
    # (col-parity s, conv2 padded col q2, cout): the W-pool becomes a
    # lane-slice max and the result lands directly in conv2's input layout.
    acc1 = jnp.dot(lhs1, B1_ref[...], preferred_element_type=f32)  # (4*M8, 512)
    # bias + ReLU after the max-pools is valid because both are monotonic.
    z1 = jnp.maximum(jnp.maximum(acc1[:, :256], acc1[:, 256:]) + b1_ref[...],
                     0.0)                                          # (4*M8, 256)

    # H-pool: phases (t=0, t=1) -> even pooled rows, (t=2, t=3) -> odd rows.
    p_even = jnp.maximum(z1[0 * M8:1 * M8], z1[1 * M8:2 * M8])     # (M8, 256)
    p_odd = jnp.maximum(z1[2 * M8:3 * M8], z1[3 * M8:4 * M8])

    # Zero each image's garbage row (j == 7); it doubles as conv2's zero halo.
    j_in_img = jax.lax.broadcasted_iota(jnp.int32, (M8, 256), 0) & 7
    keep = j_in_img < 7
    p_even = jnp.where(keep, p_even, 0.0)
    p_odd = jnp.where(keep, p_odd, 0.0)

    # ---------------- conv2 (16->32, 3x3 SAME) + bias + ReLU + 2x2 max-pool --
    zpad = jnp.zeros((8, 256), f32)
    pe = jnp.concatenate([zpad, p_even, zpad], axis=0)             # (M8+16, 256)
    po = jnp.concatenate([zpad, p_odd, zpad], axis=0)

    def shifted(plane, sigma):
        return plane[8 + sigma: 8 + sigma + M8, :]

    # (pooled plane, row shift) feeding tap dh2 for each output-row parity t2.
    tap_src = [[(po, -1), (pe, 0), (po, 0)],      # t2 = 0 (even output rows)
               [(pe, 0), (po, 0), (pe, 1)]]       # t2 = 1 (odd output rows)
    lhs2 = jnp.concatenate(
        [jnp.concatenate([shifted(p, s) for (p, s) in taps], axis=1)
         for taps in tap_src], axis=0).astype(bf16)                # (2*M8, 768)

    acc2 = jnp.dot(lhs2, B2_ref[...], preferred_element_type=f32)  # (2*M8, 512)
    z2 = jnp.maximum(jnp.maximum(acc2[:, :256], acc2[:, 256:]) + b2_ref[...],
                     0.0)                                          # (2*M8, 256)
    pooled2 = jnp.maximum(z2[:M8], z2[M8:])                        # (M8, 256)

    # ---------------- fc1 (1568->128) + ReLU + fc2 (10, padded to 128 lanes) -
    p3 = pooled2.reshape(tb, 8, 256)          # free: splits sublanes at 8
    hidden = jnp.zeros((tb, 128), f32)
    for r in range(7):                        # 7 valid pooled rows per image
        hidden = hidden + jnp.dot(p3[:, r, :].astype(bf16), wf1_ref[r],
                                  preferred_element_type=f32)
    h = jnp.maximum(hidden + bf1_ref[...], 0.0).astype(bf16)
    o_ref[...] = (jnp.dot(h, wf2_ref[...], preferred_element_type=f32)
                  + bf2_ref[...])


# ----------------------------------------------------------------------------
# One-time parameter prep: fold taps / padding / pool parity / flatten order
# into banded & permuted weight matrices (all done host-side with numpy).
# ----------------------------------------------------------------------------
def prepare_params(params):
    w1 = np.asarray(params["w1"], np.float32)     # (3,3,1,16)  HWIO
    w2 = np.asarray(params["w2"], np.float32)     # (3,3,16,32) HWIO
    b1 = np.asarray(params["b1"], np.float32)
    b2 = np.asarray(params["b2"], np.float32)
    wf1 = np.asarray(params["wf1"], np.float32)   # (1568,128), torch (c,h,w) rows
    bf1 = np.asarray(params["bf1"], np.float32)
    wf2 = np.asarray(params["wf2"], np.float32)   # (128,10)
    bf2 = np.asarray(params["bf2"], np.float32)

    # conv1 banded matrix: rows (dh, padded col q); cols (parity s, q2, cout).
    B1 = np.zeros((3, 32, 2, 16, 16), np.float32)
    for dh in range(3):
        for dw in range(3):
            for wo in range(14):
                for s in range(2):
                    B1[dh, 2 * wo + s + dw, s, wo + 1, :] = w1[dh, dw, 0, :]
    B1 = B1.reshape(96, 512)
    b1t = np.zeros((16, 16), np.float32)
    b1t[1:15, :] = b1[None, :]

    # conv2 banded matrix: rows (dh, q2, cin); cols (parity s, wo2, cout).
    B2 = np.zeros((3, 16, 16, 2, 8, 32), np.float32)
    for dh in range(3):
        for dw in range(3):
            for wo in range(7):
                for s in range(2):
                    B2[dh, 2 * wo + s + dw, :, s, wo, :] = w2[dh, dw, :, :]
    B2 = B2.reshape(768, 512)
    b2t = np.zeros((8, 32), np.float32)
    b2t[:7, :] = b2[None, :]

    # fc1 rows: torch (c,h,w) flatten order -> kernel (h, w, c) order, with the
    # w dimension padded 7 -> 8 so each row block matches the 256-wide layout.
    wf1k = np.zeros((7, 8, 32, 128), np.float32)
    wf1k[:, :7, :, :] = wf1.reshape(32, 7, 7, 128).transpose(1, 2, 0, 3)
    wf1k = wf1k.reshape(7, 256, 128)

    wf2p = np.zeros((128, 128), np.float32)
    wf2p[:, :10] = wf2
    bf2p = np.zeros((1, 128), np.float32)
    bf2p[0, :10] = bf2

    bf16 = jnp.bfloat16
    return {
        "B1": jnp.asarray(B1, bf16), "b1t": jnp.asarray(b1t.reshape(1, 256)),
        "B2": jnp.asarray(B2, bf16), "b2t": jnp.asarray(b2t.reshape(1, 256)),
        "wf1": jnp.asarray(wf1k, bf16),
        "bf1": jnp.asarray(bf1.reshape(1, 128)),
        "wf2": jnp.asarray(wf2p, bf16),
        "bf2": jnp.asarray(bf2p),
    }


# ----------------------------------------------------------------------------
# Forward pass (mirrors torch CNN.forward); kp = prepare_params(params).
# ----------------------------------------------------------------------------
def cnn_forward(kp, x_nchw):
    N = x_nchw.shape[0]
    assert x_nchw.shape[1:] == (1, 28, 28)

    # Batch tile: multiple of 8 (sublane alignment), >= 2 grid steps as soon as
    # the batch allows it (keeps both v7x TensorCores busy), capped at 32.
    tb = min(32, 8 * max(1, (N + 15) // 16))
    npad = ((N + tb - 1) // tb) * tb
    grid = npad // tb

    x = x_nchw.reshape(N, 28, 28).astype(jnp.float32)
    if npad != N:
        x = jnp.pad(x, ((0, npad - N), (0, 0), (0, 0)))
    # SAME halo + alignment padding (28x28 -> 32x32), then split rows by
    # (row mod 4) so every conv1 tap is a contiguous, uniformly-shifted slice.
    xpad = jnp.pad(x, ((0, 0), (1, 3), (1, 3)))
    xq = (xpad.reshape(npad, 8, 4, 32).transpose(2, 0, 1, 3)
              .reshape(4, npad * 8, 32))

    kern = functools.partial(_cnn_fused_kernel, tb=tb)
    out = pl.pallas_call(
        kern,
        out_shape=jax.ShapeDtypeStruct((npad, 128), jnp.float32),
        grid=(grid,),
        in_specs=[
            pl.BlockSpec((4, tb * 8, 32), lambda i: (0, i, 0)),
            pl.BlockSpec((96, 512), lambda i: (0, 0)),
            pl.BlockSpec((1, 256), lambda i: (0, 0)),
            pl.BlockSpec((768, 512), lambda i: (0, 0)),
            pl.BlockSpec((1, 256), lambda i: (0, 0)),
            pl.BlockSpec((7, 256, 128), lambda i: (0, 0, 0)),
            pl.BlockSpec((1, 128), lambda i: (0, 0)),
            pl.BlockSpec((128, 128), lambda i: (0, 0)),
            pl.BlockSpec((1, 128), lambda i: (0, 0)),
        ],
        out_specs=pl.BlockSpec((tb, 128), lambda i: (i, 0)),
        compiler_params=pltpu.CompilerParams(
            dimension_semantics=("parallel",),
            vmem_limit_bytes=32 * 1024 * 1024),
    )(xq, kp["B1"], kp["b1t"], kp["B2"], kp["b2t"],
      kp["wf1"], kp["bf1"], kp["wf2"], kp["bf2"])
    return out[:N, :10]


# ----------------------------------------------------------------------------
# Pure-jnp reference (no Pallas), same bf16-operand / f32-accumulate recipe.
# ----------------------------------------------------------------------------
def cnn_forward_ref(params, x_nchw):
    bf16 = jnp.bfloat16
    x = jnp.transpose(x_nchw, (0, 2, 3, 1)).astype(bf16)

    def conv_relu(x, w, b):
        N, H, W, Cin = x.shape
        Cout = w.shape[-1]
        xp = jnp.pad(x, ((0, 0), (1, 1), (1, 1), (0, 0)))
        cols = [xp[:, kh:kh + H, kw:kw + W, :]
                for kh in range(3) for kw in range(3)]
        patches = jnp.concatenate(cols, axis=-1).reshape(N * H * W, 9 * Cin)
        o = jnp.dot(patches, w.reshape(9 * Cin, Cout).astype(bf16),
                    preferred_element_type=jnp.float32)
        return jnp.maximum(o + b, 0.0).reshape(N, H, W, Cout)

    def pool(y):
        N, H, W, C = y.shape
        return y.reshape(N, H // 2, 2, W // 2, 2, C).max(axis=(2, 4))

    x = pool(conv_relu(x, params["w1"], params["b1"])).astype(bf16)
    x = pool(conv_relu(x, params["w2"], params["b2"])).astype(bf16)
    n = x.shape[0]
    x = jnp.transpose(x, (0, 3, 1, 2)).reshape(n, 32 * 7 * 7)  # torch .view order
    h = jnp.dot(x, params["wf1"].astype(bf16),
                preferred_element_type=jnp.float32) + params["bf1"]
    h = jnp.maximum(h, 0.0).astype(bf16)
    return jnp.dot(h, params["wf2"].astype(bf16),
                   preferred_element_type=jnp.float32) + params["bf2"]


def init_params(key):
    ks = jax.random.split(key, 8)
    s = 0.05
    f32 = jnp.float32
    return {
        "w1":  jax.random.normal(ks[0], (3, 3, 1, 16), f32) * s,   # HWIO
        "b1":  jax.random.normal(ks[1], (16,), f32) * s,
        "w2":  jax.random.normal(ks[2], (3, 3, 16, 32), f32) * s,  # HWIO
        "b2":  jax.random.normal(ks[3], (32,), f32) * s,
        "wf1": jax.random.normal(ks[4], (32 * 7 * 7, 128), f32) * s,
        "bf1": jax.random.normal(ks[5], (128,), f32) * s,
        "wf2": jax.random.normal(ks[6], (128, 10), f32) * s,
        "bf2": jax.random.normal(ks[7], (10,), f32) * s,
    }


if __name__ == "__main__":
    key = jax.random.PRNGKey(0)
    pkey, xkey = jax.random.split(key)
    params = init_params(pkey)

    # fc1 expects 32*7*7 features => input spatial size must be 28x28 (MNIST).
    x = jax.random.normal(xkey, (2, 1, 28, 28), jnp.float32)

    kparams = prepare_params(params)            # one-time weight layout prep
    out = jax.jit(cnn_forward)(kparams, x)
    out = jax.block_until_ready(out)
    assert out.shape == (2, 10), out.shape

    ref = jax.block_until_ready(cnn_forward_ref(params, x))
    assert jnp.allclose(out, ref, atol=1e-2, rtol=1e-2), (out, ref)

    print("KERNEL_OK")
</pallas_src>

<mosaic_0001>
module attributes {stable_mosaic.version = 11 : i64} {
  func.func @_cnn_fused_kernel(%arg0: i32, %arg1: memref<4x64x32xf32, #tpu.memory_space<vmem>>, %arg2: memref<96x512xbf16, #tpu.memory_space<vmem>>, %arg3: memref<1x256xf32, #tpu.memory_space<vmem>>, %arg4: memref<768x512xbf16, #tpu.memory_space<vmem>>, %arg5: memref<1x256xf32, #tpu.memory_space<vmem>>, %arg6: memref<7x256x128xbf16, #tpu.memory_space<vmem>>, %arg7: memref<1x128xf32, #tpu.memory_space<vmem>>, %arg8: memref<128x128xbf16, #tpu.memory_space<vmem>>, %arg9: memref<1x128xf32, #tpu.memory_space<vmem>>, %arg10: memref<8x128xf32, #tpu.memory_space<vmem>>) attributes {dimension_semantics = [#tpu.dimension_semantics<parallel>], iteration_bounds = array<i64: 1>, scalar_prefetch = 0 : i64, scratch_operands = 0 : i64, tpu.core_type = #tpu.core_type<tc>, window_params = [{transform_indices = @transform_0, window_bounds = array<i64: 4, 64, 32>}, {pipeline_mode = #tpu.pipeline_mode<synchronous>, transform_indices = @transform_1, window_bounds = array<i64: 96, 512>}, {pipeline_mode = #tpu.pipeline_mode<synchronous>, transform_indices = @transform_2, window_bounds = array<i64: 1, 256>}, {pipeline_mode = #tpu.pipeline_mode<synchronous>, transform_indices = @transform_3, window_bounds = array<i64: 768, 512>}, {pipeline_mode = #tpu.pipeline_mode<synchronous>, transform_indices = @transform_4, window_bounds = array<i64: 1, 256>}, {pipeline_mode = #tpu.pipeline_mode<synchronous>, transform_indices = @transform_5, window_bounds = array<i64: 7, 256, 128>}, {pipeline_mode = #tpu.pipeline_mode<synchronous>, transform_indices = @transform_6, window_bounds = array<i64: 1, 128>}, {pipeline_mode = #tpu.pipeline_mode<synchronous>, transform_indices = @transform_7, window_bounds = array<i64: 128, 128>}, {pipeline_mode = #tpu.pipeline_mode<synchronous>, transform_indices = @transform_8, window_bounds = array<i64: 1, 128>}, {transform_indices = @transform_9, window_bounds = array<i64: 8, 128>}]} {
    %c0 = arith.constant 0 : index
    %c0_0 = arith.constant 0 : index
    %c0_1 = arith.constant 0 : index
    %0 = vector.load %arg1[%c0, %c0_0, %c0_1] : memref<4x64x32xf32, #tpu.memory_space<vmem>>, vector<1x64x32xf32>
    %1 = vector.shape_cast %0 : vector<1x64x32xf32> to vector<64x32xf32>
    %cst = arith.constant 0.000000e+00 : f32
    %2 = vector.broadcast %cst : f32 to vector<8x32xf32>
    %3 = tpu.concatenate %1, %2 in 0 : vector<64x32xf32>, vector<8x32xf32> -> vector<72x32xf32>
    %c1 = arith.constant 1 : index
    %c0_2 = arith.constant 0 : index
    %c0_3 = arith.constant 0 : index
    %4 = vector.load %arg1[%c1, %c0_2, %c0_3] : memref<4x64x32xf32, #tpu.memory_space<vmem>>, vector<1x64x32xf32>
    %5 = vector.shape_cast %4 : vector<1x64x32xf32> to vector<64x32xf32>
    %cst_4 = arith.constant 0.000000e+00 : f32
    %6 = vector.broadcast %cst_4 : f32 to vector<8x32xf32>
    %7 = tpu.concatenate %5, %6 in 0 : vector<64x32xf32>, vector<8x32xf32> -> vector<72x32xf32>
    %c2 = arith.constant 2 : index
    %c0_5 = arith.constant 0 : index
    %c0_6 = arith.constant 0 : index
    %8 = vector.load %arg1[%c2, %c0_5, %c0_6] : memref<4x64x32xf32, #tpu.memory_space<vmem>>, vector<1x64x32xf32>
    %9 = vector.shape_cast %8 : vector<1x64x32xf32> to vector<64x32xf32>
    %cst_7 = arith.constant 0.000000e+00 : f32
    %10 = vector.broadcast %cst_7 : f32 to vector<8x32xf32>
    %11 = tpu.concatenate %9, %10 in 0 : vector<64x32xf32>, vector<8x32xf32> -> vector<72x32xf32>
    %c3 = arith.constant 3 : index
    %c0_8 = arith.constant 0 : index
    %c0_9 = arith.constant 0 : index
    %12 = vector.load %arg1[%c3, %c0_8, %c0_9] : memref<4x64x32xf32, #tpu.memory_space<vmem>>, vector<1x64x32xf32>
    %13 = vector.shape_cast %12 : vector<1x64x32xf32> to vector<64x32xf32>
    %cst_10 = arith.constant 0.000000e+00 : f32
    %14 = vector.broadcast %cst_10 : f32 to vector<8x32xf32>
    %15 = tpu.concatenate %13, %14 in 0 : vector<64x32xf32>, vector<8x32xf32> -> vector<72x32xf32>
    %16 = vector.extract_strided_slice %3 {offsets = [0, 0], sizes = [64, 32], strides = [1, 1]} : vector<72x32xf32> to vector<64x32xf32>
    %17 = vector.extract_strided_slice %7 {offsets = [0, 0], sizes = [64, 32], strides = [1, 1]} : vector<72x32xf32> to vector<64x32xf32>
    %18 = vector.extract_strided_slice %11 {offsets = [0, 0], sizes = [64, 32], strides = [1, 1]} : vector<72x32xf32> to vector<64x32xf32>
    %19 = tpu.concatenate %16, %17, %18 in 1 : vector<64x32xf32>, vector<64x32xf32>, vector<64x32xf32> -> vector<64x96xf32>
    %20 = vector.extract_strided_slice %7 {offsets = [0, 0], sizes = [64, 32], strides = [1, 1]} : vector<72x32xf32> to vector<64x32xf32>
    %21 = vector.extract_strided_slice %11 {offsets = [0, 0], sizes = [64, 32], strides = [1, 1]} : vector<72x32xf32> to vector<64x32xf32>
    %22 = vector.extract_strided_slice %15 {offsets = [0, 0], sizes = [64, 32], strides = [1, 1]} : vector<72x32xf32> to vector<64x32xf32>
    %23 = tpu.concatenate %20, %21, %22 in 1 : vector<64x32xf32>, vector<64x32xf32>, vector<64x32xf32> -> vector<64x96xf32>
    %24 = vector.extract_strided_slice %11 {offsets = [0, 0], sizes = [64, 32], strides = [1, 1]} : vector<72x32xf32> to vector<64x32xf32>
    %25 = vector.extract_strided_slice %15 {offsets = [0, 0], sizes = [64, 32], strides = [1, 1]} : vector<72x32xf32> to vector<64x32xf32>
    %26 = vector.extract_strided_slice %3 {offsets = [1, 0], sizes = [64, 32], strides = [1, 1]} : vector<72x32xf32> to vector<64x32xf32>
    %27 = tpu.concatenate %24, %25, %26 in 1 : vector<64x32xf32>, vector<64x32xf32>, vector<64x32xf32> -> vector<64x96xf32>
    %28 = vector.extract_strided_slice %15 {offsets = [0, 0], sizes = [64, 32], strides = [1, 1]} : vector<72x32xf32> to vector<64x32xf32>
    %29 = vector.extract_strided_slice %3 {offsets = [1, 0], sizes = [64, 32], strides = [1, 1]} : vector<72x32xf32> to vector<64x32xf32>
    %30 = vector.extract_strided_slice %7 {offsets = [1, 0], sizes = [64, 32], strides = [1, 1]} : vector<72x32xf32> to vector<64x32xf32>
    %31 = tpu.concatenate %28, %29, %30 in 1 : vector<64x32xf32>, vector<64x32xf32>, vector<64x32xf32> -> vector<64x96xf32>
    %32 = tpu.concatenate %19, %23, %27, %31 in 0 : vector<64x96xf32>, vector<64x96xf32>, vector<64x96xf32>, vector<64x96xf32> -> vector<256x96xf32>
    %33 = arith.truncf %32 : vector<256x96xf32> to vector<256x96xbf16>
    %c0_11 = arith.constant 0 : index
    %c0_12 = arith.constant 0 : index
    %34 = vector.load %arg2[%c0_11, %c0_12] : memref<96x512xbf16, #tpu.memory_space<vmem>>, vector<96x512xbf16>
    %cst_13 = arith.constant dense<0.000000e+00> : vector<256x512xf32>
    %35 = tpu.matmul %33, %34, %cst_13 {dimension_numbers = #tpu.dot_dimension_numbers<[1], [0], [0], [1], [0, 0, 1, 1], [], []>} : vector<256x96xbf16>, vector<96x512xbf16>, vector<256x512xf32> -> vector<256x512xf32>
    %36 = vector.extract_strided_slice %35 {offsets = [0, 0], sizes = [256, 256], strides = [1, 1]} : vector<256x512xf32> to vector<256x256xf32>
    %37 = vector.extract_strided_slice %35 {offsets = [0, 256], sizes = [256, 256], strides = [1, 1]} : vector<256x512xf32> to vector<256x256xf32>
    %38 = arith.maximumf %36, %37 : vector<256x256xf32>
    %c0_14 = arith.constant 0 : index
    %c0_15 = arith.constant 0 : index
    %39 = vector.load %arg3[%c0_14, %c0_15] : memref<1x256xf32, #tpu.memory_space<vmem>>, vector<1x256xf32>
    %40 = vector.broadcast %39 : vector<1x256xf32> to vector<256x256xf32>
    %41 = arith.addf %38, %40 : vector<256x256xf32>
    %cst_16 = arith.constant 0.000000e+00 : f32
    %42 = vector.broadcast %cst_16 : f32 to vector<256x256xf32>
    %43 = arith.maximumf %41, %42 : vector<256x256xf32>
    %44 = vector.extract_strided_slice %43 {offsets = [0, 0], sizes = [64, 256], strides = [1, 1]} : vector<256x256xf32> to vector<64x256xf32>
    %45 = vector.extract_strided_slice %43 {offsets = [64, 0], sizes = [64, 256], strides = [1, 1]} : vector<256x256xf32> to vector<64x256xf32>
    %46 = arith.maximumf %44, %45 : vector<64x256xf32>
    %47 = vector.extract_strided_slice %43 {offsets = [128, 0], sizes = [64, 256], strides = [1, 1]} : vector<256x256xf32> to vector<64x256xf32>
    %48 = vector.extract_strided_slice %43 {offsets = [192, 0], sizes = [64, 256], strides = [1, 1]} : vector<256x256xf32> to vector<64x256xf32>
    %49 = arith.maximumf %47, %48 : vector<64x256xf32>
    %50 = tpu.iota {dimensions = array<i32: 0>} : vector<64x256xi32>
    %c7_i32 = arith.constant 7 : i32
    %51 = vector.broadcast %c7_i32 : i32 to vector<64x256xi32>
    %52 = arith.andi %50, %51 : vector<64x256xi32>
    %c7_i32_17 = arith.constant 7 : i32
    %53 = vector.broadcast %c7_i32_17 : i32 to vector<64x256xi32>
    %54 = arith.cmpi slt, %52, %53 : vector<64x256xi32>
    %cst_18 = arith.constant 0.000000e+00 : f32
    %55 = vector.broadcast %cst_18 : f32 to vector<64x256xf32>
    %56 = arith.select %54, %46, %55 : vector<64x256xi1>, vector<64x256xf32>
    %cst_19 = arith.constant 0.000000e+00 : f32
    %57 = vector.broadcast %cst_19 : f32 to vector<64x256xf32>
    %58 = arith.select %54, %49, %57 : vector<64x256xi1>, vector<64x256xf32>
    %cst_20 = arith.constant 0.000000e+00 : f32
    %59 = vector.broadcast %cst_20 : f32 to vector<8x256xf32>
    %60 = tpu.concatenate %59, %56, %59 in 0 : vector<8x256xf32>, vector<64x256xf32>, vector<8x256xf32> -> vector<80x256xf32>
    %61 = tpu.concatenate %59, %58, %59 in 0 : vector<8x256xf32>, vector<64x256xf32>, vector<8x256xf32> -> vector<80x256xf32>
    %62 = vector.extract_strided_slice %61 {offsets = [7, 0], sizes = [64, 256], strides = [1, 1]} : vector<80x256xf32> to vector<64x256xf32>
    %63 = vector.extract_strided_slice %60 {offsets = [8, 0], sizes = [64, 256], strides = [1, 1]} : vector<80x256xf32> to vector<64x256xf32>
    %64 = vector.extract_strided_slice %61 {offsets = [8, 0], sizes = [64, 256], strides = [1, 1]} : vector<80x256xf32> to vector<64x256xf32>
    %65 = tpu.concatenate %62, %63, %64 in 1 : vector<64x256xf32>, vector<64x256xf32>, vector<64x256xf32> -> vector<64x768xf32>
    %66 = vector.extract_strided_slice %60 {offsets = [8, 0], sizes = [64, 256], strides = [1, 1]} : vector<80x256xf32> to vector<64x256xf32>
    %67 = vector.extract_strided_slice %61 {offsets = [8, 0], sizes = [64, 256], strides = [1, 1]} : vector<80x256xf32> to vector<64x256xf32>
    %68 = vector.extract_strided_slice %60 {offsets = [9, 0], sizes = [64, 256], strides = [1, 1]} : vector<80x256xf32> to vector<64x256xf32>
    %69 = tpu.concatenate %66, %67, %68 in 1 : vector<64x256xf32>, vector<64x256xf32>, vector<64x256xf32> -> vector<64x768xf32>
    %70 = tpu.concatenate %65, %69 in 0 : vector<64x768xf32>, vector<64x768xf32> -> vector<128x768xf32>
    %71 = arith.truncf %70 : vector<128x768xf32> to vector<128x768xbf16>
    %c0_21 = arith.constant 0 : index
    %c0_22 = arith.constant 0 : index
    %72 = vector.load %arg4[%c0_21, %c0_22] : memref<768x512xbf16, #tpu.memory_space<vmem>>, vector<768x512xbf16>
    %cst_23 = arith.constant dense<0.000000e+00> : vector<128x512xf32>
    %73 = tpu.matmul %71, %72, %cst_23 {dimension_numbers = #tpu.dot_dimension_numbers<[1], [0], [0], [1], [0, 0, 1, 1], [], []>} : vector<128x768xbf16>, vector<768x512xbf16>, vector<128x512xf32> -> vector<128x512xf32>
    %74 = vector.extract_strided_slice %73 {offsets = [0, 0], sizes = [128, 256], strides = [1, 1]} : vector<128x512xf32> to vector<128x256xf32>
    %75 = vector.extract_strided_slice %73 {offsets = [0, 256], sizes = [128, 256], strides = [1, 1]} : vector<128x512xf32> to vector<128x256xf32>
    %76 = arith.maximumf %74, %75 : vector<128x256xf32>
    %c0_24 = arith.constant 0 : index
    %c0_25 = arith.constant 0 : index
    %77 = vector.load %arg5[%c0_24, %c0_25] : memref<1x256xf32, #tpu.memory_space<vmem>>, vector<1x256xf32>
    %78 = vector.broadcast %77 : vector<1x256xf32> to vector<128x256xf32>
    %79 = arith.addf %76, %78 : vector<128x256xf32>
    %cst_26 = arith.constant 0.000000e+00 : f32
    %80 = vector.broadcast %cst_26 : f32 to vector<128x256xf32>
    %81 = arith.maximumf %79, %80 : vector<128x256xf32>
    %82 = vector.extract_strided_slice %81 {offsets = [0, 0], sizes = [64, 256], strides = [1, 1]} : vector<128x256xf32> to vector<64x256xf32>
    %83 = vector.extract_strided_slice %81 {offsets = [64, 0], sizes = [64, 256], strides = [1, 1]} : vector<128x256xf32> to vector<64x256xf32>
    %84 = arith.maximumf %82, %83 : vector<64x256xf32>
    %85 = vector.shape_cast %84 : vector<64x256xf32> to vector<8x8x256xf32>
    %cst_27 = arith.constant 0.000000e+00 : f32
    %86 = vector.broadcast %cst_27 : f32 to vector<8x128xf32>
    %87 = vector.extract_strided_slice %85 {offsets = [0, 0, 0], sizes = [8, 1, 256], strides = [1, 1, 1]} : vector<8x8x256xf32> to vector<8x1x256xf32>
    %88 = vector.shape_cast %87 : vector<8x1x256xf32> to vector<8x256xf32>
    %89 = arith.truncf %88 : vector<8x256xf32> to vector<8x256xbf16>
    %c0_28 = arith.constant 0 : index
    %c0_29 = arith.constant 0 : index
    %c0_30 = arith.constant 0 : index
    %90 = vector.load %arg6[%c0_28, %c0_29, %c0_30] : memref<7x256x128xbf16, #tpu.memory_space<vmem>>, vector<1x256x128xbf16>
    %91 = vector.shape_cast %90 : vector<1x256x128xbf16> to vector<256x128xbf16>
    %cst_31 = arith.constant dense<0.000000e+00> : vector<8x128xf32>
    %92 = tpu.matmul %89, %91, %cst_31 {dimension_numbers = #tpu.dot_dimension_numbers<[1], [0], [0], [1], [0, 0, 1, 1], [], []>} : vector<8x256xbf16>, vector<256x128xbf16>, vector<8x128xf32> -> vector<8x128xf32>
    %93 = arith.addf %86, %92 : vector<8x128xf32>
    %94 = vector.extract_strided_slice %85 {offsets = [0, 1, 0], sizes = [8, 1, 256], strides = [1, 1, 1]} : vector<8x8x256xf32> to vector<8x1x256xf32>
    %95 = vector.shape_cast %94 : vector<8x1x256xf32> to vector<8x256xf32>
    %96 = arith.truncf %95 : vector<8x256xf32> to vector<8x256xbf16>
    %c1_32 = arith.constant 1 : index
    %c0_33 = arith.constant 0 : index
    %c0_34 = arith.constant 0 : index
    %97 = vector.load %arg6[%c1_32, %c0_33, %c0_34] : memref<7x256x128xbf16, #tpu.memory_space<vmem>>, vector<1x256x128xbf16>
    %98 = vector.shape_cast %97 : vector<1x256x128xbf16> to vector<256x128xbf16>
    %cst_35 = arith.constant dense<0.000000e+00> : vector<8x128xf32>
    %99 = tpu.matmul %96, %98, %cst_35 {dimension_numbers = #tpu.dot_dimension_numbers<[1], [0], [0], [1], [0, 0, 1, 1], [], []>} : vector<8x256xbf16>, vector<256x128xbf16>, vector<8x128xf32> -> vector<8x128xf32>
    %100 = arith.addf %93, %99 : vector<8x128xf32>
    %101 = vector.extract_strided_slice %85 {offsets = [0, 2, 0], sizes = [8, 1, 256], strides = [1, 1, 1]} : vector<8x8x256xf32> to vector<8x1x256xf32>
    %102 = vector.shape_cast %101 : vector<8x1x256xf32> to vector<8x256xf32>
    %103 = arith.truncf %102 : vector<8x256xf32> to vector<8x256xbf16>
    %c2_36 = arith.constant 2 : index
    %c0_37 = arith.constant 0 : index
    %c0_38 = arith.constant 0 : index
    %104 = vector.load %arg6[%c2_36, %c0_37, %c0_38] : memref<7x256x128xbf16, #tpu.memory_space<vmem>>, vector<1x256x128xbf16>
    %105 = vector.shape_cast %104 : vector<1x256x128xbf16> to vector<256x128xbf16>
    %cst_39 = arith.constant dense<0.000000e+00> : vector<8x128xf32>
    %106 = tpu.matmul %103, %105, %cst_39 {dimension_numbers = #tpu.dot_dimension_numbers<[1], [0], [0], [1], [0, 0, 1, 1], [], []>} : vector<8x256xbf16>, vector<256x128xbf16>, vector<8x128xf32> -> vector<8x128xf32>
    %107 = arith.addf %100, %106 : vector<8x128xf32>
    %108 = vector.extract_strided_slice %85 {offsets = [0, 3, 0], sizes = [8, 1, 256], strides = [1, 1, 1]} : vector<8x8x256xf32> to vector<8x1x256xf32>
    %109 = vector.shape_cast %108 : vector<8x1x256xf32> to vector<8x256xf32>
    %110 = arith.truncf %109 : vector<8x256xf32> to vector<8x256xbf16>
    %c3_40 = arith.constant 3 : index
    %c0_41 = arith.constant 0 : index
    %c0_42 = arith.constant 0 : index
    %111 = vector.load %arg6[%c3_40, %c0_41, %c0_42] : memref<7x256x128xbf16, #tpu.memory_space<vmem>>, vector<1x256x128xbf16>
    %112 = vector.shape_cast %111 : vector<1x256x128xbf16> to vector<256x128xbf16>
    %cst_43 = arith.constant dense<0.000000e+00> : vector<8x128xf32>
    %113 = tpu.matmul %110, %112, %cst_43 {dimension_numbers = #tpu.dot_dimension_numbers<[1], [0], [0], [1], [0, 0, 1, 1], [], []>} : vector<8x256xbf16>, vector<256x128xbf16>, vector<8x128xf32> -> vector<8x128xf32>
    %114 = arith.addf %107, %113 : vector<8x128xf32>
    %115 = vector.extract_strided_slice %85 {offsets = [0, 4, 0], sizes = [8, 1, 256], strides = [1, 1, 1]} : vector<8x8x256xf32> to vector<8x1x256xf32>
    %116 = vector.shape_cast %115 : vector<8x1x256xf32> to vector<8x256xf32>
    %117 = arith.truncf %116 : vector<8x256xf32> to vector<8x256xbf16>
    %c4 = arith.constant 4 : index
    %c0_44 = arith.constant 0 : index
    %c0_45 = arith.constant 0 : index
    %118 = vector.load %arg6[%c4, %c0_44, %c0_45] : memref<7x256x128xbf16, #tpu.memory_space<vmem>>, vector<1x256x128xbf16>
    %119 = vector.shape_cast %118 : vector<1x256x128xbf16> to vector<256x128xbf16>
    %cst_46 = arith.constant dense<0.000000e+00> : vector<8x128xf32>
    %120 = tpu.matmul %117, %119, %cst_46 {dimension_numbers = #tpu.dot_dimension_numbers<[1], [0], [0], [1], [0, 0, 1, 1], [], []>} : vector<8x256xbf16>, vector<256x128xbf16>, vector<8x128xf32> -> vector<8x128xf32>
    %121 = arith.addf %114, %120 : vector<8x128xf32>
    %122 = vector.extract_strided_slice %85 {offsets = [0, 5, 0], sizes = [8, 1, 256], strides = [1, 1, 1]} : vector<8x8x256xf32> to vector<8x1x256xf32>
    %123 = vector.shape_cast %122 : vector<8x1x256xf32> to vector<8x256xf32>
    %124 = arith.truncf %123 : vector<8x256xf32> to vector<8x256xbf16>
    %c5 = arith.constant 5 : index
    %c0_47 = arith.constant 0 : index
    %c0_48 = arith.constant 0 : index
    %125 = vector.load %arg6[%c5, %c0_47, %c0_48] : memref<7x256x128xbf16, #tpu.memory_space<vmem>>, vector<1x256x128xbf16>
    %126 = vector.shape_cast %125 : vector<1x256x128xbf16> to vector<256x128xbf16>
    %cst_49 = arith.constant dense<0.000000e+00> : vector<8x128xf32>
    %127 = tpu.matmul %124, %126, %cst_49 {dimension_numbers = #tpu.dot_dimension_numbers<[1], [0], [0], [1], [0, 0, 1, 1], [], []>} : vector<8x256xbf16>, vector<256x128xbf16>, vector<8x128xf32> -> vector<8x128xf32>
    %128 = arith.addf %121, %127 : vector<8x128xf32>
    %129 = vector.extract_strided_slice %85 {offsets = [0, 6, 0], sizes = [8, 1, 256], strides = [1, 1, 1]} : vector<8x8x256xf32> to vector<8x1x256xf32>
    %130 = vector.shape_cast %129 : vector<8x1x256xf32> to vector<8x256xf32>
    %131 = arith.truncf %130 : vector<8x256xf32> to vector<8x256xbf16>
    %c6 = arith.constant 6 : index
    %c0_50 = arith.constant 0 : index
    %c0_51 = arith.constant 0 : index
    %132 = vector.load %arg6[%c6, %c0_50, %c0_51] : memref<7x256x128xbf16, #tpu.memory_space<vmem>>, vector<1x256x128xbf16>
    %133 = vector.shape_cast %132 : vector<1x256x128xbf16> to vector<256x128xbf16>
    %cst_52 = arith.constant dense<0.000000e+00> : vector<8x128xf32>
    %134 = tpu.matmul %131, %133, %cst_52 {dimension_numbers = #tpu.dot_dimension_numbers<[1], [0], [0], [1], [0, 0, 1, 1], [], []>} : vector<8x256xbf16>, vector<256x128xbf16>, vector<8x128xf32> -> vector<8x128xf32>
    %135 = arith.addf %128, %134 : vector<8x128xf32>
    %c0_53 = arith.constant 0 : index
    %c0_54 = arith.constant 0 : index
    %136 = vector.load %arg7[%c0_53, %c0_54] : memref<1x128xf32, #tpu.memory_space<vmem>>, vector<1x128xf32>
    %137 = vector.broadcast %136 : vector<1x128xf32> to vector<8x128xf32>
    %138 = arith.addf %135, %137 : vector<8x128xf32>
    %cst_55 = arith.constant 0.000000e+00 : f32
    %139 = vector.broadcast %cst_55 : f32 to vector<8x128xf32>
    %140 = arith.maximumf %138, %139 : vector<8x128xf32>
    %141 = arith.truncf %140 : vector<8x128xf32> to vector<8x128xbf16>
    %c0_56 = arith.constant 0 : index
    %c0_57 = arith.constant 0 : index
    %142 = vector.load %arg8[%c0_56, %c0_57] : memref<128x128xbf16, #tpu.memory_space<vmem>>, vector<128x128xbf16>
    %cst_58 = arith.constant dense<0.000000e+00> : vector<8x128xf32>
    %143 = tpu.matmul %141, %142, %cst_58 {dimension_numbers = #tpu.dot_dimension_numbers<[1], [0], [0], [1], [0, 0, 1, 1], [], []>} : vector<8x128xbf16>, vector<128x128xbf16>, vector<8x128xf32> -> vector<8x128xf32>
    %c0_59 = arith.constant 0 : index
    %c0_60 = arith.constant 0 : index
    %144 = vector.load %arg9[%c0_59, %c0_60] : memref<1x128xf32, #tpu.memory_space<vmem>>, vector<1x128xf32>
    %145 = vector.broadcast %144 : vector<1x128xf32> to vector<8x128xf32>
    %146 = arith.addf %143, %145 : vector<8x128xf32>
    %c0_61 = arith.constant 0 : index
    %c0_62 = arith.constant 0 : index
    %147 = vector.load %arg10[%c0_61, %c0_62] : memref<8x128xf32, #tpu.memory_space<vmem>>, vector<8x128xf32>
    tpu.vector_store %arg10[%c0_61, %c0_62], %146 {strides = array<i32>} : memref<8x128xf32, #tpu.memory_space<vmem>>, vector<8x128xf32>,
    return
  }
  func.func @transform_0(%arg0: i32) -> (i32, i32, i32) {
    %c0_i32 = arith.constant 0 : i32
    %c0_i32_0 = arith.constant 0 : i32
    %c0_i32_1 = arith.constant 0 : i32
    return %c0_i32, %arg0, %c0_i32_0 : i32, i32, i32
  }
  func.func @transform_1(%arg0: i32) -> (i32, i32) {
    %c0_i32 = arith.constant 0 : i32
    %c0_i32_0 = arith.constant 0 : i32
    %c0_i32_1 = arith.constant 0 : i32
    return %c0_i32, %c0_i32_0 : i32, i32
  }
  func.func @transform_2(%arg0: i32) -> (i32, i32) {
    %c0_i32 = arith.constant 0 : i32
    %c0_i32_0 = arith.constant 0 : i32
    %c0_i32_1 = arith.constant 0 : i32
    return %c0_i32, %c0_i32_0 : i32, i32
  }
  func.func @transform_3(%arg0: i32) -> (i32, i32) {
    %c0_i32 = arith.constant 0 : i32
    %c0_i32_0 = arith.constant 0 : i32
    %c0_i32_1 = arith.constant 0 : i32
    return %c0_i32, %c0_i32_0 : i32, i32
  }
  func.func @transform_4(%arg0: i32) -> (i32, i32) {
    %c0_i32 = arith.constant 0 : i32
    %c0_i32_0 = arith.constant 0 : i32
    %c0_i32_1 = arith.constant 0 : i32
    return %c0_i32, %c0_i32_0 : i32, i32
  }
  func.func @transform_5(%arg0: i32) -> (i32, i32, i32) {
    %c0_i32 = arith.constant 0 : i32
    %c0_i32_0 = arith.constant 0 : i32
    %c0_i32_1 = arith.constant 0 : i32
    %c0_i32_2 = arith.constant 0 : i32
    return %c0_i32, %c0_i32_0, %c0_i32_1 : i32, i32, i32
  }
  func.func @transform_6(%arg0: i32) -> (i32, i32) {
    %c0_i32 = arith.constant 0 : i32
    %c0_i32_0 = arith.constant 0 : i32
    %c0_i32_1 = arith.constant 0 : i32
    return %c0_i32, %c0_i32_0 : i32, i32
  }
  func.func @transform_7(%arg0: i32) -> (i32, i32) {
    %c0_i32 = arith.constant 0 : i32
    %c0_i32_0 = arith.constant 0 : i32
    %c0_i32_1 = arith.constant 0 : i32
    return %c0_i32, %c0_i32_0 : i32, i32
  }
  func.func @transform_8(%arg0: i32) -> (i32, i32) {
    %c0_i32 = arith.constant 0 : i32
    %c0_i32_0 = arith.constant 0 : i32
    %c0_i32_1 = arith.constant 0 : i32
    return %c0_i32, %c0_i32_0 : i32, i32
  }
  func.func @transform_9(%arg0: i32) -> (i32, i32) {
    %c0_i32 = arith.constant 0 : i32
    %c0_i32_0 = arith.constant 0 : i32
    return %arg0, %c0_i32 : i32, i32
  }
}

</mosaic_0001>

<bundles_post_ra>
// kernel: cnn_forward.1
= control target key start
LH: loop header
LB: loop body
LE: loop exit
PB: predicated region body
PF: predicated region fallthrough
CT: control target
= control target key end

     0   :  { %14 = vsyncpa [#allocation3], 0  ;;  %s10865_s0 = inlined_call_operand.vmem [shape: f32[4,64,32], index: 0, kind: input, shape index: {}]   ;;  %s10866_s1 = inlined_call_operand.hbm [shape: bf16[96,512], index: 1, kind: input, shape index: {}]   ;;  %s10867_s2 = inlined_call_operand.vmem [shape: f32[1,256], index: 2, kind: input, shape index: {}]   ;;  %s10868_s3 = inlined_call_operand.hbm [shape: bf16[768,512], index: 3, kind: input, shape index: {}]   ;;  %s10869_s4 = inlined_call_operand.vmem [shape: f32[1,256], index: 4, kind: input, shape index: {}]   ;;  %s10870_s5 = inlined_call_operand.vmem [shape: bf16[7,256,128], index: 5, kind: input, shape index: {}]   ;;  %s10871_s6 = inlined_call_operand.vmem [shape: f32[1,128], index: 6, kind: input, shape index: {}]   ;;  %s10872_s7 = inlined_call_operand.hbm [shape: bf16[128,128], index: 7, kind: input, shape index: {}]   ;;  %s10873_s8 = inlined_call_operand.vmem [shape: f32[1,128], index: 8, kind: input, shape index: {}]   ;;  %s10874_s9 = inlined_call_operand.vmem [shape: f32[8,128], index: 9, kind: output, shape index: {}]  }
   0x1   :  { %15 = vsyncpa [#allocation5], 0  ;;  %s37_s11 = sshll.u32 %s10868_s3, 4  ;;  %s7911_s12 = smov [#allocation4]   ;;  %s38_s11 = int_to_ptr.hbm [resolvable:$true] %s37_s11 }
   0x2   :  { %s39_s13 = sshll.u32 %s7911_s12, 4  ;;  %s22_s16 = sshll.u32 %s10866_s1, 4  ;;  %s40_s13 = int_to_ptr.vmem [resolvable:$true] %s39_s13  ;;  %s23_s16 = int_to_ptr.hbm [resolvable:$true] %s22_s16 }
   0x3   :  { %s7912_s17 = smov 256   ;;  %s7913_s18 = smov 16  }
   0x4   :  { %45 = dma.hbm_to_vmem [thread:$0]  %s38_s11, 24576, %s40_s13, [#allocation5], %s7912_s17, %s7912_s17, %s7913_s18  }
   0x5   :  { %s7914_s19 = smov [#allocation2]   ;;  %s56_s23 = sshll.u32 %s10872_s7, 4  ;;  %s57_s23 = int_to_ptr.hbm [resolvable:$true] %s56_s23 }
   0x6   :  { %s24_s20 = sshll.u32 %s7914_s19, 4  ;;  %s7915_s3 = smov [#allocation6]   ;;  %s25_s20 = int_to_ptr.vmem [resolvable:$true] %s24_s20 }
   0x7   :  { %30 = dma.hbm_to_vmem [thread:$0]  %s23_s16, 3072, %s25_s20, [#allocation3], %s7912_s17, %s7912_s17, %s7913_s18  }
   0x8   :  { %s58_s24 = sshll.u32 %s7915_s3, 4  ;;  %s7916_s25 = smov 64   ;;  %s59_s24 = int_to_ptr.vmem [resolvable:$true] %s58_s24 }
   0x9   :  { %s7917_s26 = smov 4  }
   0xa   :  { %64 = dma.hbm_to_vmem [thread:$0]  %s57_s23, 1024, %s59_s24, [#allocation5], %s7916_s25, %s7916_s25, %s7917_s26  }
   0xb   :  { %7907 = dma.done.wait [#allocation3], 3072  }
   0xc   :  { %7908 = vsyncadd [#allocation3], 4294964224 }
   0xd   :  { %7909 = dma.done.wait [#allocation5], 25600  }
   0xe   :  { %7910 = vsyncadd [#allocation5], 4294941696  ;;  %v7984_v0 = vld [vmem:[%s10865_s0 + $0x40] sm:$0xff]  ;;  %v7989_v1 = vld [vmem:[%s10865_s0 + $0x48] sm:$0xff]  ;;  %s7918_s14 = smov 32   ;;  %vm302_vm0 = vcmask 1046528  }
   0xf   :  { %v7670_v2 = vpack.i.bf16 %v7989_v1, %v7984_v0  ;;  %v7996_v3 = vld [vmem:[%s10865_s0 + $0x50] sm:$0xff]  ;;  %v8001_v4 = vld [vmem:[%s10865_s0 + $0x58] sm:$0xff]  ;;  %v8008_v6 = vld [vmem:[%s10865_s0 + $0x60] sm:$0xff]  ;;  %vm179_vm1 = vcmask 261120   ;;  %vm188_vm2 = vcmask 523264   ;;  %vm600_vm3 = vcmask 785408  }
  0x10   :  { %v7680_v5 = vpack.i.bf16 %v8001_v4, %v7996_v3  ;;  %v8014_v7 = vld [vmem:[%s10865_s0 + $0x68] sm:$0xff]  ;;  %v8019_v8 = vld [vmem:[%s10865_s0 + $0x80] sm:$0xff]  ;;  %v8032_v11 = vld [vmem:[%s10865_s0 + $0x90] sm:$0xff]  ;;  %vm1402_vm6 = vcmask 1040384  }
  0x11   :  { %7671 = vrot.lane.b32.xlu0 %v7670_v2, %s7918_s14  ;;  %v8024_v9 = vld [vmem:[%s10865_s0 + $0x88] sm:$0xff]  ;;  %v7690_v10 = vpack.i.bf16 %v8014_v7, %v8008_v6  ;;  %v8037_v12 = vld [vmem:[%s10865_s0 + $0x98] sm:$0xff]  ;;  %v8043_v13 = vld [vmem:[%s10865_s0 + $0xa0] sm:$0xff] }
  0x12   :  { %7681 = vrot.lane.b32.xlu1 %v7680_v5, %s7918_s14  ;;  %v8048_v14 = vld [vmem:[%s10865_s0 + $0xa8] sm:$0xff]  ;;  %v5615_v15 = vld [vmem:[#allocation2 + $0xa0] sm:$0xf]  ;;  %v7675_v16 = vpack.i.bf16 %v8024_v9, %v8019_v8  ;;  %v7347_v17 = vld [vmem:[#allocation2 + $0xac] sm:$0xf0]  ;;  %v8054_v20 = vpack.i.bf16 %v8037_v12, %v8032_v11 }
  0x13   :  { %7691 = vrot.lane.b32.xlu2 %v7690_v10, %s7918_s14  ;;  %v7345_v18 = vld [vmem:[#allocation2 + $0xa4] sm:$0xf]  ;;  %v5617_v19 = vld [vmem:[#allocation2 + $0xb0] sm:$0xf0]  ;;  %v5616_v21 = vor.u32 %v7347_v17, %v5615_v15  ;;  %v5623_v23 = vld [vmem:[#allocation2 + $0xa8] sm:$0xf]  ;;  %v7695_v32 = vpack.i.bf16 %v8048_v14, %v8043_v13 }
  0x14   :  { %v5620_v22 = vor.u32 %v7345_v18, %v5617_v19  ;;  %v7348_v24 = vld [vmem:[#allocation2 + $0xb4] sm:$0xf0]  ;;  %v7346_v25 = vld [vmem:[#allocation2 + $0xac] sm:$0xf]  ;;  %v5625_v27 = vld [vmem:[#allocation2 + $0xb8] sm:$0xf0] }
  0x15   :  { %v5624_v26 = vor.u32 %v7348_v24, %v5623_v23  ;;  %v5599_v28 = vld [vmem:[#allocation2 + $0x80] sm:$0xf]  ;;  %v7343_v29 = vld [vmem:[#allocation2 + $0x8c] sm:$0xf0]  ;;  %v8064_v31 = vld [vmem:[%s10865_s0 + $0x78] sm:$0xff]  ;;  %651 = vmatpush.bf16.msra.mxu0 %v5616_v21  ;;  %v5628_v33 = vor.u32 %v7346_v25, %v5625_v27 }
  0x16   :  { %v8059_v30 = vld [vmem:[%s10865_s0 + $0x70] sm:$0xff]  ;;  %740 = vmatpush.bf16.msra.mxu1 %v5620_v22  ;;  %v5600_v34 = vor.u32 %v7343_v29, %v5599_v28  ;;  %v7341_v35 = vld [vmem:[#allocation2 + $0x84] sm:$0xf]  ;;  %v5607_v37 = vld [vmem:[#allocation2 + $0x88] sm:$0xf] }
  0x17   :  { %v5601_v36 = vld [vmem:[#allocation2 + $0x90] sm:$0xf0]  ;;  %829 = vmatpush.bf16.msra.mxu2 %v5624_v26  ;;  %v7344_v39 = vld [vmem:[#allocation2 + $0x94] sm:$0xf0]  ;;  %v7342_v40 = vld [vmem:[#allocation2 + $0x8c] sm:$0xf]  ;;  %918 = vmatpush.bf16.msra.mxu3 %v5628_v33  ;;  %v7700_v54 = vpack.i.bf16 %v8064_v31, %v8059_v30 }
  0x18   :  { %v5604_v38 = vor.u32 %v7341_v35, %v5601_v36  ;;  %v5609_v41 = vld [vmem:[#allocation2 + $0x98] sm:$0xf0]  ;;  %v8074_v42 = vld [vmem:[%s10865_s0 + $0xb0] sm:$0xff]  ;;  %v5608_v44 = vor.u32 %v7344_v39, %v5607_v37  ;;  %v5583_v46 = vld [vmem:[#allocation2 + $0x60] sm:$0xf] }
  0x19   :  { %7676 = vrot.lane.b32.xlu0 %v7675_v16, %s7916_s25  ;;  %v8079_v43 = vld [vmem:[%s10865_s0 + $0xb8] sm:$0xff]  ;;  %v5612_v45 = vor.u32 %v7342_v40, %v5609_v41  ;;  %v7339_v47 = vld [vmem:[#allocation2 + $0x6c] sm:$0xf0]  ;;  %v7337_v48 = vld [vmem:[#allocation2 + $0x64] sm:$0xf]  ;;  %652 = vmatpush.bf16.msra.mxu0 %v5600_v34 }
  0x1a   :  { %7686 = vrot.lane.b32.xlu1 %v8054_v20, %s7916_s25  ;;  %v5585_v49 = vld [vmem:[#allocation2 + $0x70] sm:$0xf0]  ;;  %v5584_v50 = vor.u32 %v7339_v47, %v5583_v46  ;;  %v5591_v51 = vld [vmem:[#allocation2 + $0x68] sm:$0xf]  ;;  %v7340_v52 = vld [vmem:[#allocation2 + $0x74] sm:$0xf0]  ;;  %741 = vmatpush.bf16.msra.mxu1 %v5604_v38  ;;  %v8086_v57 = vpack.i.bf16 %v8079_v43, %v8074_v42 }
  0x1b   :  { %7696 = vrot.lane.b32.xlu2 %v7695_v32, %s7916_s25  ;;  %v7338_v53 = vld [vmem:[#allocation2 + $0x6c] sm:$0xf]  ;;  %830 = vmatpush.bf16.msra.mxu2 %v5608_v44  ;;  %v5588_v55 = vor.u32 %v7337_v48, %v5585_v49  ;;  %v5593_v56 = vld [vmem:[#allocation2 + $0x78] sm:$0xf0]  ;;  %v5592_v58 = vor.u32 %v7340_v52, %v5591_v51  ;;  %v8094_v60 = vld [vmem:[%s10865_s0 + $0xc0] sm:$0xff] }
  0x1c   :  { %919 = vmatpush.bf16.msra.mxu3 %v5612_v45  ;;  %v5596_v59 = vor.u32 %v7338_v53, %v5593_v56  ;;  %v8099_v61 = vld [vmem:[%s10865_s0 + $0xc8] sm:$0xff]  ;;  %v8109_v63 = vld [vmem:[%s10865_s0 + $0xd0] sm:$0xff]  ;;  %v8114_v2 = vld [vmem:[%s10865_s0 + $0xd8] sm:$0xff] }
  0x1d   :  { %653 = vmatpush.bf16.msra.mxu0 %v5584_v50  ;;  %v8104_v62 = vpack.i.bf16 %v8099_v61, %v8094_v60  ;;  %v8118_v5 = vpack.i.bf16 %v8114_v2, %v8109_v63  ;;  %v5529_v10 = vld [vmem:[%s10865_s0 + $0xe0] sm:$0xff]  ;;  %v8130_v15 = vld [vmem:[%s10865_s0 + $0xe8] sm:$0xff]  ;;  %v7335_v18 = vld [vmem:[#allocation2 + $0x4c] sm:$0xf0] }
  0x1e   :  { %742 = vmatpush.bf16.msra.mxu1 %v5588_v55  ;;  %v5567_v17 = vld [vmem:[#allocation2 + $0x40] sm:$0xf]  ;;  %v7333_v19 = vld [vmem:[#allocation2 + $0x44] sm:$0xf]  ;;  %v5569_v21 = vld [vmem:[#allocation2 + $0x50] sm:$0xf0] }
  0x1f   :  { %831 = vmatpush.bf16.msra.mxu2 %v5592_v58  ;;  %v5572_v22 = vor.u32 %v7333_v19, %v5569_v21  ;;  %v5575_v23 = vld [vmem:[#allocation2 + $0x48] sm:$0xf]  ;;  %v7336_v24 = vld [vmem:[#allocation2 + $0x54] sm:$0xf0]  ;;  %v7334_v25 = vld [vmem:[#allocation2 + $0x4c] sm:$0xf] }
  0x20   :  { %920 = vmatpush.bf16.msra.mxu3 %v5596_v59  ;;  %v5576_v26 = vor.u32 %v7336_v24, %v5575_v23  ;;  %v5577_v27 = vld [vmem:[#allocation2 + $0x58] sm:$0xf0]  ;;  %v5531_v28 = vld [vmem:[%s10865_s0 + $0xf0] sm:$0xff]  ;;  %v5551_v34 = vld [vmem:[#allocation2 + $0x20] sm:$0xf] }
  0x21   :  { %7701 = vrot.lane.b32.xlu0 %v7700_v54, %s7918_s14  ;;  %v5532_v29 = vld [vmem:[%s10865_s0 + $0xf8] sm:$0xff]  ;;  %v7331_v35 = vld [vmem:[#allocation2 + $0x2c] sm:$0xf0]  ;;  %v7329_v36 = vld [vmem:[#allocation2 + $0x24] sm:$0xf] }
  0x22   :  { %7706 = vrot.lane.b32.xlu1 %v8086_v57, %s7916_s25  ;;  %743 = vmatpush.bf16.msra.mxu1 %v5572_v22  ;;  %v8146_v33 = vpack.i.bf16 %v5532_v29, %v5531_v28  ;;  %v5552_v37 = vor.u32 %v7331_v35, %v5551_v34  ;;  %v5553_v38 = vld [vmem:[#allocation2 + $0x30] sm:$0xf0]  ;;  %v5559_v39 = vld [vmem:[#allocation2 + $0x28] sm:$0xf]  ;;  %v7332_v40 = vld [vmem:[#allocation2 + $0x34] sm:$0xf0] }
  0x23   :  { %7711 = vrot.lane.b32.xlu2 %v7675_v16, %s7918_s14  ;;  %v8135_v16 = vpack.i.bf16 %v8130_v15, %v5529_v10  ;;  %832 = vmatpush.bf16.msra.mxu2 %v5576_v26  ;;  %v5556_v41 = vor.u32 %v7329_v36, %v5553_v38  ;;  %v5560_v44 = vor.u32 %v7332_v40, %v5559_v39  ;;  %v7330_v45 = vld [vmem:[#allocation2 + $0x2c] sm:$0xf]  ;;  %v5561_v46 = vld [vmem:[#allocation2 + $0x38] sm:$0xf0]  ;;  %v5535_v48 = vld [vmem:[#allocation2] sm:$0xf] }
  0x24   :  { %v5564_v47 = vor.u32 %v7330_v45, %v5561_v46  ;;  %v7327_v49 = vld [vmem:[#allocation2 + $0xc] sm:$0xf0]  ;;  %v7325_v50 = vld [vmem:[#allocation2 + $0x4] sm:$0xf]  ;;  %v5537_v52 = vld [vmem:[#allocation2 + $0x10] sm:$0xf0] }
  0x25   :  { %v5536_v51 = vor.u32 %v7327_v49, %v5535_v48  ;;  %v5543_v53 = vld [vmem:[#allocation2 + $0x8] sm:$0xf]  ;;  %v7328_v54 = vld [vmem:[#allocation2 + $0x14] sm:$0xf0]  ;;  %v5540_v55 = vor.u32 %v7325_v50, %v5537_v52  ;;  %v7326_v58 = vld [vmem:[#allocation2 + $0xc] sm:$0xf] }
  0x26   :  { %744 = vmatpush.bf16.msra.mxu1 %v5556_v41  ;;  %v5544_v56 = vor.u32 %v7328_v54, %v5543_v53  ;;  %v5545_v59 = vld [vmem:[#allocation2 + $0x18] sm:$0xf0]  ;;  %v81_v22 = vld [vmem:[%s10865_s0 + $0x8] sm:$0xff]  ;;  %v86_v48 = vld [vmem:[%s10865_s0 + $0x30] sm:$0xff] }
  0x27   :  { %833 = vmatpush.bf16.msra.mxu2 %v5560_v44  ;;  %v5548_v10 = vor.u32 %v7326_v58, %v5545_v59  ;;  %v83_v19 = vld [vmem:[%s10865_s0 + $0x18] sm:$0xff]  ;;  %v304_v26 = vrot.slane %v81_v22, 1  ;;  %v314_v50 = vrot.slane %v86_v48, 1 }
  0x28   :  { %v308_v21 = vrot.slane %v83_v19, 1 }
  0x29   :  { %7716 = vrot.lane.b32.xlu0 %v8104_v62, %s7916_s25 }
  0x2a   :  { %7721 = vrot.lane.b32.xlu1 %v8054_v20, %s7918_s14  ;;  %v5568_v20 = vor.u32 %v7335_v18, %v5567_v17  ;;  %745 = vmatpush.bf16.msra.mxu1 %v5540_v55  ;;  %v8157_v17 = vld [vmem:[%s10865_s0 + $0x20] sm:$0xff]  ;;  %v82_v18 = vld [vmem:[%s10865_s0 + $0x10] sm:$0xff] }
  0x2b   :  { %7726 = vrot.lane.b32.xlu2 %v8118_v5, %s7916_s25  ;;  %834 = vmatpush.bf16.msra.mxu2 %v5544_v56  ;;  %v310_v23 = vrot.slane %v8157_v17, 1 }
  0x2c   :  { %654 = vmatpush.bf16.msra.mxu0 %v5568_v20  ;;  %v306_v20 = vrot.slane %v82_v18, 1 }
  0x2e   :  { %v309_v24 = vsel %vm302_vm0, %v306_v20, %v308_v21 }
  0x30   :  { %655 = vmatpush.bf16.msra.mxu0 %v5552_v37 }
  0x31   :  { %7731 = vrot.lane.b32.xlu0 %v7695_v32, %s7918_s14  ;;  %v5580_v32 = vor.u32 %v7334_v25, %v5577_v27  ;;  %v311_v27 = vsel %vm302_vm0, %v308_v21, %v310_v23 }
  0x32   :  { %7736 = vrot.lane.b32.xlu1 %v8135_v16, %s7916_s25  ;;  %v8176_v28 = vpack.i.bf16 %v311_v27, %v309_v24 }
  0x33   :  { %921 = vmatpush.bf16.msra.mxu3 %v5580_v32  ;;  %7741 = vrot.lane.b32.xlu2 %v8086_v57, %s7918_s14  ;;  %v80_v57 = vld [vmem:[%s10865_s0] sm:$0xff]  ;;  %v307_v32 = vsel %vm302_vm0, %v304_v26, %v306_v20 }
  0x34   :  { %656 = vmatpush.bf16.msra.mxu0 %v5536_v51  ;;  %v303_v25 = vrot.slane %v80_v57, 1 }
  0x36   :  { %v305_v29 = vsel %vm302_vm0, %v303_v25, %v304_v26 }
  0x37   :  { %922 = vmatpush.bf16.msra.mxu3 %v5564_v47  ;;  %v7755_v36 = vpack.i.bf16 %v307_v32, %v305_v29  ;;  %v85_v47 = vld [vmem:[%s10865_s0 + $0x28] sm:$0xff] }
  0x38   :  { %v312_v49 = vrot.slane %v85_v47, 1 }
  0x39   :  { %7746 = vrot.lane.b32.xlu0 %v8146_v33, %s7916_s25 }
  0x3a   :  { %7751 = vrot.lane.b32.xlu1 %v8104_v62, %s7918_s14  ;;  %v313_v51 = vsel %vm302_vm0, %v310_v23, %v312_v49  ;;  %v315_v55 = vsel %vm302_vm0, %v312_v49, %v314_v50 }
  0x3b   :  { %923 = vmatpush.bf16.msra.mxu3 %v5548_v10  ;;  %7756 = vrot.lane.b32.xlu2 %v7755_v36, %s7916_s25  ;;  %v7775_v56 = vpack.i.bf16 %v315_v55, %v313_v51 }
  0x41   :  { %7761 = vrot.lane.b32.xlu0 %v8118_v5, %s7918_s14 }
  0x42   :  { %7766 = vrot.lane.b32.xlu1 %v8176_v28, %s7916_s25 }
  0x43   :  { %7771 = vrot.lane.b32.xlu2 %v8135_v16, %s7918_s14  ;;  %v387_v16 = vrot.slane %v7996_v3, 1 }
  0x49   :  { %7776 = vrot.lane.b32.xlu0 %v7775_v56, %s7916_s25 }
  0x4a   :  { %7781 = vrot.lane.b32.xlu1 %v8146_v33, %s7918_s14  ;;  %v384_v33 = vrot.slane %v7984_v0, 1 }
  0x51   :  { %7791 = vrot.lane.b32.xlu0 %v7755_v36, %s7918_s14 }
  0x6d   :  { %v7692_v21 = vpop.permute.xlu2 %7691 }
  0x75   :  { %v7697_v23 = vpop.permute.xlu2 %7696 }
  0x76   :  { %v7699_v24 = vunpack.i.h.bf16 %v7697_v23  ;;  %v7698_v25 = vunpack.i.l.bf16 %v7697_v23 }
  0x83   :  { %v7672_v62 = vpop.permute.xlu0 %7671 }
  0x84   :  { %v7674_v34 = vunpack.i.h.bf16 %v7672_v62  ;;  %v7673_v35 = vunpack.i.l.bf16 %v7672_v62  ;;  %v7682_v37 = vpop.permute.xlu1 %7681 }
  0x85   :  { %v7684_v52 = vunpack.i.h.bf16 %v7682_v37  ;;  %v7683_v53 = vunpack.i.l.bf16 %v7682_v37 }
  0x86   :  { %v180_v40 = vsel %vm179_vm1, %v80_v57, %v7673_v35  ;;  %v181_v41 = vsel %vm179_vm1, %v81_v22, %v7674_v34  ;;  %v385_v34 = vrot.slane %v7989_v1, 1 }
  0x87   :  { %v182_v10 = vsel %vm179_vm1, %v82_v18, %v7683_v53  ;;  %v183_v20 = vsel %vm179_vm1, %v83_v19, %v7684_v52  ;;  %v7694_v18 = vunpack.i.h.bf16 %v7692_v21  ;;  %v7693_v19 = vunpack.i.l.bf16 %v7692_v21  ;;  %v7712_v21 = vpop.permute.xlu2 %7711 }
  0x88   :  { %v388_v37 = vsel %vm302_vm0, %v385_v34, %v387_v16 }
  0x89   :  { %v184_v26 = vsel %vm179_vm1, %v8157_v17, %v7693_v19  ;;  %v185_v27 = vsel %vm179_vm1, %v85_v47, %v7694_v18  ;;  %v87_v17 = vld [vmem:[%s10865_s0 + $0x38] sm:$0xff] }
  0x8a   :  { %v193_v29 = vsel %vm188_vm2, %v184_v26, %v7698_v25  ;;  %v194_v32 = vsel %vm188_vm2, %v185_v27, %v7699_v24 }
  0x8b   :  { %v7677_v5 = vpop.permute.xlu0 %7676  ;;  %v442_v35 = vpack.c.bf16 %v194_v32, %v193_v29 }
  0x8c   :  { %v7679_v38 = vunpack.i.h.bf16 %v7677_v5  ;;  %v7678_v39 = vunpack.i.l.bf16 %v7677_v5  ;;  %v7687_v54 = vpop.permute.xlu1 %7686  ;;  %v386_v5 = vsel %vm302_vm0, %v384_v33, %v385_v34  ;;  %v5807_v34 = vld [vmem:[#allocation4 + $0xe0] sm:$0xf] }
  0x8d   :  { %v7689_v58 = vunpack.i.h.bf16 %v7687_v54  ;;  %v7688_v59 = vunpack.i.l.bf16 %v7687_v54 }
  0x8e   :  { %v189_v44 = vsel %vm188_vm2, %v180_v40, %v7678_v39  ;;  %v190_v45 = vsel %vm188_vm2, %v181_v41, %v7679_v38  ;;  %v316_v38 = vrot.slane %v87_v17, 1 }
  0x8f   :  { %v440_v46 = vpack.c.bf16 %v190_v45, %v189_v44  ;;  %v191_v62 = vsel %vm188_vm2, %v182_v10, %v7688_v59  ;;  %v192_v57 = vsel %vm188_vm2, %v183_v20, %v7689_v58  ;;  %v7795_v44 = vpack.i.bf16 %v388_v37, %v386_v5  ;;  %v7475_v5 = vld [vmem:[#allocation4 + $0x3ec] sm:$0xf0] }
  0x90   :  { %v441_v22 = vpack.c.bf16 %v192_v57, %v191_v62  ;;  %v317_v45 = vsel %vm302_vm0, %v314_v50, %v316_v38  ;;  %v389_v10 = vrot.slane %v8001_v4, 1  ;;  %v391_v20 = vrot.slane %v8008_v6, 1 }
  0x91   :  { %5629 = vmatmul.msk.bf16.vlgmr.msra.gmra.mxu0 %vm600_vm3, %v440_v46  ;;  %5645 = vmatmul.msk.bf16.vlgmr.msra.gmra.mxu1 %vm600_vm3, %v440_v46  ;;  %v7713_v57 = vunpack.i.l.bf16 %v7712_v21 }
  0x92   :  { %5661 = vmatmul.msk.bf16.vlgmr.msra.gmra.mxu2 %vm600_vm3, %v440_v46  ;;  %5677 = vmatmul.msk.bf16.vlgmr.msra.gmra.mxu3 %vm600_vm3, %v440_v46  ;;  %v10875_v46 = vmov 0.0   ;;  %v392_v62 = vsel %vm302_vm0, %v389_v10, %v391_v20 }
  0x93   :  { %v7702_v36 = vpop.permute.xlu0 %7701  ;;  %v8232_v47 = vrot.slane %v10875_v46, 1  ;;  %7796 = vrot.lane.b32.xlu1 %v7795_v44, %s7916_s25  ;;  %v253_v24 = vsel %vm179_vm1, %v7984_v0, %v7713_v57  ;;  %v6063_v0 = vld [vmem:[#allocation4 + $0x2e0] sm:$0xf] }
  0x94   :  { %v7704_v39 = vunpack.i.h.bf16 %v7702_v36  ;;  %v7703_v40 = vunpack.i.l.bf16 %v7702_v36  ;;  %v7707_v41 = vpop.permute.xlu1 %7706  ;;  %v7379_v36 = vld [vmem:[#allocation4 + $0xec] sm:$0xf0] }
  0x95   :  { %v7709_v49 = vunpack.i.h.bf16 %v7707_v41  ;;  %v7708_v51 = vunpack.i.l.bf16 %v7707_v41  ;;  %v319_v52 = vsel %vm302_vm0, %v316_v38, %v8232_v47  ;;  %v5808_v37 = vor.u32 %v7379_v36, %v5807_v34  ;;  %v5791_v36 = vld [vmem:[#allocation4 + $0xc0] sm:$0xf] }
  0x96   :  { %v186_v53 = vsel %vm179_vm1, %v86_v48, %v7703_v40  ;;  %v187_v54 = vsel %vm179_vm1, %v87_v17, %v7704_v39  ;;  %v7785_v55 = vpack.i.bf16 %v319_v52, %v317_v45  ;;  %v390_v48 = vsel %vm302_vm0, %v387_v16, %v389_v10  ;;  %v7727_v16 = vpop.permute.xlu2 %7726  ;;  %v6191_v17 = vld [vmem:[#allocation4 + $0x3e0] sm:$0xf]  ;;  %v7411_v40 = vld [vmem:[#allocation4 + $0x1ec] sm:$0xf0] }
  0x97   :  { %v195_v50 = vsel %vm188_vm2, %v186_v53, %v7708_v51  ;;  %v196_v58 = vsel %vm188_vm2, %v187_v54, %v7709_v49  ;;  %v7805_v18 = vpack.i.bf16 %v392_v62, %v390_v48  ;;  %v6192_v38 = vor.u32 %v7475_v5, %v6191_v17  ;;  %v5935_v39 = vld [vmem:[#allocation4 + $0x1e0] sm:$0xf]  ;;  %2752 = vmatpush.bf16.msrb.mxu0 %v5808_v37  ;;  %v7375_v5 = vld [vmem:[#allocation4 + $0xcc] sm:$0xf0] }
  0x98   :  { %7786 = vrot.lane.b32.xlu2 %v7785_v55, %s7916_s25  ;;  %v443_v59 = vpack.c.bf16 %v196_v58, %v195_v50  ;;  %v5936_v41 = vor.u32 %v7411_v40, %v5935_v39  ;;  %v7729_v44 = vunpack.i.h.bf16 %v7727_v16  ;;  %v7728_v45 = vunpack.i.l.bf16 %v7727_v16  ;;  %v6047_v16 = vld [vmem:[#allocation4 + $0x2c0] sm:$0xf] }
  0x99   :  { %7806 = vrot.lane.b32.xlu0 %v7805_v18, %s7916_s25  ;;  %2899 = vmatpush.bf16.msrb.mxu3 %v6192_v38  ;;  %v397_v50 = vrot.slane %v8064_v31, 1  ;;  %v393_v18 = vrot.slane %v8014_v7, 1  ;;  %v6175_v37 = vld [vmem:[#allocation4 + $0x3c0] sm:$0xf]  ;;  %v7471_v38 = vld [vmem:[#allocation4 + $0x3cc] sm:$0xf0]  ;;  %v5792_v39 = vor.u32 %v7375_v5, %v5791_v36 }
  0x9a   :  { %2801 = vmatpush.bf16.msrb.mxu1 %v5936_v41  ;;  %v6176_v40 = vor.u32 %v7471_v38, %v6175_v37  ;;  %v5919_v41 = vld [vmem:[#allocation4 + $0x1c0] sm:$0xf] }
  0x9b   :  { %7811 = vrot.lane.b32.xlu1 %v7775_v56, %s7918_s14  ;;  %v7714_v56 = vunpack.i.h.bf16 %v7712_v21  ;;  %v399_v21 = vsel %vm302_vm0, %v397_v50, %v8232_v47  ;;  %2753 = vmatpush.bf16.msrb.mxu0 %v5792_v39 }
  0x9c   :  { %v7722_v32 = vpop.permute.xlu1 %7721 }
  0x9d   :  { %v254_v25 = vsel %vm179_vm1, %v7989_v1, %v7714_v56  ;;  %v7724_v1 = vunpack.i.h.bf16 %v7722_v32  ;;  %v7723_v33 = vunpack.i.l.bf16 %v7722_v32  ;;  %2900 = vmatpush.bf16.msrb.mxu3 %v6176_v40 }
  0x9f   :  { %v256_v49 = vsel %vm179_vm1, %v8001_v4, %v7724_v1  ;;  %v255_v51 = vsel %vm179_vm1, %v7996_v3, %v7723_v33  ;;  %v395_v4 = vrot.slane %v8059_v30, 1 }
  0xa0   :  { %7801 = vrot.lane.b32.xlu2 %v8176_v28, %s7918_s14  ;;  %v7443_v28 = vld [vmem:[#allocation4 + $0x2ec] sm:$0xf0]  ;;  %v263_v52 = vsel %vm188_vm2, %v255_v51, %v7728_v45  ;;  %v264_v53 = vsel %vm188_vm2, %v256_v49, %v7729_v44 }
  0xa1   :  { %5630 = vmatmul.msk.bf16.gmra.mxu0 %vm600_vm3, %v441_v22  ;;  %5646 = vmatmul.msk.bf16.gmra.mxu1 %vm600_vm3, %v441_v22  ;;  %v445_v54 = vpack.c.bf16 %v264_v53, %v263_v52  ;;  %v398_v10 = vsel %vm302_vm0, %v395_v4, %v397_v50  ;;  %v7407_v44 = vld [vmem:[#allocation4 + $0x1cc] sm:$0xf0] }
  0xa2   :  { %5662 = vmatmul.msk.bf16.gmra.mxu2 %vm600_vm3, %v441_v22  ;;  %5678 = vmatmul.msk.bf16.gmra.mxu3 %vm600_vm3, %v441_v22  ;;  %v7717_v22 = vpop.permute.xlu0 %7716  ;;  %v7825_v48 = vpack.i.bf16 %v399_v21, %v398_v10 }
  0xa3   :  { %v7719_v19 = vunpack.i.h.bf16 %v7717_v22  ;;  %v7718_v23 = vunpack.i.l.bf16 %v7717_v22  ;;  %7821 = vrot.lane.b32.xlu0 %v7785_v55, %s7918_s14 }
  0xa4   :  { %7826 = vrot.lane.b32.xlu1 %v7825_v48, %s7916_s25 }
  0xa5   :  { %v262_v26 = vsel %vm188_vm2, %v254_v25, %v7719_v19  ;;  %v261_v27 = vsel %vm188_vm2, %v253_v24, %v7718_v23  ;;  %v394_v25 = vsel %vm302_vm0, %v391_v20, %v393_v18 }
  0xa6   :  { %v444_v29 = vpack.c.bf16 %v262_v26, %v261_v27  ;;  %v396_v26 = vsel %vm302_vm0, %v393_v18, %v395_v4 }
  0xa7   :  { %v7815_v27 = vpack.i.bf16 %v396_v26, %v394_v25 }
  0xa9   :  { %7816 = vrot.lane.b32.xlu2 %v7815_v27, %s7916_s25 }
  0xaa   :  { %v7732_v55 = vpop.permute.xlu0 %7731 }
  0xab   :  { %v7734_v3 = vunpack.i.h.bf16 %v7732_v55  ;;  %v7733_v58 = vunpack.i.l.bf16 %v7732_v55 }
  0xad   :  { %v258_v57 = vsel %vm179_vm1, %v8014_v7, %v7734_v3  ;;  %v257_v22 = vsel %vm179_vm1, %v8008_v6, %v7733_v58 }
  0xb1   :  { %5631 = vmatmul.msk.bf16.gmra.mxu0 %vm600_vm3, %v442_v35  ;;  %5647 = vmatmul.msk.bf16.gmra.mxu1 %vm600_vm3, %v442_v35 }
  0xb2   :  { %5663 = vmatmul.msk.bf16.gmra.mxu2 %vm600_vm3, %v442_v35  ;;  %5679 = vmatmul.msk.bf16.gmra.mxu3 %vm600_vm3, %v442_v35  ;;  %v6064_v35 = vor.u32 %v7443_v28, %v6063_v0  ;;  %v7747_v0 = vpop.permute.xlu0 %7746 }
  0xb3   :  { %v7749_v6 = vunpack.i.h.bf16 %v7747_v0  ;;  %v7748_v28 = vunpack.i.l.bf16 %v7747_v0 }
  0xb4   :  { %2850 = vmatpush.bf16.msrb.mxu2 %v6064_v35  ;;  %v7439_v35 = vld [vmem:[#allocation4 + $0x2cc] sm:$0xf0] }
  0xb5   :  { %v6048_v17 = vor.u32 %v7439_v35, %v6047_v16  ;;  %v7403_v16 = vld [vmem:[#allocation4 + $0x1ac] sm:$0xf0] }
  0xb8   :  { %2851 = vmatpush.bf16.msrb.mxu2 %v6048_v17 }
  0xba   :  { %v7762_v21 = vpop.permute.xlu0 %7761 }
  0xc1   :  { %5632 = vmatmul.msk.bf16.gmra.mxu0 %vm600_vm3, %v443_v59  ;;  %5648 = vmatmul.msk.bf16.gmra.mxu1 %vm600_vm3, %v443_v59 }
  0xc2   :  { %5664 = vmatmul.msk.bf16.gmra.mxu2 %vm600_vm3, %v443_v59  ;;  %5680 = vmatmul.msk.bf16.gmra.mxu3 %vm600_vm3, %v443_v59  ;;  %v7737_v59 = vpop.permute.xlu1 %7736 }
  0xc3   :  { %v7739_v62 = vunpack.i.h.bf16 %v7737_v59  ;;  %v7738_v56 = vunpack.i.l.bf16 %v7737_v59 }
  0xc5   :  { %v265_v19 = vsel %vm188_vm2, %v257_v22, %v7738_v56  ;;  %v266_v23 = vsel %vm188_vm2, %v258_v57, %v7739_v62 }
  0xc6   :  { %v446_v24 = vpack.c.bf16 %v266_v23, %v265_v19 }
  0xd1   :  { %5633 = vmatmul.msk.bf16.gmra.mxu0 %vm600_vm3, %v444_v29  ;;  %5649 = vmatmul.msk.bf16.gmra.mxu1 %vm600_vm3, %v444_v29 }
  0xd2   :  { %5665 = vmatmul.msk.bf16.gmra.mxu2 %vm600_vm3, %v444_v29  ;;  %5681 = vmatmul.msk.bf16.gmra.mxu3 %vm600_vm3, %v444_v29  ;;  %v7742_v29 = vpop.permute.xlu2 %7741 }
  0xd3   :  { %v7744_v7 = vunpack.i.h.bf16 %v7742_v29  ;;  %v7743_v32 = vunpack.i.l.bf16 %v7742_v29 }
  0xd5   :  { %v260_v20 = vsel %vm179_vm1, %v8064_v31, %v7744_v7  ;;  %v259_v34 = vsel %vm179_vm1, %v8059_v30, %v7743_v32  ;;  %v5920_v31 = vor.u32 %v7407_v44, %v5919_v41  ;;  %v7752_v30 = vpop.permute.xlu1 %7751  ;;  %v6031_v7 = vld [vmem:[#allocation4 + $0x2a0] sm:$0xf]  ;;  %v7435_v32 = vld [vmem:[#allocation4 + $0x2ac] sm:$0xf0] }
  0xd6   :  { %v268_v1 = vsel %vm188_vm2, %v260_v20, %v7749_v6  ;;  %v267_v33 = vsel %vm188_vm2, %v259_v34, %v7748_v28  ;;  %v7754_v49 = vunpack.i.h.bf16 %v7752_v30  ;;  %v7753_v51 = vunpack.i.l.bf16 %v7752_v30  ;;  %v5775_v6 = vld [vmem:[#allocation4 + $0xa0] sm:$0xf]  ;;  %v7371_v28 = vld [vmem:[#allocation4 + $0xac] sm:$0xf0] }
  0xd7   :  { %v447_v45 = vpack.c.bf16 %v268_v1, %v267_v33  ;;  %2802 = vmatpush.bf16.msrb.mxu1 %v5920_v31  ;;  %v6032_v0 = vor.u32 %v7435_v32, %v6031_v7  ;;  %v6159_v20 = vld [vmem:[#allocation4 + $0x3a0] sm:$0xf]  ;;  %v5776_v34 = vor.u32 %v7371_v28, %v5775_v6  ;;  %v7467_v1 = vld [vmem:[#allocation4 + $0x3ac] sm:$0xf0] }
  0xd8   :  { %v345_v55 = vsel %vm179_vm1, %v8024_v9, %v7754_v49  ;;  %v344_v4 = vsel %vm179_vm1, %v8019_v8, %v7753_v51  ;;  %v7764_v9 = vunpack.i.h.bf16 %v7762_v21  ;;  %v7763_v8 = vunpack.i.l.bf16 %v7762_v21  ;;  %v5903_v33 = vld [vmem:[#allocation4 + $0x1a0] sm:$0xf] }
  0xd9   :  { %2852 = vmatpush.bf16.msrb.mxu2 %v6032_v0  ;;  %v5904_v17 = vor.u32 %v7403_v16, %v5903_v33  ;;  %2754 = vmatpush.bf16.msrb.mxu0 %v5776_v34 }
  0xda   :  { %v7757_v52 = vpop.permute.xlu2 %7756  ;;  %v347_v25 = vsel %vm179_vm1, %v8037_v12, %v7764_v9  ;;  %v346_v26 = vsel %vm179_vm1, %v8032_v11, %v7763_v8  ;;  %v6160_v11 = vor.u32 %v7467_v1, %v6159_v20 }
  0xdb   :  { %v7759_v53 = vunpack.i.h.bf16 %v7757_v52  ;;  %2803 = vmatpush.bf16.msrb.mxu1 %v5904_v17 }
  0xdc   :  { %2901 = vmatpush.bf16.msrb.mxu3 %v6160_v11 }
  0xdd   :  { %v353_v50 = vsel %vm188_vm2, %v345_v55, %v7759_v53  ;;  %v7767_v48 = vpop.permute.xlu1 %7766 }
  0xde   :  { %v7769_v23 = vunpack.i.h.bf16 %v7767_v48 }
  0xe0   :  { %v355_v27 = vsel %vm188_vm2, %v347_v25, %v7769_v23 }
  0xe1   :  { %5634 = vmatmul.msk.bf16.gmra.mxu0 %vm600_vm3, %v445_v54  ;;  %5650 = vmatmul.msk.bf16.gmra.mxu1 %vm600_vm3, %v445_v54 }
  0xe2   :  { %5666 = vmatmul.msk.bf16.gmra.mxu2 %vm600_vm3, %v445_v54  ;;  %5682 = vmatmul.msk.bf16.gmra.mxu3 %vm600_vm3, %v445_v54  ;;  %v7758_v54 = vunpack.i.l.bf16 %v7757_v52  ;;  %v7772_v40 = vpop.permute.xlu2 %7771 }
  0xe3   :  { %v7774_v41 = vunpack.i.h.bf16 %v7772_v40  ;;  %v7773_v44 = vunpack.i.l.bf16 %v7772_v40 }
  0xe4   :  { %v352_v3 = vsel %vm188_vm2, %v344_v4, %v7758_v54 }
  0xe5   :  { %v448_v58 = vpack.c.bf16 %v353_v50, %v352_v3  ;;  %v349_v4 = vsel %vm179_vm1, %v8048_v14, %v7774_v41  ;;  %v348_v50 = vsel %vm179_vm1, %v8043_v13, %v7773_v44  ;;  %v7782_v13 = vpop.permute.xlu1 %7781 }
  0xe6   :  { %v7784_v25 = vunpack.i.h.bf16 %v7782_v13 }
  0xe8   :  { %v351_v1 = vsel %vm179_vm1, %v8079_v43, %v7784_v25 }
  0xf1   :  { %5635 = vmatmul.msk.bf16.gmra.mxu0 %vm600_vm3, %v446_v24  ;;  %5651 = vmatmul.msk.bf16.gmra.mxu1 %vm600_vm3, %v446_v24 }
  0xf2   :  { %5667 = vmatmul.msk.bf16.gmra.mxu2 %vm600_vm3, %v446_v24  ;;  %5683 = vmatmul.msk.bf16.gmra.mxu3 %vm600_vm3, %v446_v24  ;;  %v7768_v24 = vunpack.i.l.bf16 %v7767_v48 }
  0xf4   :  { %v354_v29 = vsel %vm188_vm2, %v346_v26, %v7768_v24  ;;  %v7783_v26 = vunpack.i.l.bf16 %v7782_v13 }
  0xf5   :  { %v449_v35 = vpack.c.bf16 %v355_v27, %v354_v29  ;;  %v7787_v27 = vpop.permute.xlu2 %7786 }
  0xf6   :  { %v7789_v20 = vunpack.i.h.bf16 %v7787_v27  ;;  %v7788_v34 = vunpack.i.l.bf16 %v7787_v27  ;;  %v350_v33 = vsel %vm179_vm1, %v8074_v42, %v7783_v26  ;;  %v7463_v27 = vld [vmem:[#allocation4 + $0x38c] sm:$0xf0] }
  0xf8   :  { %v359_v16 = vsel %vm188_vm2, %v351_v1, %v7789_v20  ;;  %v5887_v20 = vld [vmem:[#allocation4 + $0x180] sm:$0xf] }
 0x101   :  { %5636 = vmatmul.msk.bf16.gmra.mxu0 %vm600_vm3, %v447_v45  ;;  %5652 = vmatmul.msk.bf16.gmra.mxu1 %vm600_vm3, %v447_v45 }
 0x102   :  { %5668 = vmatmul.msk.bf16.gmra.mxu2 %vm600_vm3, %v447_v45  ;;  %5684 = vmatmul.msk.bf16.gmra.mxu3 %vm600_vm3, %v447_v45  ;;  %v7777_v45 = vpop.permute.xlu0 %7776 }
 0x103   :  { %v7779_v54 = vunpack.i.h.bf16 %v7777_v45  ;;  %v7778_v55 = vunpack.i.l.bf16 %v7777_v45 }
 0x105   :  { %v356_v3 = vsel %vm188_vm2, %v348_v50, %v7778_v55  ;;  %v7431_v55 = vld [vmem:[#allocation4 + $0x28c] sm:$0xf0]  ;;  %v7797_v25 = vpop.permute.xlu1 %7796 }
 0x10a   :  { %v7792_v42 = vpop.permute.xlu0 %7791 }
 0x10b   :  { %v7793_v13 = vunpack.i.l.bf16 %v7792_v42 }
 0x10e   :  { %v8315_v59 = vpop.f32.mrf.mxu0  ;;  %v8317_v10 = vpop.f32.mrf.mxu1 }
 0x111   :  { %5637 = vmatmul.msk.bf16.gmra.mxu0 %vm600_vm3, %v448_v58  ;;  %5653 = vmatmul.msk.bf16.gmra.mxu1 %vm600_vm3, %v448_v58 }
 0x112   :  { %5669 = vmatmul.msk.bf16.gmra.mxu2 %vm600_vm3, %v448_v58  ;;  %5685 = vmatmul.msk.bf16.gmra.mxu3 %vm600_vm3, %v448_v58  ;;  %v357_v58 = vsel %vm188_vm2, %v349_v4, %v7779_v54  ;;  %v6015_v54 = vld [vmem:[#allocation4 + $0x280] sm:$0xf] }
 0x113   :  { %v450_v21 = vpack.c.bf16 %v357_v58, %v356_v3  ;;  %v5759_v4 = vld [vmem:[#allocation4 + $0x80] sm:$0xf]  ;;  %v6016_v50 = vor.u32 %v7431_v55, %v6015_v54  ;;  %v7367_v3 = vld [vmem:[#allocation4 + $0x8c] sm:$0xf0] }
 0x114   :  { %v6143_v58 = vld [vmem:[#allocation4 + $0x380] sm:$0xf]  ;;  %v5760_v26 = vor.u32 %v7367_v3, %v5759_v4  ;;  %v7799_v4 = vunpack.i.h.bf16 %v7797_v25  ;;  %v7798_v3 = vunpack.i.l.bf16 %v7797_v25 }
 0x115   :  { %v8323_v62 = vpop.f32.mrf.mxu2  ;;  %v8325_v56 = vpop.f32.mrf.mxu3  ;;  %2853 = vmatpush.bf16.msrb.mxu2 %v6016_v50  ;;  %v6144_v1 = vor.u32 %v7463_v27, %v6143_v58  ;;  %v424_v58 = vsel %vm179_vm1, %v8094_v60, %v7793_v13  ;;  %v1069_v25 = vld [vmem:[%s10867_s2] sm:$0x3] }
 0x116   :  { %v1005_v57 = vmax.f32 %v8315_v59, %v8323_v62  ;;  %v1006_v22 = vmax.f32 %v8317_v10, %v8325_v56  ;;  %v8331_v18 = vpop.f32.mrf.mxu0  ;;  %v8333_v19 = vpop.f32.mrf.mxu1  ;;  %2755 = vmatpush.bf16.msrb.mxu0 %v5760_v26  ;;  %v432_v26 = vsel %vm188_vm2, %v424_v58, %v7798_v3  ;;  %v1235_v3 = vlaneseq }
 0x117   :  { %2902 = vmatpush.bf16.msrb.mxu3 %v6144_v1  ;;  %v7802_v13 = vpop.permute.xlu2 %7801 }
 0x118   :  { %v7803_v58 = vunpack.i.l.bf16 %v7802_v13  ;;  %v8470_v1 = vshrl.u32 %v1235_v3, 7 }
 0x11a   :  { %v426_v62 = vsel %vm179_vm1, %v8109_v63, %v7803_v58  ;;  %v1237_v56 = vadd.s32 8, %v8470_v1 }
 0x11d   :  { %v8341_v36 = vpop.f32.mrf.mxu2  ;;  %v8343_v12 = vpop.f32.mrf.mxu3 }
 0x11e   :  { %v1007_v5 = vmax.f32 %v8331_v18, %v8341_v36  ;;  %v1008_v37 = vmax.f32 %v8333_v19, %v8343_v12  ;;  %v8349_v38 = vpop.f32.mrf.mxu0  ;;  %v8351_v39 = vpop.f32.mrf.mxu1 }
 0x121   :  { %5638 = vmatmul.msk.bf16.gmra.mxu0 %vm600_vm3, %v449_v35  ;;  %5654 = vmatmul.msk.bf16.gmra.mxu1 %vm600_vm3, %v449_v35 }
 0x122   :  { %5670 = vmatmul.msk.bf16.gmra.mxu2 %vm600_vm3, %v449_v35  ;;  %5686 = vmatmul.msk.bf16.gmra.mxu3 %vm600_vm3, %v449_v35  ;;  %v358_v35 = vsel %vm188_vm2, %v350_v33, %v7788_v34  ;;  %v7399_v34 = vld [vmem:[#allocation4 + $0x18c] sm:$0xf0] }
 0x123   :  { %v451_v11 = vpack.c.bf16 %v359_v16, %v358_v35  ;;  %v5888_v33 = vor.u32 %v7399_v34, %v5887_v20 }
 0x125   :  { %v8357_v31 = vpop.f32.mrf.mxu2  ;;  %v8359_v30 = vpop.f32.mrf.mxu3  ;;  %2804 = vmatpush.bf16.msrb.mxu1 %v5888_v33  ;;  %v8454_v33 = vperm.slane %v1069_v25, 0 }
 0x126   :  { %v1009_v49 = vmax.f32 %v8349_v38, %v8357_v31  ;;  %v1010_v51 = vmax.f32 %v8351_v39, %v8359_v30  ;;  %v8365_v52 = vpop.f32.mrf.mxu0  ;;  %v8367_v53 = vpop.f32.mrf.mxu1  ;;  %v1244_v38 = vand.u32 7, %v8470_v1 }
 0x127   :  { %v8476_v59 = vadd.f32 %v8454_v33, %v1007_v5  ;;  %v7812_v5 = vpop.permute.xlu1 %7811 }
 0x128   :  { %vm8526_vm4 = vcmp.lt.s32.totalorder %v1244_v38, 7 }
 0x12d   :  { %v8375_v9 = vpop.f32.mrf.mxu2  ;;  %v8377_v8 = vpop.f32.mrf.mxu3 }
 0x12e   :  { %v1011_v48 = vmax.f32 %v8365_v52, %v8375_v9  ;;  %v1012_v23 = vmax.f32 %v8367_v53, %v8377_v8  ;;  %v8383_v24 = vpop.f32.mrf.mxu0  ;;  %v8385_v14 = vpop.f32.mrf.mxu1  ;;  %v1238_v52 = vadd.s32 16, %v8470_v1  ;;  %v1141_v9 = vmax.f32 %v8476_v59, 0.0 }
 0x130   :  { %v8507_v12 = vadd.f32 %v8454_v33, %v1011_v48 }
 0x131   :  { %5639 = vmatmul.msk.bf16.gmra.mxu0 %vm600_vm3, %v450_v21  ;;  %5655 = vmatmul.msk.bf16.gmra.mxu1 %vm600_vm3, %v450_v21 }
 0x132   :  { %5671 = vmatmul.msk.bf16.gmra.mxu2 %vm600_vm3, %v450_v21  ;;  %5687 = vmatmul.msk.bf16.gmra.mxu3 %vm600_vm3, %v450_v21  ;;  %v7794_v21 = vunpack.i.h.bf16 %v7792_v42 }
 0x134   :  { %v425_v50 = vsel %vm179_vm1, %v8099_v61, %v7794_v21 }
 0x135   :  { %v8391_v29 = vpop.f32.mrf.mxu2  ;;  %v8393_v7 = vpop.f32.mrf.mxu3  ;;  %v433_v27 = vsel %vm188_vm2, %v425_v50, %v7799_v4  ;;  %v8456_v4 = vperm.slane %v1069_v25, 1  ;;  %v7804_v50 = vunpack.i.h.bf16 %v7802_v13 }
 0x136   :  { %v1013_v32 = vmax.f32 %v8383_v24, %v8391_v29  ;;  %v8399_v6 = vpop.f32.mrf.mxu0  ;;  %v8401_v28 = vpop.f32.mrf.mxu1  ;;  %v452_v20 = vpack.c.bf16 %v433_v27, %v432_v26  ;;  %v1075_v27 = vadd.f32 %v8454_v33, %v1005_v57 }
 0x137   :  { %v7807_v26 = vpop.permute.xlu0 %7806  ;;  %v1076_v25 = vadd.f32 %v8456_v4, %v1006_v22  ;;  %v427_v10 = vsel %vm179_vm1, %v8114_v2, %v7804_v50  ;;  %v8487_v57 = vadd.f32 %v8456_v4, %v1008_v37  ;;  %v8493_v22 = vadd.f32 %v8454_v33, %v1009_v49 }
 0x138   :  { %v7809_v13 = vunpack.i.h.bf16 %v7807_v26  ;;  %v7808_v0 = vunpack.i.l.bf16 %v7807_v26  ;;  %v1139_v36 = vmax.f32 %v1075_v27, 0.0  ;;  %v8501_v19 = vadd.f32 %v8456_v4, %v1010_v51 }
 0x139   :  { %v1140_v63 = vmax.f32 %v1076_v25, 0.0  ;;  %v8516_v39 = vadd.f32 %v8456_v4, %v1012_v23  ;;  %v1245_v51 = vand.u32 7, %v1237_v56  ;;  %v1142_v48 = vmax.f32 %v8487_v57, 0.0  ;;  %v7427_v57 = vld [vmem:[#allocation4 + $0x26c] sm:$0xf0] }
 0x13a   :  { %v434_v31 = vsel %vm188_vm2, %v426_v62, %v7808_v0  ;;  %v435_v49 = vsel %vm188_vm2, %v427_v10, %v7809_v13  ;;  %v7817_v0 = vpop.permute.xlu2 %7816  ;;  %v7813_v27 = vunpack.i.l.bf16 %v7812_v5  ;;  %v1246_v10 = vand.u32 7, %v1238_v52 }
 0x13b   :  { %v453_v8 = vpack.c.bf16 %v435_v49, %v434_v31  ;;  %vm8537_vm5 = vcmp.lt.s32.totalorder %v1245_v51, 7  ;;  %v7363_v51 = vld [vmem:[#allocation4 + $0x6c] sm:$0xf0] }
 0x13c   :  { %vm8559_vm7 = vcmp.lt.s32.totalorder %v1246_v10, 7  ;;  %vm8971_vm13 = vmpackc.low %vm8537_vm5, %vm8526_vm4 }
 0x13d   :  { %v8409_v17 = vpop.f32.mrf.mxu2  ;;  %v8411_v40 = vpop.f32.mrf.mxu3 }
 0x13e   :  { %v8417_v45 = vpop.f32.mrf.mxu0  ;;  %v8419_v43 = vpop.f32.mrf.mxu1 }
 0x141   :  { %5640 = vmatmul.msk.bf16.gmra.mxu0 %vm600_vm3, %v451_v11  ;;  %5656 = vmatmul.msk.bf16.gmra.mxu1 %vm600_vm3, %v451_v11 }
 0x142   :  { %5672 = vmatmul.msk.bf16.gmra.mxu2 %vm600_vm3, %v451_v11  ;;  %5688 = vmatmul.msk.bf16.gmra.mxu3 %vm600_vm3, %v451_v11 }
 0x145   :  { %v8425_v16 = vpop.f32.mrf.mxu2  ;;  %v8427_v35 = vpop.f32.mrf.mxu3 }
 0x146   :  { %v8433_v42 = vpop.f32.mrf.mxu0  ;;  %v8435_v55 = vpop.f32.mrf.mxu1 }
 0x14d   :  { %v8443_v34 = vpop.f32.mrf.mxu2  ;;  %v8445_v46 = vpop.f32.mrf.mxu3 }
 0x14e   :  { %v678_v60 = vpop.f32.mrf.mxu0  ;;  %v767_v21 = vpop.f32.mrf.mxu1 }
 0x151   :  { %5641 = vmatmul.msk.bf16.gmra.mxu0 %vm600_vm3, %v452_v20  ;;  %5657 = vmatmul.msk.bf16.gmra.mxu1 %vm600_vm3, %v452_v20 }
 0x152   :  { %5673 = vmatmul.msk.bf16.gmra.mxu2 %vm600_vm3, %v452_v20  ;;  %5689 = vmatmul.msk.bf16.gmra.mxu3 %vm600_vm3, %v452_v20 }
 0x155   :  { %v856_v61 = vpop.f32.mrf.mxu2  ;;  %v945_v54 = vpop.f32.mrf.mxu3 }
 0x156   :  { %v1021_v11 = vmax.f32 %v678_v60, %v856_v61  ;;  %v1022_v44 = vmax.f32 %v767_v21, %v945_v54  ;;  %v680_v20 = vpop.f32.mrf.mxu0  ;;  %v769_v41 = vpop.f32.mrf.mxu1  ;;  %v1144_v54 = vmax.f32 %v8501_v19, 0.0  ;;  %v7447_v19 = vld [vmem:[#allocation4 + $0x30c] sm:$0xf0] }
 0x158   :  { %v1091_v18 = vadd.f32 %v8454_v33, %v1021_v11  ;;  %v1092_v2 = vadd.f32 %v8456_v4, %v1022_v44  ;;  %v1143_v44 = vmax.f32 %v8493_v22, 0.0  ;;  %v7814_v11 = vunpack.i.h.bf16 %v7812_v5 }
 0x15a   :  { %v1155_v37 = vmax.f32 %v1091_v18, 0.0  ;;  %v1156_v30 = vmax.f32 %v1092_v2, 0.0  ;;  %v6127_v18 = vld [vmem:[#allocation4 + $0x360] sm:$0xf] }
 0x15c   :  { %v8524_v53 = vmax.f32 %v1139_v36, %v1155_v37  ;;  %v8535_v13 = vmax.f32 %v1140_v63, %v1156_v30  ;;  %v7819_v36 = vunpack.i.h.bf16 %v7817_v0  ;;  %v7818_v63 = vunpack.i.l.bf16 %v7817_v0  ;;  %v7459_v37 = vld [vmem:[#allocation4 + $0x36c] sm:$0xf0]  ;;  %v5743_v30 = vld [vmem:[#allocation4 + $0x60] sm:$0xf] }
 0x15d   :  { %v858_v23 = vpop.f32.mrf.mxu2  ;;  %v947_v60 = vpop.f32.mrf.mxu3  ;;  %v6128_v52 = vor.u32 %v7459_v37, %v6127_v18 }
 0x15e   :  { %v1023_v3 = vmax.f32 %v680_v20, %v858_v23  ;;  %v1024_v50 = vmax.f32 %v769_v41, %v947_v60  ;;  %v8530_v58 = vpop.f32.mrf.mxu0  ;;  %v8532_v26 = vpop.f32.mrf.mxu1  ;;  %v429_v41 = vsel %vm179_vm1, %v8130_v15, %v7814_v11  ;;  %v5999_v20 = vld [vmem:[#allocation4 + $0x260] sm:$0xf]  ;;  %v1260_v2 = vsel %vm8526_vm4, %v8524_v53, 0.0 }
 0x15f   :  { %v6000_v5 = vor.u32 %v7427_v57, %v5999_v20  ;;  %v7832_v15 = vld [vmem:[%s10865_s0 + $0xe0] sm:$0xff]  ;;  %v1261_v11 = vsel %vm8526_vm4, %v8535_v13, 0.0  ;;  %v8564_v23 = vadd.s32 24, %v8470_v1  ;;  %2903 = vmatpush.bf16.msrb.mxu3 %v6128_v52  ;;  %v7423_v20 = vld [vmem:[#allocation4 + $0x24c] sm:$0xf0]  ;;  %v1308_v18 = vrot.slane %v1260_v2, 1 }
 0x160   :  { %v1093_v62 = vadd.f32 %v8454_v33, %v1023_v3  ;;  %v1094_v56 = vadd.f32 %v8456_v4, %v1024_v50  ;;  %v428_v49 = vsel %vm179_vm1, %v7832_v15, %v7813_v27  ;;  %v5871_v60 = vld [vmem:[#allocation4 + $0x160] sm:$0xf]  ;;  %v7395_v3 = vld [vmem:[#allocation4 + $0x16c] sm:$0xf0]  ;;  %v437_v15 = vsel %vm188_vm2, %v429_v41, %v7819_v36 }
 0x161   :  { %5642 = vmatmul.msk.bf16.gmra.mxu0 %vm600_vm3, %v453_v8  ;;  %5658 = vmatmul.msk.bf16.gmra.mxu1 %vm600_vm3, %v453_v8  ;;  %v6111_v57 = vld [vmem:[#allocation4 + $0x340] sm:$0xf]  ;;  %v436_v25 = vsel %vm188_vm2, %v428_v49, %v7818_v63 }
 0x162   :  { %v1157_v38 = vmax.f32 %v1093_v62, 0.0  ;;  %v1158_v31 = vmax.f32 %v1094_v56, 0.0  ;;  %5674 = vmatmul.msk.bf16.gmra.mxu2 %vm600_vm3, %v453_v8  ;;  %5690 = vmatmul.msk.bf16.gmra.mxu3 %vm600_vm3, %v453_v8  ;;  %v5744_v8 = vor.u32 %v7363_v51, %v5743_v30  ;;  %v5872_v62 = vor.u32 %v7395_v3, %v5871_v60  ;;  %v5983_v56 = vld [vmem:[#allocation4 + $0x240] sm:$0xf]  ;;  %v7419_v60 = vld [vmem:[#allocation4 + $0x22c] sm:$0xf0] }
 0x163   :  { %2854 = vmatpush.bf16.msrb.mxu2 %v6000_v5  ;;  %v5984_v61 = vor.u32 %v7423_v20, %v5983_v56  ;;  %v7455_v5 = vld [vmem:[#allocation4 + $0x34c] sm:$0xf0]  ;;  %v1309_v51 = vrot.slane %v1261_v11, 1  ;;  %v6095_v3 = vld [vmem:[#allocation4 + $0x320] sm:$0xf] }
 0x164   :  { %v1205_v50 = vmax.f32 %v1141_v9, %v1157_v38  ;;  %v1206_v27 = vmax.f32 %v1142_v48, %v1158_v31  ;;  %2756 = vmatpush.bf16.msrb.mxu0 %v5744_v8  ;;  %2805 = vmatpush.bf16.msrb.mxu1 %v5872_v62  ;;  %v6112_v63 = vor.u32 %v7455_v5, %v6111_v57  ;;  %v5967_v8 = vld [vmem:[#allocation4 + $0x220] sm:$0xf]  ;;  %v7451_v20 = vld [vmem:[#allocation4 + $0x32c] sm:$0xf0] }
 0x165   :  { %v861_v37 = vpop.f32.mrf.mxu2  ;;  %v950_v10 = vpop.f32.mrf.mxu3  ;;  %v5968_v62 = vor.u32 %v7419_v60, %v5967_v8 }
 0x166   :  { %v1262_v30 = vsel %vm8537_vm5, %v1205_v50, 0.0  ;;  %v1263_v9 = vsel %vm8537_vm5, %v1206_v27, 0.0  ;;  %v1025_v48 = vmax.f32 %v8530_v58, %v861_v37  ;;  %v1026_v38 = vmax.f32 %v8532_v26, %v950_v10  ;;  %v685_v2 = vpop.f32.mrf.mxu0  ;;  %v774_v31 = vpop.f32.mrf.mxu1  ;;  %2904 = vmatpush.bf16.msrb.mxu3 %v6112_v63 }
 0x167   :  { %v1310_v41 = vrot.slane %v1262_v30, 1  ;;  %v1312_v36 = vrot.slane %v1263_v9, 1  ;;  %2855 = vmatpush.bf16.msrb.mxu2 %v5984_v61  ;;  %v8577_v56 = vpack.c.bf16 %v1205_v50, %v8524_v53  ;;  %v8580_v58 = vpack.c.bf16 %v1206_v27, %v8535_v13  ;;  %v7822_v9 = vpop.permute.xlu0 %7821 }
 0x168   :  { %v1095_v49 = vadd.f32 %v8454_v33, %v1025_v48  ;;  %v1096_v52 = vadd.f32 %v8456_v4, %v1026_v38  ;;  %v1408_v26 = vrot.slane %v1308_v18, 7  ;;  %v6096_v10 = vor.u32 %v7451_v20, %v6095_v3  ;;  %v5951_v48 = vld [vmem:[#allocation4 + $0x200] sm:$0xf]  ;;  %v7415_v38 = vld [vmem:[#allocation4 + $0x20c] sm:$0xf0] }
 0x169   :  { %11010 = vst [vmem:[#allocation9_spill] sm:$0xff] %v8577_v56  ;;  %v8583_v11 = vsel %vm302_vm0, %v1308_v18, %v1310_v41  ;;  %v8586_v61 = vsel %vm302_vm0, %v1309_v51, %v1312_v36  ;;  %v1411_v53 = vrot.slane %v1309_v51, 7  ;;  %v1247_v50 = vand.u32 7, %v8564_v23  ;;  %v6079_v51 = vld [vmem:[#allocation4 + $0x300] sm:$0xf] }
 0x16a   :  { %11011 = vst [vmem:[#allocation10_spill] sm:$0xff] %v8580_v58  ;;  %v1159_v57 = vmax.f32 %v1095_v49, 0.0  ;;  %v1160_v37 = vmax.f32 %v1096_v52, 0.0  ;;  %v1409_v5 = vrot.slane %v8583_v11, 7  ;;  %v8591_v13 = vadd.s32 32, %v8470_v1  ;;  %2905 = vmatpush.bf16.msrb.mxu3 %v6096_v10  ;;  %v7827_v10 = vpop.permute.xlu1 %7826 }
 0x16b   :  { %2856 = vmatpush.bf16.msrb.mxu2 %v5968_v62  ;;  %v1412_v27 = vrot.slane %v8586_v61, 7  ;;  %v8607_v63 = vadd.f32 %v8454_v33, %v1013_v32  ;;  %v454_v49 = vpack.c.bf16 %v437_v15, %v436_v25  ;;  %v5952_v52 = vor.u32 %v7415_v38, %v5951_v48 }
 0x16c   :  { %v8596_v18 = vmax.f32 %v1143_v44, %v1159_v57  ;;  %v8600_v30 = vmax.f32 %v1144_v54, %v1160_v37  ;;  %v1410_v23 = vsel %vm1402_vm6, %v1408_v26, %v1409_v5  ;;  %v11012_v25 = vmax.f32 %v8385_v14, %v8393_v7 }
 0x16d   :  { %v863_v22 = vpop.f32.mrf.mxu2  ;;  %v952_v44 = vpop.f32.mrf.mxu3  ;;  %v1413_v54 = vsel %vm1402_vm6, %v1411_v53, %v1412_v27  ;;  %v6080_v20 = vor.u32 %v7447_v19, %v6079_v51  ;;  %vm8623_vm8 = vcmp.lt.s32.totalorder %v1247_v50, 7  ;;  %v7824_v53 = vunpack.i.h.bf16 %v7822_v9 }
 0x16e   :  { %v1264_v8 = vsel %vm8559_vm7, %v8596_v18, 0.0  ;;  %v1265_v60 = vsel %vm8559_vm7, %v8600_v30, 0.0  ;;  %v1027_v24 = vmax.f32 %v685_v2, %v863_v22  ;;  %v1028_v29 = vmax.f32 %v774_v31, %v952_v44  ;;  %v688_v32 = vpop.f32.mrf.mxu0  ;;  %v777_v3 = vpop.f32.mrf.mxu1  ;;  %vm9116_vm14 = vmpackc.low %vm8623_vm8, %vm8559_vm7 }
 0x16f   :  { %v8620_v15 = vadd.f32 %v8456_v4, %v11012_v25  ;;  %v1314_v26 = vrot.slane %v1264_v8, 1  ;;  %v1316_v62 = vrot.slane %v1265_v60, 1  ;;  %2857 = vmatpush.bf16.msrb.mxu2 %v5952_v52  ;;  %v1248_v31 = vand.u32 7, %v8591_v13  ;;  %2906 = vmatpush.bf16.msrb.mxu3 %v6080_v20 }
 0x170   :  { %v1097_v57 = vadd.f32 %v8454_v33, %v1027_v24  ;;  %v1098_v2 = vadd.f32 %v8456_v4, %v1028_v29  ;;  %v7823_v50 = vunpack.i.l.bf16 %v7822_v9  ;;  %v7828_v13 = vunpack.i.l.bf16 %v7827_v10 }
 0x171   :  { %v8630_v14 = vsel %vm302_vm0, %v1310_v41, %v1314_v26  ;;  %v8633_v7 = vsel %vm302_vm0, %v1312_v36, %v1316_v62  ;;  %5643 = vmatmul.msk.bf16.gmra.mxu0 %vm600_vm3, %v454_v49  ;;  %5659 = vmatmul.msk.bf16.gmra.mxu1 %vm600_vm3, %v454_v49  ;;  %v7829_v41 = vunpack.i.h.bf16 %v7827_v10  ;;  %v11017_v44 = vmax.f32 %v8507_v12, 0.0  ;;  %v7834_v12 = vld [vmem:[%s10865_s0 + $0xf0] sm:$0xff] }
 0x172   :  { %v1424_v48 = vrot.slane %v8630_v14, 7  ;;  %v1426_v38 = vrot.slane %v8633_v7, 7  ;;  %v1161_v51 = vmax.f32 %v1097_v57, 0.0  ;;  %v1162_v22 = vmax.f32 %v1098_v2, 0.0  ;;  %5675 = vmatmul.msk.bf16.gmra.mxu2 %vm600_vm3, %v454_v49  ;;  %5691 = vmatmul.msk.bf16.gmra.mxu3 %vm600_vm3, %v454_v49 }
 0x173   :  { %v8643_v36 = vpack.c.bf16 %v8630_v14, %v8583_v11  ;;  %v8647_v9 = vpack.c.bf16 %v8633_v7, %v8586_v61  ;;  %v11018_v19 = vmax.f32 %v8516_v39, 0.0  ;;  %v7833_v11 = vld [vmem:[%s10865_s0 + $0xf8] sm:$0xff]  ;;  %v430_v61 = vsel %vm179_vm1, %v7834_v12, %v7823_v50 }
 0x174   :  { %v1209_v52 = vmax.f32 %v11017_v44, %v1161_v51  ;;  %v1425_v60 = vsel %vm1402_vm6, %v1409_v5, %v1424_v48  ;;  %v1427_v49 = vsel %vm1402_vm6, %v1412_v27, %v1426_v38  ;;  %v431_v25 = vsel %vm179_vm1, %v7833_v11, %v7824_v53 }
 0x175   :  { %11015 = vst [vmem:[#allocation11_spill] sm:$0xff] %v8643_v36  ;;  %v1210_v8 = vmax.f32 %v11018_v19, %v1162_v22  ;;  %v866_v24 = vpop.f32.mrf.mxu2  ;;  %v955_v29 = vpop.f32.mrf.mxu3  ;;  %v8663_v39 = vpack.c.bf16 %v1425_v60, %v1410_v23  ;;  %v8665_v20 = vpack.c.bf16 %v1427_v49, %v1413_v54  ;;  %v1147_v54 = vmax.f32 %v8607_v63, 0.0  ;;  %v7359_v60 = vld [vmem:[#allocation4 + $0x4c] sm:$0xf0] }
 0x176   :  { %11016 = vst [vmem:[#allocation12_spill] sm:$0xff] %v8647_v9  ;;  %v1266_v5 = vsel %vm8623_vm8, %v1209_v52, 0.0  ;;  %v1029_v57 = vmax.f32 %v688_v32, %v866_v24  ;;  %v1030_v2 = vmax.f32 %v777_v3, %v955_v29  ;;  %v690_v10 = vpop.f32.mrf.mxu0  ;;  %v779_v14 = vpop.f32.mrf.mxu1  ;;  %v8672_v51 = vpack.c.bf16 %v1209_v52, %v8596_v18  ;;  %v5855_v24 = vld [vmem:[#allocation4 + $0x140] sm:$0xf]  ;;  %v7391_v29 = vld [vmem:[#allocation4 + $0x14c] sm:$0xf0] }
 0x177   :  { %11019 = vst [vmem:[#allocation13_spill] sm:$0xff] %v8663_v39  ;;  %v1267_v27 = vsel %vm8623_vm8, %v1210_v8, 0.0  ;;  %v1318_v7 = vrot.slane %v1266_v5, 1  ;;  %v8675_v23 = vpack.c.bf16 %v1210_v8, %v8600_v30  ;;  %v1148_v50 = vmax.f32 %v8620_v15, 0.0  ;;  %v5727_v8 = vld [vmem:[#allocation4 + $0x40] sm:$0xf] }
 0x178   :  { %11020 = vst [vmem:[#allocation14_spill] sm:$0xff] %v8665_v20  ;;  %v1320_v53 = vrot.slane %v1267_v27, 1  ;;  %v1099_v22 = vadd.f32 %v8454_v33, %v1029_v57  ;;  %v1100_v44 = vadd.f32 %v8456_v4, %v1030_v2  ;;  %vm8683_vm9 = vcmp.lt.s32.totalorder %v1248_v31, 7 }
 0x179   :  { %11021 = vst [vmem:[#allocation15_spill] sm:$0xff] %v8672_v51  ;;  %v1319_v32 = vsel %vm302_vm0, %v1314_v26, %v1318_v7  ;;  %v1241_v18 = vadd.s32 40, %v8470_v1  ;;  %v438_v63 = vsel %vm188_vm2, %v430_v61, %v7828_v13  ;;  %v439_v15 = vsel %vm188_vm2, %v431_v25, %v7829_v41 }
 0x17a   :  { %11022 = vst [vmem:[#allocation16_spill] sm:$0xff] %v8675_v23  ;;  %v1321_v3 = vsel %vm302_vm0, %v1316_v62, %v1320_v53  ;;  %v1163_v30 = vmax.f32 %v1099_v22, 0.0  ;;  %v1164_v52 = vmax.f32 %v1100_v44, 0.0  ;;  %v5728_v49 = vor.u32 %v7359_v60, %v5727_v8 }
 0x17b   :  { %v1436_v26 = vrot.slane %v1319_v32, 7  ;;  %v1438_v11 = vrot.slane %v1321_v3, 7  ;;  %v11025_v62 = vmax.f32 %v8399_v6, %v8409_v17  ;;  %v5856_v27 = vor.u32 %v7391_v29, %v5855_v24 }
 0x17c   :  { %v1211_v12 = vmax.f32 %v1147_v54, %v1163_v30  ;;  %v1212_v5 = vmax.f32 %v1148_v50, %v1164_v52  ;;  %v11026_v13 = vmax.f32 %v8401_v28, %v8411_v40  ;;  %v455_v25 = vpack.c.bf16 %v439_v15, %v438_v63  ;;  %2757 = vmatpush.bf16.msrb.mxu0 %v5728_v49 }
 0x17d   :  { %v1085_v31 = vadd.f32 %v8454_v33, %v11025_v62  ;;  %v868_v61 = vpop.f32.mrf.mxu2  ;;  %v957_v57 = vpop.f32.mrf.mxu3  ;;  %v1437_v2 = vsel %vm1402_vm6, %v1424_v48, %v1436_v26  ;;  %v1439_v22 = vsel %vm1402_vm6, %v1426_v38, %v1438_v11  ;;  %2806 = vmatpush.bf16.msrb.mxu1 %v5856_v27  ;;  %v1249_v52 = vand.u32 7, %v1241_v18 }
 0x17e   :  { %v1086_v41 = vadd.f32 %v8456_v4, %v11026_v13  ;;  %v1268_v6 = vsel %vm8683_vm9, %v1211_v12, 0.0  ;;  %v1269_v17 = vsel %vm8683_vm9, %v1212_v5, 0.0  ;;  %v1031_v54 = vmax.f32 %v690_v10, %v868_v61  ;;  %v693_v44 = vpop.f32.mrf.mxu0  ;;  %v782_v28 = vpop.f32.mrf.mxu1 }
 0x17f   :  { %v1032_v50 = vmax.f32 %v779_v14, %v957_v57  ;;  %v1322_v40 = vrot.slane %v1268_v6, 1  ;;  %v1324_v30 = vrot.slane %v1269_v17, 1  ;;  %v1149_v63 = vmax.f32 %v1085_v31, 0.0 }
 0x180   :  { %v1101_v15 = vadd.f32 %v8454_v33, %v1031_v54  ;;  %v1150_v38 = vmax.f32 %v1086_v41, 0.0  ;;  %v1242_v10 = vadd.s32 48, %v8470_v1  ;;  %v11027_v29 = vmax.f32 %v8417_v45, %v8425_v16 }
 0x181   :  { %v1102_v48 = vadd.f32 %v8456_v4, %v1032_v50  ;;  %v1323_v8 = vsel %vm302_vm0, %v1318_v7, %v1322_v40  ;;  %v1325_v60 = vsel %vm302_vm0, %v1320_v53, %v1324_v30  ;;  %5644 = vmatmul.msk.bf16.gmra.mxu0 %vm600_vm3, %v455_v25  ;;  %5660 = vmatmul.msk.bf16.gmra.mxu1 %vm600_vm3, %v455_v25  ;;  %vm8717_vm10 = vcmp.lt.s32.totalorder %v1249_v52, 7 }
 0x182   :  { %v1448_v14 = vrot.slane %v1323_v8, 7  ;;  %v1450_v49 = vrot.slane %v1325_v60, 7  ;;  %v1165_v24 = vmax.f32 %v1101_v15, 0.0  ;;  %5676 = vmatmul.msk.bf16.gmra.mxu2 %vm600_vm3, %v455_v25  ;;  %5692 = vmatmul.msk.bf16.gmra.mxu3 %vm600_vm3, %v455_v25  ;;  %v1087_v7 = vadd.f32 %v8454_v33, %v11027_v29  ;;  %vm9247_vm15 = vmpackc.low %vm8717_vm10, %vm8683_vm9 }
 0x183   :  { %v1166_v18 = vmax.f32 %v1102_v48, 0.0  ;;  %v8721_v62 = vpack.c.bf16 %v1323_v8, %v1319_v32  ;;  %v8723_v31 = vpack.c.bf16 %v1325_v60, %v1321_v3  ;;  %v11032_v25 = vmax.f32 %v8419_v43, %v8427_v35 }
 0x184   :  { %v1213_v27 = vmax.f32 %v1149_v63, %v1165_v24  ;;  %v1449_v41 = vsel %vm1402_vm6, %v1436_v26, %v1448_v14  ;;  %v1451_v61 = vsel %vm1402_vm6, %v1438_v11, %v1450_v49  ;;  %v1250_v57 = vand.u32 7, %v1242_v10 }
 0x185   :  { %11030 = vst [vmem:[#allocation17_spill] sm:$0xff] %v8721_v62  ;;  %v1214_v13 = vmax.f32 %v1150_v38, %v1166_v18  ;;  %v1088_v45 = vadd.f32 %v8456_v4, %v11032_v25  ;;  %v871_v16 = vpop.f32.mrf.mxu2  ;;  %v960_v6 = vpop.f32.mrf.mxu3  ;;  %v8731_v17 = vpack.c.bf16 %v1449_v41, %v1437_v2  ;;  %v8733_v32 = vpack.c.bf16 %v1451_v61, %v1439_v22 }
 0x186   :  { %11031 = vst [vmem:[#allocation18_spill] sm:$0xff] %v8723_v31  ;;  %v1270_v3 = vsel %vm8717_vm10, %v1213_v27, 0.0  ;;  %v1033_v54 = vmax.f32 %v693_v44, %v871_v16  ;;  %v1034_v11 = vmax.f32 %v782_v28, %v960_v6  ;;  %v695_v50 = vpop.f32.mrf.mxu0  ;;  %v784_v52 = vpop.f32.mrf.mxu1  ;;  %v8739_v63 = vpack.c.bf16 %v1213_v27, %v1211_v12 }
 0x187   :  { %11033 = vst [vmem:[#allocation19_spill] sm:$0xff] %v8731_v17  ;;  %v1271_v26 = vsel %vm8717_vm10, %v1214_v13, 0.0  ;;  %v1326_v43 = vrot.slane %v1270_v3, 1  ;;  %v8741_v15 = vpack.c.bf16 %v1214_v13, %v1212_v5  ;;  %v1151_v48 = vmax.f32 %v1087_v7, 0.0 }
 0x188   :  { %11034 = vst [vmem:[#allocation20_spill] sm:$0xff] %v8733_v32  ;;  %v1328_v35 = vrot.slane %v1271_v26, 1  ;;  %v1103_v2 = vadd.f32 %v8454_v33, %v1033_v54  ;;  %v1104_v22 = vadd.f32 %v8456_v4, %v1034_v11  ;;  %v1152_v38 = vmax.f32 %v1088_v45, 0.0 }
 0x189   :  { %11035 = vst [vmem:[#allocation21_spill] sm:$0xff] %v8739_v63  ;;  %v1327_v8 = vsel %vm302_vm0, %v1322_v40, %v1326_v43  ;;  %vm8747_vm11 = vcmp.lt.s32.totalorder %v1250_v57, 7  ;;  %v1243_v12 = vadd.s32 56, %v8470_v1  ;;  %v11039_v40 = vmax.f32 %v8433_v42, %v8443_v34 }
 0x18a   :  { %11036 = vst [vmem:[#allocation22_spill] sm:$0xff] %v8741_v15  ;;  %v1329_v60 = vsel %vm302_vm0, %v1324_v30, %v1328_v35  ;;  %v1167_v44 = vmax.f32 %v1103_v2, 0.0  ;;  %v1168_v28 = vmax.f32 %v1104_v22, 0.0  ;;  %v1460_v10 = vrot.slane %v1327_v8, 7 }
 0x18b   :  { %v1462_v24 = vrot.slane %v1329_v60, 7  ;;  %v1089_v30 = vadd.f32 %v8454_v33, %v11039_v40  ;;  %v11040_v13 = vmax.f32 %v8435_v55, %v8445_v46  ;;  %v1251_v6 = vand.u32 7, %v1243_v12 }
 0x18c   :  { %v1215_v5 = vmax.f32 %v1151_v48, %v1167_v44  ;;  %v1216_v29 = vmax.f32 %v1152_v38, %v1168_v28  ;;  %v1461_v27 = vsel %vm1402_vm6, %v1448_v14, %v1460_v10  ;;  %vm4163_vm2 = vcmask 1042434  }
 0x18d   :  { %v1463_v7 = vsel %vm1402_vm6, %v1450_v49, %v1462_v24  ;;  %v1090_v41 = vadd.f32 %v8456_v4, %v11040_v13  ;;  %v873_v61 = vpop.f32.mrf.mxu2  ;;  %v962_v25 = vpop.f32.mrf.mxu3  ;;  %v1153_v3 = vmax.f32 %v1089_v30, 0.0  ;;  %vm8776_vm12 = vcmp.lt.s32.totalorder %v1251_v6, 7 }
 0x18e   :  { %v1272_v1 = vsel %vm8747_vm11, %v1215_v5, 0.0  ;;  %v1273_v14 = vsel %vm8747_vm11, %v1216_v29, 0.0  ;;  %v1035_v45 = vmax.f32 %v695_v50, %v873_v61  ;;  %v1036_v49 = vmax.f32 %v784_v52, %v962_v25  ;;  %v8766_v16 = vpop.f32.mrf.mxu0  ;;  %v8768_v42 = vpop.f32.mrf.mxu1  ;;  %vm9338_vm1 = vmpackc.low %vm8776_vm12, %vm8747_vm11 }
 0x18f   :  { %v1330_v34 = vrot.slane %v1272_v1, 1  ;;  %v1332_v57 = vrot.slane %v1273_v14, 1  ;;  %v1154_v26 = vmax.f32 %v1090_v41, 0.0  ;;  %vm4166_vm3 = vcmask 1043459  }
 0x190   :  { %v1105_v46 = vadd.f32 %v8454_v33, %v1035_v45  ;;  %v1106_v55 = vadd.f32 %v8456_v4, %v1036_v49 }
 0x191   :  { %v1331_v54 = vsel %vm302_vm0, %v1326_v43, %v1330_v34  ;;  %v1333_v11 = vsel %vm302_vm0, %v1328_v35, %v1332_v57 }
 0x192   :  { %v1472_v2 = vrot.slane %v1331_v54, 7  ;;  %v1474_v50 = vrot.slane %v1333_v11, 7  ;;  %v1169_v52 = vmax.f32 %v1105_v46, 0.0  ;;  %v1170_v22 = vmax.f32 %v1106_v55, 0.0  ;;  %2858 = vmatmul.bf16.vlgmr.msrb.gmra.mxu2 %v8663_v39  ;;  %2907 = vmatmul.bf16.vlgmr.msrb.gmra.mxu3 %v8665_v20  ;;  %v5711_v55 = vld [vmem:[#allocation4 + $0x20] sm:$0xf] }
 0x193   :  { %v8780_v38 = vpack.c.bf16 %v1331_v54, %v1327_v8  ;;  %v8782_v44 = vpack.c.bf16 %v1333_v11, %v1329_v60 }
 0x194   :  { %v1217_v28 = vmax.f32 %v1153_v3, %v1169_v52  ;;  %v1218_v43 = vmax.f32 %v1154_v26, %v1170_v22  ;;  %v1473_v35 = vsel %vm1402_vm6, %v1460_v10, %v1472_v2  ;;  %v1475_v12 = vsel %vm1402_vm6, %v1462_v24, %v1474_v50  ;;  %v7355_v3 = vld [vmem:[#allocation4 + $0x2c] sm:$0xf0]  ;;  %v5839_v52 = vld [vmem:[#allocation4 + $0x120] sm:$0xf] }
 0x195   :  { %11043 = vst [vmem:[#allocation23_spill] sm:$0xff] %v8780_v38  ;;  %v8786_v40 = vpop.f32.mrf.mxu2  ;;  %v8788_v30 = vpop.f32.mrf.mxu3  ;;  %v8790_v13 = vpack.c.bf16 %v1473_v35, %v1461_v27  ;;  %v8792_v41 = vpack.c.bf16 %v1475_v12, %v1463_v7  ;;  %v5712_v11 = vor.u32 %v7355_v3, %v5711_v55  ;;  %v5823_v10 = vld [vmem:[#allocation4 + $0x100] sm:$0xf] }
 0x196   :  { %11044 = vst [vmem:[#allocation24_spill] sm:$0xff] %v8782_v44  ;;  %v1274_v8 = vsel %vm8776_vm12, %v1217_v28, 0.0  ;;  %v1275_v60 = vsel %vm8776_vm12, %v1218_v43, 0.0  ;;  %v8802_v24 = vpop.f32.mrf.mxu0  ;;  %v8804_v25 = vpop.f32.mrf.mxu1  ;;  %v8806_v7 = vpack.c.bf16 %v1217_v28, %v1215_v5  ;;  %v8808_v14 = vpack.c.bf16 %v1218_v43, %v1216_v29  ;;  %v7387_v5 = vld [vmem:[#allocation4 + $0x12c] sm:$0xf0] }
 0x197   :  { %11045 = vst [vmem:[#allocation25_spill] sm:$0xff] %v8790_v13  ;;  %v1334_v27 = vrot.slane %v1274_v8, 1  ;;  %v1336_v1 = vrot.slane %v1275_v60, 1  ;;  %2758 = vmatpush.bf16.msrb.mxu0 %v5712_v11 }
 0x198   :  { %11046 = vst [vmem:[#allocation26_spill] sm:$0xff] %v8792_v41 }
 0x199   :  { %11047 = vst [vmem:[#allocation27_spill] sm:$0xff] %v8806_v7  ;;  %v1335_v45 = vsel %vm302_vm0, %v1330_v34, %v1334_v27  ;;  %v1337_v49 = vsel %vm302_vm0, %v1332_v57, %v1336_v1  ;;  %v1496_v6 = vrot.slane %v1334_v27, 7  ;;  %v1498_v46 = vrot.slane %v1336_v1, 7 }
 0x19a   :  { %11048 = vst [vmem:[#allocation28_spill] sm:$0xff] %v8808_v14  ;;  %v1384_v26 = vsel %vm302_vm0, %v1334_v27, %v8232_v47  ;;  %v1385_v54 = vsel %vm302_vm0, %v1336_v1, %v8232_v47  ;;  %v1484_v22 = vrot.slane %v1335_v45, 7  ;;  %v1486_v29 = vrot.slane %v1337_v49, 7 }
 0x19b   :  { %v8816_v28 = vpack.c.bf16 %v1384_v26, %v1335_v45  ;;  %v5840_v34 = vor.u32 %v7387_v5, %v5839_v52  ;;  %v8818_v43 = vpack.c.bf16 %v1385_v54, %v1337_v49 }
 0x19c   :  { %v1485_v12 = vsel %vm1402_vm6, %v1472_v2, %v1484_v22  ;;  %v1497_v8 = vsel %vm1402_vm6, %v1484_v22, %v1496_v6  ;;  %v1487_v47 = vsel %vm1402_vm6, %v1474_v50, %v1486_v29  ;;  %v1499_v60 = vsel %vm1402_vm6, %v1486_v29, %v1498_v46  ;;  %v7383_v29 = vld [vmem:[#allocation4 + $0x10c] sm:$0xf0] }
 0x19d   :  { %11049 = vst [vmem:[#allocation29_spill] sm:$0xff] %v8816_v28  ;;  %v8820_v57 = vpop.f32.mrf.mxu2  ;;  %v8822_v35 = vpop.f32.mrf.mxu3  ;;  %2807 = vmatpush.bf16.msrb.mxu1 %v5840_v34  ;;  %v8832_v45 = vpack.c.bf16 %v1497_v8, %v1485_v12  ;;  %v8834_v49 = vpack.c.bf16 %v1499_v60, %v1487_v47  ;;  %v5824_v61 = vor.u32 %v7383_v29, %v5823_v10 }
 0x19e   :  { %11050 = vst [vmem:[#allocation30_spill] sm:$0xff] %v8818_v43  ;;  %v8828_v27 = vpop.f32.mrf.mxu0  ;;  %v8830_v1 = vpop.f32.mrf.mxu1  ;;  %v11054_v43 = vmax.f32 %v8768_v42, %v8788_v30 }
 0x19f   :  { %11051 = vst [vmem:[#allocation31_spill] sm:$0xff] %v8832_v45 }
 0x1a0   :  { %11052 = vst [vmem:[#allocation32_spill] sm:$0xff] %v8834_v49  ;;  %v1108_v28 = vadd.f32 %v8456_v4, %v11054_v43 }
 0x1a1   :  { %2808 = vmatpush.bf16.msrb.mxu1 %v5824_v61  ;;  %v1040_v61 = vmax.f32 %v8804_v25, %v8822_v35 }
 0x1a2   :  { %2863 = vmatmul.bf16.gmra.mxu2 %v8731_v17  ;;  %2912 = vmatmul.bf16.gmra.mxu3 %v8733_v32  ;;  %v11053_v17 = vmax.f32 %v8766_v16, %v8786_v40  ;;  %v1172_v40 = vmax.f32 %v1108_v28, 0.0 }
 0x1a3   :  { %v1110_v16 = vadd.f32 %v8456_v4, %v1040_v61 }
 0x1a4   :  { %v1107_v39 = vadd.f32 %v8454_v33, %v11053_v17 }
 0x1a5   :  { %v8838_v2 = vpop.f32.mrf.mxu2  ;;  %v8840_v6 = vpop.f32.mrf.mxu3 }
 0x1a6   :  { %v1041_v50 = vmax.f32 %v8828_v27, %v8838_v2  ;;  %v1042_v46 = vmax.f32 %v8830_v1, %v8840_v6  ;;  %v705_v55 = vpop.f32.mrf.mxu0  ;;  %v794_v3 = vpop.f32.mrf.mxu1  ;;  %v5695_v2 = vld [vmem:[#allocation4] sm:$0xf]  ;;  %v7351_v6 = vld [vmem:[#allocation4 + $0xc] sm:$0xf0]  ;;  %v1171_v17 = vmax.f32 %v1107_v39, 0.0  ;;  %v11055_v39 = vmov 0.0  }
 0x1a7   :  { %v5696_v34 = vor.u32 %v7351_v6, %v5695_v2  ;;  %v1403_v28 = vrot.slane %v11055_v39, 7 }
 0x1a8   :  { %v8907_v30 = vadd.f32 %v8454_v33, %v1041_v50 }
 0x1a9   :  { %2759 = vmatpush.bf16.msrb.mxu0 %v5696_v34  ;;  %v1039_v34 = vmax.f32 %v8802_v24, %v8820_v57 }
 0x1ab   :  { %v1109_v9 = vadd.f32 %v8454_v33, %v1039_v34 }
 0x1ad   :  { %v883_v26 = vpop.f32.mrf.mxu2  ;;  %v972_v54 = vpop.f32.mrf.mxu3 }
 0x1ae   :  { %v8846_v11 = vpop.f32.mrf.mxu0  ;;  %v8848_v52 = vpop.f32.mrf.mxu1  ;;  %v1043_v24 = vmax.f32 %v705_v55, %v883_v26  ;;  %v1044_v57 = vmax.f32 %v794_v3, %v972_v54  ;;  %v1173_v3 = vmax.f32 %v1109_v9, 0.0  ;;  %v1174_v26 = vmax.f32 %v1110_v16, 0.0  ;;  %v5809_v9 = vld [vmem:[#allocation4 + $0xf0] sm:$0xf0] }
 0x1b0   :  { %v8913_v43 = vadd.f32 %v8454_v33, %v1043_v24 }
 0x1b2   :  { %2868 = vmatmul.bf16.gmra.mxu2 %v8790_v13  ;;  %2917 = vmatmul.bf16.gmra.mxu3 %v8792_v41 }
 0x1b5   :  { %v8852_v5 = vpop.f32.mrf.mxu2  ;;  %v8854_v22 = vpop.f32.mrf.mxu3 }
 0x1b6   :  { %v8860_v12 = vpop.f32.mrf.mxu0  ;;  %v8862_v8 = vpop.f32.mrf.mxu1 }
 0x1bd   :  { %v8864_v47 = vpop.f32.mrf.mxu2  ;;  %v8866_v60 = vpop.f32.mrf.mxu3 }
 0x1be   :  { %v8868_v27 = vpop.f32.mrf.mxu0  ;;  %v8870_v1 = vpop.f32.mrf.mxu1 }
 0x1c2   :  { %2873 = vmatmul.bf16.gmra.mxu2 %v8832_v45  ;;  %2922 = vmatmul.bf16.gmra.mxu3 %v8834_v49 }
 0x1c5   :  { %v8874_v41 = vpop.f32.mrf.mxu2  ;;  %v8876_v13 = vpop.f32.mrf.mxu3 }
 0x1c6   :  { %v8882_v20 = vpop.f32.mrf.mxu0  ;;  %v8884_v45 = vpop.f32.mrf.mxu1 }
 0x1cd   :  { %v8886_v49 = vpop.f32.mrf.mxu2  ;;  %v8888_v2 = vpop.f32.mrf.mxu3 }
 0x1ce   :  { %v718_v10 = vpop.f32.mrf.mxu0  ;;  %v807_v29 = vpop.f32.mrf.mxu1 }
 0x1d5   :  { %v896_v6 = vpop.f32.mrf.mxu2  ;;  %v985_v32 = vpop.f32.mrf.mxu3 }
 0x1d6   :  { %v1053_v44 = vmax.f32 %v718_v10, %v896_v6  ;;  %v1054_v38 = vmax.f32 %v807_v29, %v985_v32  ;;  %v720_v31 = vpop.f32.mrf.mxu0  ;;  %v809_v62 = vpop.f32.mrf.mxu1  ;;  %v8910_v32 = vadd.f32 %v8456_v4, %v1042_v46  ;;  %v7507_v6 = vld [vmem:[#allocation4 + $0x4ec] sm:$0xf0] }
 0x1d8   :  { %v1123_v25 = vadd.f32 %v8454_v33, %v1053_v44  ;;  %v1124_v35 = vadd.f32 %v8456_v4, %v1054_v38  ;;  %v8916_v44 = vadd.f32 %v8456_v4, %v1044_v57 }
 0x1da   :  { %v1187_v36 = vmax.f32 %v1123_v25, 0.0  ;;  %v1188_v42 = vmax.f32 %v1124_v35, 0.0  ;;  %v11056_v25 = vmax.f32 %v8846_v11, %v8852_v5  ;;  %v5937_v11 = vld [vmem:[#allocation4 + $0x1f0] sm:$0xf0]  ;;  %v6447_v5 = vld [vmem:[#allocation4 + $0x5e0] sm:$0xf] }
 0x1dc   :  { %v8918_v38 = vmax.f32 %v1171_v17, %v1187_v36  ;;  %v8920_v55 = vmax.f32 %v1172_v40, %v1188_v42  ;;  %v8949_v35 = vadd.f32 %v8454_v33, %v11056_v25  ;;  %v7539_v25 = vld [vmem:[#allocation4 + $0x5ec] sm:$0xf0] }
 0x1dd   :  { %v898_v54 = vpop.f32.mrf.mxu2  ;;  %v987_v50 = vpop.f32.mrf.mxu3 }
 0x1de   :  { %v8926_v46 = vsel %vm8526_vm4, %v8918_v38, 0.0  ;;  %v8931_v10 = vsel %vm8526_vm4, %v8920_v55, 0.0  ;;  %v1055_v36 = vmax.f32 %v720_v31, %v898_v54  ;;  %v1056_v29 = vmax.f32 %v809_v62, %v987_v50  ;;  %v723_v34 = vpop.f32.mrf.mxu0  ;;  %v812_v61 = vpop.f32.mrf.mxu1  ;;  %v7377_v50 = vld [vmem:[#allocation4 + $0xe4] sm:$0xf] }
 0x1df   :  { %v1404_v24 = vrot.slane %v8926_v46, 7  ;;  %v1406_v57 = vrot.slane %v8931_v10, 7  ;;  %v1354_v62 = vrot.slane %v8926_v46, 1  ;;  %v1355_v31 = vrot.slane %v8931_v10, 1 }
 0x1e0   :  { %v1125_v16 = vadd.f32 %v8454_v33, %v1055_v36  ;;  %v1126_v17 = vadd.f32 %v8456_v4, %v1056_v29  ;;  %v11057_v36 = vmax.f32 %v8848_v52, %v8854_v22  ;;  %v5812_v10 = vor.u32 %v7377_v50, %v5809_v9  ;;  %v6319_v29 = vld [vmem:[#allocation4 + $0x4e0] sm:$0xf] }
 0x1e1   :  { %v1405_v40 = vsel %vm1402_vm6, %v1403_v28, %v1404_v24  ;;  %v1407_v42 = vsel %vm1402_vm6, %v1403_v28, %v1406_v57  ;;  %v7409_v28 = vld [vmem:[#allocation4 + $0x1e4] sm:$0xf]  ;;  %v6320_v7 = vor.u32 %v7507_v6, %v6319_v29  ;;  %v1414_v15 = vrot.slane %v1354_v62, 7 }
 0x1e2   :  { %v1189_v39 = vmax.f32 %v1125_v16, 0.0  ;;  %v1190_v54 = vmax.f32 %v1126_v17, 0.0  ;;  %v8955_v46 = vadd.f32 %v8456_v4, %v11057_v36  ;;  %v1047_v16 = vmax.f32 %v8860_v12, %v8864_v47  ;;  %3046 = vmatpush.bf16.msra.mxu2 %v5812_v10 }
 0x1e3   :  { %v1417_v63 = vrot.slane %v1355_v31, 7  ;;  %v5940_v22 = vor.u32 %v7409_v28, %v5937_v11  ;;  %v6448_v36 = vor.u32 %v7539_v25, %v6447_v5  ;;  %2948 = vmatpush.bf16.msra.mxu0 %v6320_v7  ;;  %v11064_v5 = vmax.f32 %v8907_v30, 0.0 }
 0x1e4   :  { %v1221_v17 = vmax.f32 %v1173_v3, %v1189_v39  ;;  %v1222_v14 = vmax.f32 %v1174_v26, %v1190_v54  ;;  %vm4169_vm4 = vcmask 1044484  }
 0x1e5   :  { %v901_v23 = vpop.f32.mrf.mxu2  ;;  %v990_v52 = vpop.f32.mrf.mxu3  ;;  %3095 = vmatpush.bf16.msra.mxu3 %v5940_v22  ;;  %2997 = vmatpush.bf16.msra.mxu1 %v6448_v36  ;;  %v7373_v36 = vld [vmem:[#allocation4 + $0xc4] sm:$0xf] }
 0x1e6   :  { %v8961_v9 = vsel %vm8537_vm5, %v1221_v17, 0.0  ;;  %v8965_v12 = vsel %vm8537_vm5, %v1222_v14, 0.0  ;;  %v1057_v47 = vmax.f32 %v723_v34, %v901_v23  ;;  %v1058_v3 = vmax.f32 %v812_v61, %v990_v52  ;;  %v725_v26 = vpop.f32.mrf.mxu0  ;;  %v814_v6 = vpop.f32.mrf.mxu1 }
 0x1e7   :  { %v1356_v54 = vrot.slane %v8961_v9, 1  ;;  %v1420_v50 = vrot.slane %v8961_v9, 7  ;;  %v1358_v10 = vrot.slane %v8965_v12, 1  ;;  %v10909_v23 = vrot.slane %v8965_v12, 7 }
 0x1e8   :  { %v1127_v7 = vadd.f32 %v8454_v33, %v1057_v47  ;;  %v1128_v21 = vadd.f32 %v8456_v4, %v1058_v3  ;;  %v8982_v59 = vpack.c.bf16 %v1221_v17, %v8918_v38  ;;  %v8985_v34 = vpack.c.bf16 %v1222_v14, %v8920_v55  ;;  %v5793_v47 = vld [vmem:[#allocation4 + $0xd0] sm:$0xf0]  ;;  %v7405_v3 = vld [vmem:[#allocation4 + $0x1c4] sm:$0xf] }
 0x1e9   :  { %v8988_v61 = vsel %vm302_vm0, %v1354_v62, %v1356_v54  ;;  %v8991_v29 = vsel %vm302_vm0, %v1355_v31, %v1358_v10  ;;  %v1421_v28 = vsel %vm1402_vm6, %v1404_v24, %v1420_v50  ;;  %v1423_v11 = vsel %vm1402_vm6, %v1406_v57, %v10909_v23 }
 0x1ea   :  { %11060 = vst [vmem:[#allocation33_spill] sm:$0xff] %v8982_v59  ;;  %v10908_v38 = vrot.slane %v8988_v61, 7  ;;  %v10905_v17 = vrot.slane %v8991_v29, 7  ;;  %v1191_v14 = vmax.f32 %v1127_v7, 0.0  ;;  %v1192_v55 = vmax.f32 %v1128_v21, 0.0  ;;  %6487 = vmatmul.msk.bf16.gmra.mxu2 %vm8971_vm13, %v8982_v59  ;;  %6499 = vmatmul.msk.bf16.gmra.mxu3 %vm8971_vm13, %v8985_v34 }
 0x1eb   :  { %11061 = vst [vmem:[#allocation34_spill] sm:$0xff] %v8985_v34  ;;  %v9008_v24 = vadd.f32 %v8454_v33, %v1047_v16  ;;  %v1048_v57 = vmax.f32 %v8862_v8, %v8866_v60  ;;  %v9012_v62 = vpack.c.bf16 %v1421_v28, %v1405_v40  ;;  %v9014_v31 = vpack.c.bf16 %v1423_v11, %v1407_v42  ;;  %v5921_v7 = vld [vmem:[#allocation4 + $0x1d0] sm:$0xf0]  ;;  %v7365_v34 = vld [vmem:[#allocation4 + $0x84] sm:$0xf] }
 0x1ec   :  { %v9018_v25 = vmax.f32 %v11064_v5, %v1191_v14  ;;  %v11065_v52 = vmax.f32 %v8910_v32, 0.0  ;;  %v9027_v16 = vsel %vm1402_vm6, %v1414_v15, %v10908_v38  ;;  %v9032_v8 = vsel %vm1402_vm6, %v1417_v63, %v10905_v17  ;;  %v6431_v38 = vld [vmem:[#allocation4 + $0x5c0] sm:$0xf]  ;;  %v5761_v59 = vld [vmem:[#allocation4 + $0x90] sm:$0xf0] }
 0x1ed   :  { %11062 = vst [vmem:[#allocation35_spill] sm:$0xff] %v9012_v62  ;;  %2760 = vmatmul.bf16.vlgmr.msrb.gmra.mxu0 %v9012_v62  ;;  %2809 = vmatmul.bf16.vlgmr.msrb.gmra.mxu1 %v9014_v31  ;;  %v903_v32 = vpop.f32.mrf.mxu2  ;;  %v992_v40 = vpop.f32.mrf.mxu3  ;;  %v5796_v42 = vor.u32 %v7373_v36, %v5793_v47  ;;  %v9053_v47 = vadd.f32 %v8456_v4, %v1048_v57  ;;  %v11069_v23 = vmax.f32 %v8916_v44, 0.0  ;;  %v11070_v9 = vrot.slane %v8965_v12, 7 }
 0x1ee   :  { %11063 = vst [vmem:[#allocation36_spill] sm:$0xff] %v9014_v31  ;;  %v9022_v22 = vmax.f32 %v11065_v52, %v1192_v55  ;;  %v9041_v15 = vsel %vm8559_vm7, %v9018_v25, 0.0  ;;  %v1059_v21 = vmax.f32 %v725_v26, %v903_v32  ;;  %v1060_v28 = vmax.f32 %v814_v6, %v992_v40  ;;  %v728_v11 = vpop.f32.mrf.mxu0  ;;  %v817_v14 = vpop.f32.mrf.mxu1  ;;  %v7369_v6 = vld [vmem:[#allocation4 + $0xa4] sm:$0xf]  ;;  %v5777_v32 = vld [vmem:[#allocation4 + $0xb0] sm:$0xf0] }
 0x1ef   :  { %v10906_v5 = vrot.slane %v9041_v15, 1  ;;  %v10916_v52 = vrot.slane %v9041_v15, 7  ;;  %3047 = vmatpush.bf16.msra.mxu2 %v5796_v42  ;;  %v5924_v26 = vor.u32 %v7405_v3, %v5921_v7  ;;  %v7401_v40 = vld [vmem:[#allocation4 + $0x1a4] sm:$0xf]  ;;  %v11066_v55 = vmax.f32 %v8868_v27, %v8874_v41  ;;  %v5905_v7 = vld [vmem:[#allocation4 + $0x1b0] sm:$0xf0] }
 0x1f0   :  { %v9046_v63 = vsel %vm8559_vm7, %v9022_v22, 0.0  ;;  %v1129_v30 = vadd.f32 %v8454_v33, %v1059_v21  ;;  %v1130_v60 = vadd.f32 %v8456_v4, %v1060_v28  ;;  %v7535_v21 = vld [vmem:[#allocation4 + $0x5cc] sm:$0xf0]  ;;  %v5780_v41 = vor.u32 %v7369_v6, %v5777_v32 }
 0x1f1   :  { %v10907_v36 = vrot.slane %v9046_v63, 1  ;;  %v9061_v17 = vadd.f32 %v8454_v33, %v11066_v55  ;;  %v9066_v42 = vsel %vm302_vm0, %v1356_v54, %v10906_v5  ;;  %v1434_v3 = vrot.slane %v9046_v63, 7  ;;  %v6303_v55 = vld [vmem:[#allocation4 + $0x4c0] sm:$0xf]  ;;  %3096 = vmatpush.bf16.msra.mxu3 %v5924_v26 }
 0x1f2   :  { %v1193_v27 = vmax.f32 %v1129_v30, 0.0  ;;  %v1194_v28 = vmax.f32 %v1130_v60, 0.0  ;;  %v11067_v54 = vmax.f32 %v8870_v1, %v8876_v13  ;;  %v5908_v30 = vor.u32 %v7401_v40, %v5905_v7  ;;  %v5889_v40 = vld [vmem:[#allocation4 + $0x190] sm:$0xf0] }
 0x1f3   :  { %v9071_v57 = vsel %vm302_vm0, %v1358_v10, %v10907_v36  ;;  %v1433_v10 = vsel %vm1402_vm6, %v1420_v50, %v10916_v52  ;;  %v7503_v36 = vld [vmem:[#allocation4 + $0x4cc] sm:$0xf0]  ;;  %v11068_v60 = vmax.f32 %v8913_v43, 0.0  ;;  %v1435_v50 = vsel %vm1402_vm6, %v11070_v9, %v1434_v3  ;;  %3048 = vmatpush.bf16.msra.mxu2 %v5780_v41 }
 0x1f4   :  { %v9080_v5 = vadd.f32 %v8456_v4, %v11067_v54  ;;  %v1226_v13 = vmax.f32 %v11069_v23, %v1194_v28  ;;  %v6304_v1 = vor.u32 %v7503_v36, %v6303_v55  ;;  %v6432_v54 = vor.u32 %v7535_v21, %v6431_v38  ;;  %v7361_v28 = vld [vmem:[#allocation4 + $0x64] sm:$0xf]  ;;  %v5745_v55 = vld [vmem:[#allocation4 + $0x70] sm:$0xf0] }
 0x1f5   :  { %v1225_v26 = vmax.f32 %v11068_v60, %v1193_v27  ;;  %v906_v51 = vpop.f32.mrf.mxu2  ;;  %v995_v58 = vpop.f32.mrf.mxu3  ;;  %v5764_v52 = vor.u32 %v7365_v34, %v5761_v59  ;;  %v11071_v6 = vrot.slane %v9066_v42, 7  ;;  %v11072_v43 = vrot.slane %v8988_v61, 7  ;;  %v7397_v61 = vld [vmem:[#allocation4 + $0x184] sm:$0xf]  ;;  %3097 = vmatpush.bf16.msra.mxu3 %v5908_v30 }
 0x1f6   :  { %v11073_v44 = vrot.slane %v9071_v57, 7  ;;  %v11074_v23 = vrot.slane %v8991_v29, 7  ;;  %v9110_v12 = vsel %vm8623_vm8, %v1226_v13, 0.0  ;;  %v1061_v59 = vmax.f32 %v728_v11, %v906_v51  ;;  %2949 = vmatpush.bf16.msra.mxu0 %v6304_v1  ;;  %2998 = vmatpush.bf16.msra.mxu1 %v6432_v54  ;;  %v730_v0 = vpop.f32.mrf.mxu0  ;;  %v7393_v60 = vld [vmem:[#allocation4 + $0x164] sm:$0xf] }
 0x1f7   :  { %v1429_v32 = vsel %vm1402_vm6, %v11072_v43, %v11071_v6  ;;  %v9106_v36 = vsel %vm8623_vm8, %v1225_v26, 0.0  ;;  %v1062_v34 = vmax.f32 %v817_v14, %v995_v58  ;;  %v11075_v29 = vmov 0  ;;  %v819_v14 = vpop.f32.mrf.mxu1  ;;  %3049 = vmatpush.bf16.msra.mxu2 %v5764_v52 }
 0x1f8   :  { %v1431_v38 = vsel %vm1402_vm6, %v11074_v23, %v11073_v44  ;;  %v11076_v29 = vsel %vm9116_vm14, 4294967295, %v11075_v29  ;;  %v1364_v7 = vrot.slane %v9106_v36, 1  ;;  %v1444_v21 = vrot.slane %v9106_v36, 7  ;;  %v6287_v44 = vld [vmem:[#allocation4 + $0x4a0] sm:$0xf] }
 0x1f9   :  { %11077 = vst [vmem:[#allocation37_spill] sm:$0xff] %v11076_v29  ;;  %v1366_v41 = vrot.slane %v9110_v12, 1  ;;  %v1446_v58 = vrot.slane %v9110_v12, 7  ;;  %v1131_v51 = vadd.f32 %v8454_v33, %v1061_v59  ;;  %v1132_v11 = vadd.f32 %v8456_v4, %v1062_v34  ;;  %v6415_v59 = vld [vmem:[#allocation4 + $0x5a0] sm:$0xf] }
 0x1fa   :  { %v9127_v37 = vpack.c.bf16 %v1225_v26, %v9018_v25  ;;  %v9130_v27 = vpack.c.bf16 %v1226_v13, %v9022_v22  ;;  %v11080_v1 = vrot.slane %v9041_v15, 7  ;;  %v5892_v9 = vor.u32 %v7397_v61, %v5889_v40  ;;  %v5873_v26 = vld [vmem:[#allocation4 + $0x170] sm:$0xf0]  ;;  %v7531_v34 = vld [vmem:[#allocation4 + $0x5ac] sm:$0xf0] }
 0x1fb   :  { %v1447_v54 = vsel %vm1402_vm6, %v1434_v3, %v1446_v58  ;;  %v5748_v25 = vor.u32 %v7361_v28, %v5745_v55  ;;  %v1195_v6 = vmax.f32 %v1131_v51, 0.0  ;;  %v1196_v22 = vmax.f32 %v1132_v11, 0.0  ;;  %v7499_v3 = vld [vmem:[#allocation4 + $0x4ac] sm:$0xf0]  ;;  %v7357_v55 = vld [vmem:[#allocation4 + $0x44] sm:$0xf] }
 0x1fc   :  { %11078 = vst [vmem:[#allocation38_spill] sm:$0xff] %v9127_v37  ;;  %v1445_v30 = vsel %vm1402_vm6, %v11080_v1, %v1444_v21  ;;  %6490 = vmatmul.msk.bf16.gmra.mxu2 %vm9116_vm14, %v9127_v37  ;;  %6502 = vmatmul.msk.bf16.gmra.mxu3 %vm9116_vm14, %v9130_v27  ;;  %v9148_v43 = vpack.c.bf16 %v1447_v54, %v1435_v50  ;;  %v11085_v51 = vmax.f32 %v8949_v35, 0.0  ;;  %v5729_v1 = vld [vmem:[#allocation4 + $0x50] sm:$0xf0]  ;;  %vm4172_vm5 = vcmask 1045509  }
 0x1fd   :  { %11079 = vst [vmem:[#allocation39_spill] sm:$0xff] %v9130_v27  ;;  %v9146_v13 = vpack.c.bf16 %v1445_v30, %v1433_v10  ;;  %3098 = vmatpush.bf16.msra.mxu3 %v5892_v9  ;;  %v6288_v52 = vor.u32 %v7499_v3, %v6287_v44  ;;  %v5876_v23 = vor.u32 %v7393_v60, %v5873_v26  ;;  %v11086_v10 = vmax.f32 %v8955_v46, 0.0  ;;  %v908_v35 = vpop.f32.mrf.mxu2  ;;  %v997_v46 = vpop.f32.mrf.mxu3  ;;  %v7389_v30 = vld [vmem:[#allocation4 + $0x144] sm:$0xf]  ;;  %v5857_v54 = vld [vmem:[#allocation4 + $0x150] sm:$0xf0] }
 0x1fe   :  { %11082 = vst [vmem:[#allocation41_spill] sm:$0xff] %v9148_v43  ;;  %v9151_v61 = vpack.c.bf16 %v1429_v32, %v9027_v16  ;;  %v9154_v40 = vpack.c.bf16 %v1431_v38, %v9032_v8  ;;  %v9158_v11 = vmax.f32 %v11085_v51, %v1195_v6  ;;  %v6416_v28 = vor.u32 %v7531_v34, %v6415_v59  ;;  %v7353_v44 = vld [vmem:[#allocation4 + $0x24] sm:$0xf]  ;;  %v5713_v51 = vld [vmem:[#allocation4 + $0x30] sm:$0xf0] }
 0x1ff   :  { %11081 = vst [vmem:[#allocation40_spill] sm:$0xff] %v9146_v13  ;;  %v9162_v50 = vmax.f32 %v11086_v10, %v1196_v22  ;;  %v11087_v60 = vrot.slane %v9041_v15, 1  ;;  %v1182_v8 = vmax.f32 %v9053_v47, 0.0  ;;  %v1183_v32 = vmax.f32 %v9061_v17, 0.0  ;;  %2765 = vmatmul.bf16.gmra.mxu0 %v9146_v13  ;;  %2814 = vmatmul.bf16.gmra.mxu1 %v9148_v43  ;;  %v7417_v27 = vld [vmem:[#allocation4 + $0x224] sm:$0xf] }
 0x200   :  { %11083 = vst [vmem:[#allocation42_spill] sm:$0xff] %v9151_v61  ;;  %v5732_v38 = vor.u32 %v7357_v55, %v5729_v1  ;;  %v11088_v9 = vrot.slane %v9046_v63, 1  ;;  %v9183_v47 = vsel %vm8683_vm9, %v9158_v11, 0.0  ;;  %v1063_v6 = vmax.f32 %v730_v0, %v908_v35  ;;  %2950 = vmatpush.bf16.msra.mxu0 %v6288_v52  ;;  %3050 = vmatpush.bf16.msra.mxu2 %v5748_v25  ;;  %v7385_v25 = vld [vmem:[#allocation4 + $0x124] sm:$0xf] }
 0x201   :  { %11084 = vst [vmem:[#allocation43_spill] sm:$0xff] %v9154_v40  ;;  %v1365_v16 = vsel %vm302_vm0, %v11087_v60, %v1364_v7  ;;  %v9188_v26 = vsel %vm8683_vm9, %v9162_v50, 0.0  ;;  %v1064_v22 = vmax.f32 %v819_v14, %v997_v46  ;;  %v1184_v63 = vmax.f32 %v9080_v5, 0.0  ;;  %3099 = vmatpush.bf16.msra.mxu3 %v5876_v23  ;;  %2999 = vmatpush.bf16.msra.mxu1 %v6416_v28  ;;  %v5841_v52 = vld [vmem:[#allocation4 + $0x130] sm:$0xf0] }
 0x202   :  { %v9178_v15 = vsel %vm302_vm0, %v11088_v9, %v1366_v41  ;;  %v10918_v3 = vrot.slane %v9183_v47, 1  ;;  %v1456_v59 = vrot.slane %v9183_v47, 7  ;;  %v10917_v34 = vrot.slane %v9188_v26, 1  ;;  %v822_v9 = vpop.f32.mrf.mxu1  ;;  %v5969_v29 = vld [vmem:[#allocation4 + $0x230] sm:$0xf0] }
 0x203   :  { %v1458_v10 = vrot.slane %v9188_v26, 7  ;;  %v1133_v55 = vadd.f32 %v8454_v33, %v1063_v6  ;;  %v1134_v0 = vadd.f32 %v8456_v4, %v1064_v22  ;;  %v5860_v14 = vor.u32 %v7389_v30, %v5857_v54  ;;  %v733_v54 = vpop.f32.mrf.mxu0 }
 0x204   :  { %v9206_v23 = vsel %vm302_vm0, %v1364_v7, %v10918_v3  ;;  %v9213_v28 = vsel %vm302_vm0, %v1366_v41, %v10917_v34  ;;  %3051 = vmatpush.bf16.msra.mxu2 %v5732_v38  ;;  %v5716_v6 = vor.u32 %v7353_v44, %v5713_v51  ;;  %v1457_v7 = vsel %vm1402_vm6, %v1444_v21, %v1456_v59  ;;  %v7349_v44 = vld [vmem:[#allocation4 + $0x4] sm:$0xf]  ;;  %v5697_v51 = vld [vmem:[#allocation4 + $0x10] sm:$0xf0] }
 0x205   :  { %v1452_v35 = vrot.slane %v9206_v23, 7  ;;  %v1197_v46 = vmax.f32 %v1133_v55, 0.0  ;;  %v1198_v30 = vmax.f32 %v1134_v0, 0.0  ;;  %3100 = vmatpush.bf16.msra.mxu3 %v5860_v14  ;;  %v5844_v22 = vor.u32 %v7385_v25, %v5841_v52  ;;  %v911_v36 = vpop.f32.mrf.mxu2  ;;  %v1000_v0 = vpop.f32.mrf.mxu3  ;;  %v7381_v14 = vld [vmem:[#allocation4 + $0x104] sm:$0xf] }
 0x206   :  { %v1440_v60 = vrot.slane %v1365_v16, 7  ;;  %v1442_v1 = vrot.slane %v9178_v15, 7  ;;  %v1454_v41 = vrot.slane %v9213_v28, 7  ;;  %v11089_v34 = vmax.f32 %v9008_v24, 0.0  ;;  %v5825_v25 = vld [vmem:[#allocation4 + $0x110] sm:$0xf0] }
 0x207   :  { %v1230_v55 = vmax.f32 %v1182_v8, %v1198_v30  ;;  %v1459_v38 = vsel %vm1402_vm6, %v1446_v58, %v1458_v10  ;;  %v5700_v21 = vor.u32 %v7349_v44, %v5697_v51  ;;  %v11090_v16 = vrot.slane %v9066_v42, 7  ;;  %v7495_v30 = vld [vmem:[#allocation4 + $0x48c] sm:$0xf0] }
 0x208   :  { %v1229_v3 = vmax.f32 %v11089_v34, %v1197_v46  ;;  %v1453_v24 = vsel %vm1402_vm6, %v1440_v60, %v1452_v35  ;;  %v11091_v8 = vrot.slane %v9071_v57, 7  ;;  %v1065_v52 = vmax.f32 %v733_v54, %v911_v36  ;;  %3052 = vmatpush.bf16.msra.mxu2 %v5716_v6  ;;  %v6271_v46 = vld [vmem:[#allocation4 + $0x480] sm:$0xf] }
 0x209   :  { %v1441_v15 = vsel %vm1402_vm6, %v11090_v16, %v1440_v60  ;;  %v9241_v34 = vsel %vm8717_vm10, %v1230_v55, 0.0  ;;  %v1066_v42 = vmax.f32 %v822_v9, %v1000_v0  ;;  %v11092_v57 = vmov 0  ;;  %3101 = vmatpush.bf16.msra.mxu3 %v5844_v22 }
 0x20a   :  { %v1443_v12 = vsel %vm1402_vm6, %v11091_v8, %v1442_v1  ;;  %v9237_v58 = vsel %vm8717_vm10, %v1229_v3, 0.0  ;;  %v11093_v57 = vsel %vm9247_vm15, 4294967295, %v11092_v57  ;;  %v1374_v51 = vrot.slane %v9241_v34, 1 }
 0x20b   :  { %11094 = vst [vmem:[#allocation44_spill] sm:$0xff] %v11093_v57  ;;  %v1372_v60 = vrot.slane %v9237_v58, 1  ;;  %v1468_v44 = vrot.slane %v9237_v58, 7  ;;  %v1470_v54 = vrot.slane %v9241_v34, 7  ;;  %v1135_v9 = vadd.f32 %v8454_v33, %v1065_v52  ;;  %v11124_v57 = vld [vmem:[#allocation12_spill] sm:$0xff] }
 0x20c   :  { %v1136_v6 = vadd.f32 %v8456_v4, %v1066_v42  ;;  %v9258_v19 = vpack.c.bf16 %v1229_v3, %v9158_v11  ;;  %v9261_v53 = vpack.c.bf16 %v1230_v55, %v9162_v50  ;;  %v5828_v16 = vor.u32 %v7381_v14, %v5825_v25  ;;  %v6399_v3 = vld [vmem:[#allocation4 + $0x580] sm:$0xf]  ;;  %3053 = vmatpush.bf16.msra.mxu2 %v5700_v21  ;;  %v735_v42 = vpop.f32.mrf.mxu0 }
 0x20d   :  { %v1469_v36 = vsel %vm1402_vm6, %v1456_v59, %v1468_v44  ;;  %v1471_v0 = vsel %vm1402_vm6, %v1458_v10, %v1470_v54  ;;  %v6272_v22 = vor.u32 %v7495_v30, %v6271_v46  ;;  %v1199_v8 = vmax.f32 %v1135_v9, 0.0  ;;  %v7527_v59 = vld [vmem:[#allocation4 + $0x58c] sm:$0xf0] }
 0x20e   :  { %11095 = vst [vmem:[#allocation45_spill] sm:$0xff] %v9258_v19  ;;  %v1200_v52 = vmax.f32 %v1136_v6, 0.0  ;;  %6493 = vmatmul.msk.bf16.gmra.mxu2 %vm9247_vm15, %v9258_v19  ;;  %6505 = vmatmul.msk.bf16.gmra.mxu3 %vm9247_vm15, %v9261_v53  ;;  %v9275_v11 = vpack.c.bf16 %v1469_v36, %v1457_v7  ;;  %v9277_v50 = vpack.c.bf16 %v1471_v0, %v1459_v38  ;;  %v824_v38 = vpop.f32.mrf.mxu1  ;;  %v11101_v21 = vrot.slane %v9183_v47, 1 }
 0x20f   :  { %11096 = vst [vmem:[#allocation46_spill] sm:$0xff] %v9261_v53  ;;  %3102 = vmatpush.bf16.msra.mxu3 %v5828_v16  ;;  %v6400_v10 = vor.u32 %v7527_v59, %v6399_v3  ;;  %v9279_v55 = vpack.c.bf16 %v1453_v24, %v1441_v15  ;;  %v1455_v14 = vsel %vm1402_vm6, %v1442_v1, %v1454_v41  ;;  %v11104_v47 = vrot.slane %v9188_v26, 1 }
 0x210   :  { %11097 = vst [vmem:[#allocation47_spill] sm:$0xff] %v9275_v11  ;;  %v1231_v25 = vmax.f32 %v1183_v32, %v1199_v8  ;;  %v1232_v7 = vmax.f32 %v1184_v63, %v1200_v52  ;;  %2951 = vmatpush.bf16.msra.mxu0 %v6272_v22  ;;  %v9288_v46 = vpack.c.bf16 %v1455_v14, %v1443_v12  ;;  %v913_v32 = vpop.f32.mrf.mxu2  ;;  %v1002_v63 = vpop.f32.mrf.mxu3  ;;  %vm4178_vm7 = vcmask 1047559  }
 0x211   :  { %11098 = vst [vmem:[#allocation48_spill] sm:$0xff] %v9277_v50  ;;  %v1373_v15 = vsel %vm302_vm0, %v11101_v21, %v1372_v60  ;;  %v11102_v24 = vmax.f32 %v8882_v20, %v8886_v49  ;;  %v11103_v17 = vmax.f32 %v8884_v45, %v8888_v2  ;;  %2770 = vmatmul.bf16.gmra.mxu0 %v9275_v11 }
 0x212   :  { %11099 = vst [vmem:[#allocation49_spill] sm:$0xff] %v9279_v55  ;;  %2819 = vmatmul.bf16.gmra.mxu1 %v9277_v50  ;;  %v1464_v12 = vrot.slane %v1373_v15, 7  ;;  %v1375_v30 = vsel %vm302_vm0, %v11104_v47, %v1374_v51  ;;  %v1288_v20 = vsel %vm8747_vm11, %v1231_v25, 0.0  ;;  %v1289_v49 = vsel %vm8747_vm11, %v1232_v7, 0.0 }
 0x213   :  { %11100 = vst [vmem:[#allocation50_spill] sm:$0xff] %v9288_v46  ;;  %v1121_v1 = vadd.f32 %v8454_v33, %v11102_v24  ;;  %v1122_v5 = vadd.f32 %v8456_v4, %v11103_v17  ;;  %v1067_v45 = vmax.f32 %v735_v42, %v913_v32  ;;  %v1068_v2 = vmax.f32 %v824_v38, %v1002_v63  ;;  %v6255_v24 = vld [vmem:[#allocation4 + $0x460] sm:$0xf] }
 0x214   :  { %3000 = vmatpush.bf16.msra.mxu1 %v6400_v10  ;;  %v1376_v9 = vrot.slane %v1288_v20, 1  ;;  %v1378_v6 = vrot.slane %v1289_v49, 1  ;;  %v1465_v26 = vsel %vm1402_vm6, %v1452_v35, %v1464_v12  ;;  %v1466_v16 = vrot.slane %v1375_v30, 7 }
 0x215   :  { %v1137_v36 = vadd.f32 %v8454_v33, %v1067_v45  ;;  %v1138_v0 = vadd.f32 %v8456_v4, %v1068_v2  ;;  %v1185_v22 = vmax.f32 %v1121_v1, 0.0  ;;  %v1186_v8 = vmax.f32 %v1122_v5, 0.0  ;;  %v6383_v2 = vld [vmem:[#allocation4 + $0x560] sm:$0xf] }
 0x216   :  { %v1377_v52 = vsel %vm302_vm0, %v1372_v60, %v1376_v9  ;;  %v1379_v3 = vsel %vm302_vm0, %v1374_v51, %v1378_v6  ;;  %v1480_v38 = vrot.slane %v1288_v20, 7  ;;  %v1467_v33 = vsel %vm1402_vm6, %v1454_v41, %v1466_v16  ;;  %v7491_v60 = vld [vmem:[#allocation4 + $0x46c] sm:$0xf0] }
 0x217   :  { %v1476_v59 = vrot.slane %v1377_v52, 7  ;;  %v1478_v14 = vrot.slane %v1379_v3, 7  ;;  %v1201_v10 = vmax.f32 %v1137_v36, 0.0  ;;  %v1202_v42 = vmax.f32 %v1138_v0, 0.0  ;;  %v7523_v36 = vld [vmem:[#allocation4 + $0x56c] sm:$0xf0] }
 0x218   :  { %v1482_v15 = vrot.slane %v1289_v49, 7  ;;  %v11109_v32 = vmov 0  ;;  %v1481_v20 = vsel %vm1402_vm6, %v1468_v44, %v1480_v38  ;;  %v5972_v37 = vor.u32 %v7417_v27, %v5969_v29  ;;  %v7449_v29 = vld [vmem:[#allocation4 + $0x324] sm:$0xf]  ;;  %v6097_v27 = vld [vmem:[#allocation4 + $0x330] sm:$0xf0] }
 0x219   :  { %v1233_v4 = vmax.f32 %v1185_v22, %v1201_v10  ;;  %v1234_v23 = vmax.f32 %v1186_v8, %v1202_v42  ;;  %v1477_v35 = vsel %vm1402_vm6, %v1464_v12, %v1476_v59  ;;  %v1479_v21 = vsel %vm1402_vm6, %v1466_v16, %v1478_v14  ;;  %v9370_v10 = vpop.f32.mrf.mxu2  ;;  %v9372_v42 = vpop.f32.mrf.mxu3 }
 0x21a   :  { %v9322_v1 = vpack.c.bf16 %v1477_v35, %v1465_v26  ;;  %v9324_v51 = vpack.c.bf16 %v1479_v21, %v1467_v33  ;;  %v11110_v32 = vsel %vm9338_vm1, 4294967295, %v11109_v32  ;;  %v1483_v18 = vsel %vm1402_vm6, %v1470_v54, %v1482_v15  ;;  %v7487_v33 = vld [vmem:[#allocation4 + $0x44c] sm:$0xf0] }
 0x21b   :  { %v1290_v17 = vsel %vm8776_vm12, %v1233_v4, 0.0  ;;  %v1291_v28 = vsel %vm8776_vm12, %v1234_v23, 0.0  ;;  %v9330_v41 = vpack.c.bf16 %v1233_v4, %v1231_v25  ;;  %v9332_v5 = vpack.c.bf16 %v1234_v23, %v1232_v7  ;;  %11111 = vst [vmem:[#allocation55_spill] sm:$0xff] %v11110_v32  ;;  %v7519_v35 = vld [vmem:[#allocation4 + $0x54c] sm:$0xf0] }
 0x21c   :  { %11105 = vst [vmem:[#allocation51_spill] sm:$0xff] %v9322_v1  ;;  %v1380_v63 = vrot.slane %v1290_v17, 1  ;;  %v1492_v12 = vrot.slane %v1290_v17, 7  ;;  %v1382_v47 = vrot.slane %v1291_v28, 1  ;;  %v1494_v30 = vrot.slane %v1291_v28, 7 }
 0x21d   :  { %11106 = vst [vmem:[#allocation52_spill] sm:$0xff] %v9324_v51  ;;  %v6256_v25 = vor.u32 %v7491_v60, %v6255_v24  ;;  %v6384_v54 = vor.u32 %v7523_v36, %v6383_v2  ;;  %v6223_v24 = vld [vmem:[#allocation4 + $0x420] sm:$0xf]  ;;  %v7483_v60 = vld [vmem:[#allocation4 + $0x42c] sm:$0xf0] }
 0x21e   :  { %11107 = vst [vmem:[#allocation53_spill] sm:$0xff] %v9330_v41  ;;  %v1500_v49 = vrot.slane %v1380_v63, 7  ;;  %v1493_v7 = vsel %vm1402_vm6, %v1480_v38, %v1492_v12  ;;  %v1495_v48 = vsel %vm1402_vm6, %v1482_v15, %v1494_v30  ;;  %v1502_v45 = vrot.slane %v1382_v47, 7  ;;  %6496 = vmatmul.msk.bf16.gmra.mxu2 %vm9338_vm1, %v9330_v41  ;;  %6508 = vmatmul.msk.bf16.gmra.mxu3 %vm9338_vm1, %v9332_v5  ;;  %v6239_v38 = vld [vmem:[#allocation4 + $0x440] sm:$0xf]  ;;  %v11116_v15 = vld [vmem:[#allocation10_spill] sm:$0xff] }
 0x21f   :  { %11108 = vst [vmem:[#allocation54_spill] sm:$0xff] %v9332_v5  ;;  %v9356_v58 = vpack.c.bf16 %v1493_v7, %v1481_v20  ;;  %v9358_v44 = vpack.c.bf16 %v1495_v48, %v1483_v18  ;;  %v1381_v34 = vsel %vm302_vm0, %v1376_v9, %v1380_v63  ;;  %2952 = vmatpush.bf16.msra.mxu0 %v6256_v25  ;;  %v6351_v12 = vld [vmem:[#allocation4 + $0x520] sm:$0xf]  ;;  %v11118_v7 = vld [vmem:[#allocation16_spill] sm:$0xff]  ;;  %v7479_v48 = vld [vmem:[#allocation4 + $0x40c] sm:$0xf0] }
 0x220   :  { %v1488_v0 = vrot.slane %v1381_v34, 7  ;;  %v1383_v26 = vsel %vm302_vm0, %v1378_v6, %v1382_v47  ;;  %3001 = vmatpush.bf16.msra.mxu1 %v6384_v54  ;;  %v6240_v4 = vor.u32 %v7487_v33, %v6239_v38  ;;  %v6224_v17 = vor.u32 %v7483_v60, %v6223_v24  ;;  %v7515_v47 = vld [vmem:[#allocation4 + $0x52c] sm:$0xf0]  ;;  %v6207_v18 = vld [vmem:[#allocation4 + $0x400] sm:$0xf] }
 0x221   :  { %11112 = vst [vmem:[#allocation56_spill] sm:$0xff] %v9356_v58  ;;  %v1490_v16 = vrot.slane %v1383_v26, 7  ;;  %2775 = vmatmul.bf16.gmra.mxu0 %v9356_v58  ;;  %v9378_v23 = vpop.f32.mrf.mxu3  ;;  %v6352_v30 = vor.u32 %v7515_v47, %v6351_v12  ;;  %v6335_v34 = vld [vmem:[#allocation4 + $0x500] sm:$0xf]  ;;  %v7511_v54 = vld [vmem:[#allocation4 + $0x50c] sm:$0xf0] }
 0x222   :  { %11113 = vst [vmem:[#allocation57_spill] sm:$0xff] %v9358_v44  ;;  %2824 = vmatmul.bf16.gmra.mxu1 %v9358_v44  ;;  %v1489_v22 = vsel %vm1402_vm6, %v1476_v59, %v1488_v0  ;;  %v1501_v8 = vsel %vm1402_vm6, %v1488_v0, %v1500_v49  ;;  %v9376_v59 = vpop.f32.mrf.mxu2  ;;  %v11117_v49 = vld [vmem:[#allocation15_spill] sm:$0xff]  ;;  %v6336_v0 = vor.u32 %v7511_v54, %v6335_v34  ;;  %v11119_v26 = vld [vmem:[#allocation21_spill] sm:$0xff]  ;;  %v11122_v47 = vld [vmem:[#allocation28_spill] sm:$0xff]  ;;  %vm4160_vm0 = vcmask 1041409  }
 0x223   :  { %v9366_v52 = vpack.c.bf16 %v1501_v8, %v1489_v22  ;;  %v1491_v3 = vsel %vm1402_vm6, %v1478_v14, %v1490_v16  ;;  %v1503_v9 = vsel %vm1402_vm6, %v1490_v16, %v1502_v45  ;;  %2953 = vmatpush.bf16.msra.mxu0 %v6240_v4  ;;  %v6367_v14 = vld [vmem:[#allocation4 + $0x540] sm:$0xf]  ;;  %v6208_v45 = vor.u32 %v7479_v48, %v6207_v18  ;;  %v11120_v16 = vld [vmem:[#allocation22_spill] sm:$0xff]  ;;  %v7441_v33 = vld [vmem:[#allocation4 + $0x2e4] sm:$0xf] }
 0x224   :  { %v9374_v6 = vpack.c.bf16 %v1503_v9, %v1491_v3  ;;  %v6368_v21 = vor.u32 %v7519_v35, %v6367_v14  ;;  %v7505_v3 = vld [vmem:[#allocation4 + $0x4e4] sm:$0xf]  ;;  %v6321_v9 = vld [vmem:[#allocation4 + $0x4f0] sm:$0xf0]  ;;  %vm4175_vm6 = vcmask 1046534  }
 0x225   :  { %11114 = vst [vmem:[#allocation58_spill] sm:$0xff] %v9366_v52  ;;  %v6324_v38 = vor.u32 %v7505_v3, %v6321_v9  ;;  %v6065_v4 = vld [vmem:[#allocation4 + $0x2f0] sm:$0xf0]  ;;  %v7537_v14 = vld [vmem:[#allocation4 + $0x5e4] sm:$0xf] }
 0x226   :  { %11115 = vst [vmem:[#allocation59_spill] sm:$0xff] %v9374_v6  ;;  %3002 = vmatpush.bf16.msra.mxu1 %v6368_v21  ;;  %v6068_v24 = vor.u32 %v7441_v33, %v6065_v4  ;;  %v6449_v60 = vld [vmem:[#allocation4 + $0x5f0] sm:$0xf0]  ;;  %v7501_v54 = vld [vmem:[#allocation4 + $0x4c4] sm:$0xf] }
 0x227   :  { %2954 = vmatpush.bf16.msra.mxu0 %v6224_v17  ;;  %3242 = vmatpush.bf16.msrb.mxu2 %v6324_v38  ;;  %v6452_v17 = vor.u32 %v7537_v14, %v6449_v60  ;;  %v11121_v12 = vld [vmem:[#allocation27_spill] sm:$0xff]  ;;  %v7437_v33 = vld [vmem:[#allocation4 + $0x2c4] sm:$0xf] }
 0x228   :  { %v6193_v18 = vld [vmem:[#allocation4 + $0x3f0] sm:$0xf0]  ;;  %v7533_v14 = vld [vmem:[#allocation4 + $0x5c4] sm:$0xf] }
 0x229   :  { %v9390_v63 = vpop.f32.mrf.mxu3  ;;  %3291 = vmatpush.bf16.msrb.mxu3 %v6452_v17  ;;  %v6049_v4 = vld [vmem:[#allocation4 + $0x2d0] sm:$0xf0] }
 0x22a   :  { %v9388_v28 = vpop.f32.mrf.mxu2  ;;  %3003 = vmatpush.bf16.msra.mxu1 %v6352_v30  ;;  %v7473_v30 = vld [vmem:[#allocation4 + $0x3e4] sm:$0xf]  ;;  %v6052_v60 = vor.u32 %v7437_v33, %v6049_v4  ;;  %v6433_v17 = vld [vmem:[#allocation4 + $0x5d0] sm:$0xf0] }
 0x22b   :  { %2955 = vmatpush.bf16.msra.mxu0 %v6208_v45  ;;  %v6196_v48 = vor.u32 %v7473_v30, %v6193_v18  ;;  %v6436_v30 = vor.u32 %v7533_v14, %v6433_v17  ;;  %v7497_v14 = vld [vmem:[#allocation4 + $0x4a4] sm:$0xf]  ;;  %v6289_v17 = vld [vmem:[#allocation4 + $0x4b0] sm:$0xf0] }
 0x22d   :  { %3292 = vmatpush.bf16.msrb.mxu3 %v6436_v30  ;;  %v6401_v30 = vld [vmem:[#allocation4 + $0x590] sm:$0xf0] }
 0x22e   :  { %3054 = vmatmul.bf16.vlgmr.msra.gmra.mxu2 %v9012_v62  ;;  %3103 = vmatmul.bf16.vlgmr.msra.gmra.mxu3 %v9014_v31  ;;  %v6369_v31 = vld [vmem:[#allocation4 + $0x550] sm:$0xf0] }
 0x22f   :  { %3004 = vmatpush.bf16.msra.mxu1 %v6336_v0  ;;  %3144 = vmatpush.bf16.msrb.mxu0 %v6068_v24  ;;  %v6305_v0 = vld [vmem:[#allocation4 + $0x4d0] sm:$0xf0] }
 0x230   :  { %v6308_v3 = vor.u32 %v7501_v54, %v6305_v0  ;;  %v7469_v54 = vld [vmem:[#allocation4 + $0x3c4] sm:$0xf]  ;;  %v6177_v0 = vld [vmem:[#allocation4 + $0x3d0] sm:$0xf0] }
 0x231   :  { %6463 = vmatmul.msk.bf16.gmra.mxu0 %vm8971_vm13, %v8577_v56  ;;  %v9396_v25 = vpop.f32.mrf.mxu3 }
 0x232   :  { %6475 = vmatmul.msk.bf16.gmra.mxu1 %vm8971_vm13, %v11116_v15  ;;  %v9394_v20 = vpop.f32.mrf.mxu2  ;;  %3243 = vmatpush.bf16.msrb.mxu2 %v6308_v3  ;;  %v6180_v3 = vor.u32 %v7469_v54, %v6177_v0 }
 0x233   :  { %3193 = vmatpush.bf16.msrb.mxu1 %v6196_v48  ;;  %3145 = vmatpush.bf16.msrb.mxu0 %v6052_v60  ;;  %v7525_v60 = vld [vmem:[#allocation4 + $0x584] sm:$0xf] }
 0x237   :  { %3194 = vmatpush.bf16.msrb.mxu1 %v6180_v3  ;;  %v6404_v3 = vor.u32 %v7525_v60, %v6401_v30  ;;  %v6385_v30 = vld [vmem:[#allocation4 + $0x570] sm:$0xf0] }
 0x239   :  { %v9406_v36 = vpop.f32.mrf.mxu3 }
 0x23a   :  { %v9404_v2 = vpop.f32.mrf.mxu2 }
 0x23e   :  { %3059 = vmatmul.bf16.gmra.mxu2 %v9146_v13  ;;  %3108 = vmatmul.bf16.gmra.mxu3 %v9148_v43 }
 0x241   :  { %6466 = vmatmul.msk.bf16.gmra.mxu0 %vm9116_vm14, %v11117_v49  ;;  %v9418_v8 = vpop.f32.mrf.mxu3 }
 0x242   :  { %6478 = vmatmul.msk.bf16.gmra.mxu1 %vm9116_vm14, %v11118_v7  ;;  %v9416_v22 = vpop.f32.mrf.mxu2 }
 0x249   :  { %v9424_v21 = vpop.f32.mrf.mxu3 }
 0x24a   :  { %v9422_v35 = vpop.f32.mrf.mxu2 }
 0x24e   :  { %3064 = vmatmul.bf16.gmra.mxu2 %v9275_v11  ;;  %3113 = vmatmul.bf16.gmra.mxu3 %v9277_v50  ;;  %v7493_v50 = vld [vmem:[#allocation4 + $0x484] sm:$0xf]  ;;  %v6273_v11 = vld [vmem:[#allocation4 + $0x490] sm:$0xf0] }
 0x24f   :  { %v6276_v54 = vor.u32 %v7493_v50, %v6273_v11  ;;  %v7489_v11 = vld [vmem:[#allocation4 + $0x464] sm:$0xf]  ;;  %v6257_v50 = vld [vmem:[#allocation4 + $0x470] sm:$0xf0] }
 0x250   :  { %v6260_v60 = vor.u32 %v7489_v11, %v6257_v50  ;;  %v7481_v11 = vld [vmem:[#allocation4 + $0x424] sm:$0xf] }
 0x251   :  { %6469 = vmatmul.msk.bf16.gmra.mxu0 %vm9247_vm15, %v11119_v26  ;;  %v9434_v34 = vpop.f32.mrf.mxu3  ;;  %v7513_v50 = vld [vmem:[#allocation4 + $0x524] sm:$0xf] }
 0x252   :  { %6481 = vmatmul.msk.bf16.gmra.mxu1 %vm9247_vm15, %v11120_v16  ;;  %v9432_v45 = vpop.f32.mrf.mxu2 }
 0x25e   :  { %3069 = vmatmul.bf16.gmra.mxu2 %v9356_v58  ;;  %3118 = vmatmul.bf16.gmra.mxu3 %v9358_v44  ;;  %v6292_v44 = vor.u32 %v7497_v14, %v6289_v17  ;;  %v6417_v58 = vld [vmem:[#allocation4 + $0x5b0] sm:$0xf0] }
 0x25f   :  { %v6033_v14 = vld [vmem:[#allocation4 + $0x2b0] sm:$0xf0] }
 0x260   :  { %3244 = vmatpush.bf16.msrb.mxu2 %v6292_v44  ;;  %v7521_v44 = vld [vmem:[#allocation4 + $0x564] sm:$0xf] }
 0x261   :  { %6472 = vmatmul.msk.bf16.gmra.mxu0 %vm9338_vm1, %v11121_v12 }
 0x262   :  { %6484 = vmatmul.msk.bf16.gmra.mxu1 %vm9338_vm1, %v11122_v47 }
 0x264   :  { %3245 = vmatpush.bf16.msrb.mxu2 %v6276_v54  ;;  %v7485_v54 = vld [vmem:[#allocation4 + $0x444] sm:$0xf] }
 0x268   :  { %3246 = vmatpush.bf16.msrb.mxu2 %v6260_v60  ;;  %v6353_v60 = vld [vmem:[#allocation4 + $0x530] sm:$0xf0] }
 0x26a   :  { %v2761_v9 = vpop.f32.mrf.mxu0  ;;  %v2810_v38 = vpop.f32.mrf.mxu1 }
 0x26b   :  { %v9442_v24 = vadd.f32 %v2810_v38, %v2761_v9 }
 0x26d   :  { %v9444_v18 = vpop.f32.mrf.mxu2  ;;  %v9446_v48 = vpop.f32.mrf.mxu3 }
 0x26e   :  { %6511 = vmatmul.msk.bf16.gmra.mxu2 %vm8971_vm13, %v8577_v56  ;;  %6523 = vmatmul.msk.bf16.gmra.mxu3 %vm8971_vm13, %v11116_v15  ;;  %v7529_v56 = vld [vmem:[#allocation4 + $0x5a4] sm:$0xf] }
 0x26f   :  { %v6420_v43 = vor.u32 %v7529_v56, %v6417_v58 }
 0x271   :  { %2956 = vmatmul.bf16.vlgmr.msra.gmra.mxu0 %v9151_v61  ;;  %3293 = vmatpush.bf16.msrb.mxu3 %v6420_v43 }
 0x272   :  { %3005 = vmatmul.bf16.vlgmr.msra.gmra.mxu1 %v9154_v40  ;;  %v2763_v15 = vpop.f32.mrf.mxu0  ;;  %v2812_v9 = vpop.f32.mrf.mxu1 }
 0x273   :  { %v9450_v38 = vadd.f32 %v2812_v9, %v2763_v15  ;;  %v7433_v9 = vld [vmem:[#allocation4 + $0x2a4] sm:$0xf] }
 0x274   :  { %v6036_v56 = vor.u32 %v7433_v9, %v6033_v14  ;;  %v6241_v14 = vld [vmem:[#allocation4 + $0x450] sm:$0xf0] }
 0x275   :  { %v9452_v33 = vpop.f32.mrf.mxu2  ;;  %v9454_v4 = vpop.f32.mrf.mxu3  ;;  %3294 = vmatpush.bf16.msrb.mxu3 %v6404_v3  ;;  %v6244_v13 = vor.u32 %v7485_v54, %v6241_v14  ;;  %v7429_v54 = vld [vmem:[#allocation4 + $0x284] sm:$0xf] }
 0x276   :  { %3146 = vmatpush.bf16.msrb.mxu0 %v6036_v56 }
 0x277   :  { %3247 = vmatpush.bf16.msrb.mxu2 %v6244_v13 }
 0x27c   :  { %v2766_v15 = vpop.f32.mrf.mxu0  ;;  %v2815_v0 = vpop.f32.mrf.mxu1 }
 0x27d   :  { %v9462_v17 = vadd.f32 %v2815_v0, %v2766_v15  ;;  %v6161_v15 = vld [vmem:[#allocation4 + $0x3b0] sm:$0xf0]  ;;  %v6388_v0 = vor.u32 %v7521_v44, %v6385_v30  ;;  %v7477_v30 = vld [vmem:[#allocation4 + $0x404] sm:$0xf] }
 0x27e   :  { %6514 = vmatmul.msk.bf16.gmra.mxu2 %vm9116_vm14, %v11117_v49  ;;  %6526 = vmatmul.msk.bf16.gmra.mxu3 %vm9116_vm14, %v11118_v7  ;;  %v7465_v7 = vld [vmem:[#allocation4 + $0x3a4] sm:$0xf] }
 0x27f   :  { %v9464_v58 = vpop.f32.mrf.mxu2  ;;  %v9466_v43 = vpop.f32.mrf.mxu3  ;;  %v6164_v9 = vor.u32 %v7465_v7, %v6161_v15  ;;  %v7517_v49 = vld [vmem:[#allocation4 + $0x544] sm:$0xf]  ;;  %3295 = vmatpush.bf16.msrb.mxu3 %v6388_v0  ;;  %v6225_v7 = vld [vmem:[#allocation4 + $0x430] sm:$0xf0] }
 0x280   :  { %v6372_v41 = vor.u32 %v7517_v49, %v6369_v31  ;;  %v6228_v44 = vor.u32 %v7481_v11, %v6225_v7  ;;  %v6209_v15 = vld [vmem:[#allocation4 + $0x410] sm:$0xf0]  ;;  %v7509_v31 = vld [vmem:[#allocation4 + $0x504] sm:$0xf] }
 0x281   :  { %2961 = vmatmul.bf16.gmra.mxu0 %v9279_v55  ;;  %3195 = vmatpush.bf16.msrb.mxu1 %v6164_v9  ;;  %v6356_v9 = vor.u32 %v7513_v50, %v6353_v60  ;;  %v6212_v0 = vor.u32 %v7477_v30, %v6209_v15  ;;  %v6145_v60 = vld [vmem:[#allocation4 + $0x390] sm:$0xf0] }
 0x282   :  { %3010 = vmatmul.bf16.gmra.mxu1 %v9288_v46  ;;  %3248 = vmatpush.bf16.msrb.mxu2 %v6228_v44  ;;  %v7461_v44 = vld [vmem:[#allocation4 + $0x384] sm:$0xf] }
 0x283   :  { %3296 = vmatpush.bf16.msrb.mxu3 %v6372_v41  ;;  %v6148_v30 = vor.u32 %v7461_v44, %v6145_v60 }
 0x284   :  { %v2768_v62 = vpop.f32.mrf.mxu0  ;;  %v2817_v5 = vpop.f32.mrf.mxu1 }
 0x285   :  { %v9470_v53 = vadd.f32 %v2817_v5, %v2768_v62  ;;  %v6337_v62 = vld [vmem:[#allocation4 + $0x510] sm:$0xf0]  ;;  %3196 = vmatpush.bf16.msrb.mxu1 %v6148_v30  ;;  %v7457_v30 = vld [vmem:[#allocation4 + $0x364] sm:$0xf] }
 0x286   :  { %v6017_v5 = vld [vmem:[#allocation4 + $0x290] sm:$0xf0]  ;;  %v6340_v11 = vor.u32 %v7509_v31, %v6337_v62  ;;  %3249 = vmatpush.bf16.msrb.mxu2 %v6212_v0  ;;  %v7425_v31 = vld [vmem:[#allocation4 + $0x264] sm:$0xf] }
 0x287   :  { %v9472_v3 = vpop.f32.mrf.mxu2  ;;  %v9474_v56 = vpop.f32.mrf.mxu3  ;;  %v6020_v13 = vor.u32 %v7429_v54, %v6017_v5  ;;  %3297 = vmatpush.bf16.msrb.mxu3 %v6356_v9  ;;  %v6001_v62 = vld [vmem:[#allocation4 + $0x270] sm:$0xf0] }
 0x289   :  { %3147 = vmatpush.bf16.msrb.mxu0 %v6020_v13  ;;  %v6004_v13 = vor.u32 %v7425_v31, %v6001_v62 }
 0x28b   :  { %3298 = vmatpush.bf16.msrb.mxu3 %v6340_v11 }
 0x28d   :  { %3148 = vmatpush.bf16.msrb.mxu0 %v6004_v13 }
 0x28e   :  { %6517 = vmatmul.msk.bf16.gmra.mxu2 %vm9247_vm15, %v11119_v26  ;;  %6529 = vmatmul.msk.bf16.gmra.mxu3 %vm9247_vm15, %v11120_v16  ;;  %v2771_v41 = vpop.f32.mrf.mxu0  ;;  %v5985_v16 = vld [vmem:[#allocation4 + $0x250] sm:$0xf0] }
 0x28f   :  { %v2820_v49 = vpop.f32.mrf.mxu1 }
 0x290   :  { %v9482_v14 = vadd.f32 %v2820_v49, %v2771_v41 }
 0x291   :  { %v9484_v7 = vpop.f32.mrf.mxu2  ;;  %v9486_v50 = vpop.f32.mrf.mxu3  ;;  %2966 = vmatmul.bf16.gmra.mxu0 %v9322_v1 }
 0x292   :  { %3015 = vmatmul.bf16.gmra.mxu1 %v9324_v51 }
 0x296   :  { %v2773_v15 = vpop.f32.mrf.mxu0 }
 0x297   :  { %v2822_v54 = vpop.f32.mrf.mxu1 }
 0x298   :  { %v9490_v5 = vadd.f32 %v2822_v54, %v2773_v15  ;;  %v6129_v15 = vld [vmem:[#allocation4 + $0x370] sm:$0xf0] }
 0x299   :  { %v9492_v9 = vpop.f32.mrf.mxu2  ;;  %v9494_v0 = vpop.f32.mrf.mxu3  ;;  %v6132_v54 = vor.u32 %v7457_v30, %v6129_v15 }
 0x29b   :  { %3197 = vmatpush.bf16.msrb.mxu1 %v6132_v54 }
 0x29e   :  { %6520 = vmatmul.msk.bf16.gmra.mxu2 %vm9338_vm1, %v11121_v12  ;;  %6532 = vmatmul.msk.bf16.gmra.mxu3 %vm9338_vm1, %v11122_v47  ;;  %v2776_v41 = vpop.f32.mrf.mxu0 }
 0x29f   :  { %v2825_v49 = vpop.f32.mrf.mxu1 }
 0x2a0   :  { %v9502_v11 = vadd.f32 %v2825_v49, %v2776_v41  ;;  %v7421_v49 = vld [vmem:[#allocation4 + $0x244] sm:$0xf] }
 0x2a1   :  { %v9504_v44 = vpop.f32.mrf.mxu2  ;;  %v9506_v60 = vpop.f32.mrf.mxu3  ;;  %2971 = vmatmul.bf16.gmra.mxu0 %v9366_v52  ;;  %v5988_v26 = vor.u32 %v7421_v49, %v5985_v16  ;;  %v7453_v16 = vld [vmem:[#allocation4 + $0x344] sm:$0xf]  ;;  %v6113_v49 = vld [vmem:[#allocation4 + $0x350] sm:$0xf0] }
 0x2a2   :  { %3020 = vmatmul.bf16.gmra.mxu1 %v9374_v6 }
 0x2a3   :  { %3149 = vmatpush.bf16.msrb.mxu0 %v5988_v26  ;;  %v6116_v26 = vor.u32 %v7453_v16, %v6113_v49  ;;  %v11125_v16 = vld [vmem:[#allocation17_spill] sm:$0xff]  ;;  %v11126_v49 = vld [vmem:[#allocation18_spill] sm:$0xff] }
 0x2a5   :  { %3198 = vmatpush.bf16.msrb.mxu1 %v6116_v26 }
 0x2a6   :  { %v2778_v31 = vpop.f32.mrf.mxu0 }
 0x2a7   :  { %v2827_v62 = vpop.f32.mrf.mxu1  ;;  %3150 = vmatpush.bf16.msrb.mxu0 %v5972_v37  ;;  %v6100_v37 = vor.u32 %v7449_v29, %v6097_v27 }
 0x2a8   :  { %v2828_v13 = vadd.f32 %v2827_v62, %v2778_v31 }
 0x2a9   :  { %v9511_v12 = vpop.f32.mrf.mxu2  ;;  %v9513_v41 = vpop.f32.mrf.mxu3  ;;  %3199 = vmatpush.bf16.msrb.mxu1 %v6100_v37  ;;  %v11127_v37 = vld [vmem:[#allocation23_spill] sm:$0xff] }
 0x2aa   :  { %v2877_v47 = vadd.f32 %v9432_v45, %v2828_v13  ;;  %v11123_v13 = vld [vmem:[#allocation11_spill] sm:$0xff] }
 0x2ac   :  { %v9516_v32 = vadd.f32 %v9434_v34, %v2877_v47 }
 0x2ae   :  { %3250 = vmatmul.bf16.vlgmr.msrb.gmra.mxu2 %v9151_v61  ;;  %3299 = vmatmul.bf16.vlgmr.msrb.gmra.mxu3 %v9154_v40  ;;  %v2781_v30 = vpop.f32.mrf.mxu0 }
 0x2af   :  { %v2830_v15 = vpop.f32.mrf.mxu1 }
 0x2b0   :  { %v2831_v54 = vadd.f32 %v2830_v15, %v2781_v30 }
 0x2b1   :  { %v3055_v31 = vpop.f32.mrf.mxu2  ;;  %v3104_v62 = vpop.f32.mrf.mxu3  ;;  %2976 = vmatmul.bf16.gmra.mxu0 %v11123_v13 }
 0x2b2   :  { %v2880_v45 = vadd.f32 %v9444_v18, %v2831_v54  ;;  %3025 = vmatmul.bf16.gmra.mxu1 %v11124_v57  ;;  %v9523_v47 = vadd.f32 %v3104_v62, %v3055_v31 }
 0x2b4   :  { %v9526_v34 = vadd.f32 %v9446_v48, %v2880_v45 }
 0x2b6   :  { %v2783_v40 = vpop.f32.mrf.mxu0 }
 0x2b7   :  { %v2832_v61 = vpop.f32.mrf.mxu1 }
 0x2b8   :  { %v2833_v30 = vadd.f32 %v2832_v61, %v2783_v40 }
 0x2b9   :  { %v3057_v15 = vpop.f32.mrf.mxu2  ;;  %v3106_v54 = vpop.f32.mrf.mxu3 }
 0x2ba   :  { %v2882_v18 = vadd.f32 %v9452_v33, %v2833_v30  ;;  %v9529_v19 = vadd.f32 %v3106_v54, %v3057_v15 }
 0x2bc   :  { %v9532_v31 = vadd.f32 %v9454_v4, %v2882_v18 }
 0x2be   :  { %3255 = vmatmul.bf16.gmra.mxu2 %v9279_v55  ;;  %3304 = vmatmul.bf16.gmra.mxu3 %v9288_v46  ;;  %v2786_v48 = vpop.f32.mrf.mxu0  ;;  %v5953_v46 = vld [vmem:[#allocation4 + $0x210] sm:$0xf0] }
 0x2bf   :  { %v2835_v45 = vpop.f32.mrf.mxu1 }
 0x2c0   :  { %v2836_v61 = vadd.f32 %v2835_v45, %v2786_v48 }
 0x2c1   :  { %v3060_v33 = vpop.f32.mrf.mxu2  ;;  %v3109_v62 = vpop.f32.mrf.mxu3  ;;  %2981 = vmatmul.bf16.gmra.mxu0 %v11125_v16 }
 0x2c2   :  { %v2885_v40 = vadd.f32 %v9464_v58, %v2836_v61  ;;  %3030 = vmatmul.bf16.gmra.mxu1 %v11126_v49  ;;  %v9539_v4 = vadd.f32 %v3109_v62, %v3060_v33  ;;  %v7413_v61 = vld [vmem:[#allocation4 + $0x204] sm:$0xf] }
 0x2c3   :  { %v5956_v55 = vor.u32 %v7413_v61, %v5953_v46  ;;  %v7445_v46 = vld [vmem:[#allocation4 + $0x304] sm:$0xf] }
 0x2c4   :  { %v9542_v26 = vadd.f32 %v9466_v43, %v2885_v40 }
 0x2c5   :  { %3151 = vmatpush.bf16.msrb.mxu0 %v5956_v55 }
 0x2c6   :  { %v2788_v30 = vpop.f32.mrf.mxu0 }
 0x2c7   :  { %v2837_v18 = vpop.f32.mrf.mxu1 }
 0x2c8   :  { %v2838_v15 = vadd.f32 %v2837_v18, %v2788_v30  ;;  %v11128_v30 = vld [vmem:[#allocation24_spill] sm:$0xff]  ;;  %v6081_v18 = vld [vmem:[#allocation4 + $0x310] sm:$0xf0] }
 0x2c9   :  { %v3062_v54 = vpop.f32.mrf.mxu2  ;;  %v3111_v48 = vpop.f32.mrf.mxu3  ;;  %v6084_v55 = vor.u32 %v7445_v46, %v6081_v18  ;;  %v7380_v46 = vld [vmem:[#allocation4 + $0xf4] sm:$0xf0] }
 0x2ca   :  { %v2887_v58 = vadd.f32 %v9472_v3, %v2838_v15  ;;  %v9545_v45 = vadd.f32 %v3111_v48, %v3062_v54 }
 0x2cb   :  { %3200 = vmatpush.bf16.msrb.mxu1 %v6084_v55 }
 0x2cc   :  { %v9548_v33 = vadd.f32 %v9474_v56, %v2887_v58 }
 0x2ce   :  { %3260 = vmatmul.bf16.gmra.mxu2 %v9322_v1  ;;  %3309 = vmatmul.bf16.gmra.mxu3 %v9324_v51  ;;  %v2791_v43 = vpop.f32.mrf.mxu0  ;;  %v7444_v51 = vld [vmem:[#allocation4 + $0x2f4] sm:$0xf0] }
 0x2cf   :  { %v2840_v40 = vpop.f32.mrf.mxu1 }
 0x2d0   :  { %v2841_v62 = vadd.f32 %v2840_v40, %v2791_v43 }
 0x2d1   :  { %v3065_v29 = vpop.f32.mrf.mxu2  ;;  %v3114_v27 = vpop.f32.mrf.mxu3  ;;  %2986 = vmatmul.bf16.gmra.mxu0 %v11127_v37 }
 0x2d2   :  { %v2890_v3 = vadd.f32 %v9484_v7, %v2841_v62  ;;  %3035 = vmatmul.bf16.gmra.mxu1 %v11128_v30  ;;  %v9555_v56 = vadd.f32 %v3114_v27, %v3065_v29  ;;  %v6071_v62 = vld [vmem:[#allocation4 + $0x2e8] sm:$0xf] }
 0x2d3   :  { %v6072_v1 = vor.u32 %v7444_v51, %v6071_v62  ;;  %v5815_v27 = vld [vmem:[#allocation4 + $0xe8] sm:$0xf] }
 0x2d4   :  { %v9558_v15 = vadd.f32 %v9486_v50, %v2890_v3  ;;  %v5816_v55 = vor.u32 %v7380_v46, %v5815_v27  ;;  %v2860_v46 = vadd.f32 %v9370_v10, %v9442_v24 }
 0x2d5   :  { %3438 = vmatpush.bf16.msra.mxu2 %v6072_v1  ;;  %v11130_v1 = vld [vmem:[#allocation30_spill] sm:$0xff] }
 0x2d6   :  { %v2793_v58 = vpop.f32.mrf.mxu0  ;;  %3340 = vmatpush.bf16.msra.mxu0 %v5816_v55  ;;  %v7440_v55 = vld [vmem:[#allocation4 + $0x2d4] sm:$0xf0] }
 0x2d7   :  { %v2842_v54 = vpop.f32.mrf.mxu1 }
 0x2d8   :  { %v2843_v48 = vadd.f32 %v2842_v54, %v2793_v58  ;;  %v7476_v58 = vld [vmem:[#allocation4 + $0x3f4] sm:$0xf0] }
 0x2d9   :  { %v3067_v61 = vpop.f32.mrf.mxu2  ;;  %v3116_v43 = vpop.f32.mrf.mxu3 }
 0x2da   :  { %v2892_v7 = vadd.f32 %v9492_v9, %v2843_v48  ;;  %v9561_v40 = vadd.f32 %v3116_v43, %v3067_v61  ;;  %v6199_v9 = vld [vmem:[#allocation4 + $0x3e8] sm:$0xf]  ;;  %v7412_v43 = vld [vmem:[#allocation4 + $0x1f4] sm:$0xf0] }
 0x2db   :  { %v6200_v54 = vor.u32 %v7476_v58, %v6199_v9 }
 0x2dc   :  { %v9564_v29 = vadd.f32 %v9494_v0, %v2892_v7  ;;  %v11129_v0 = vld [vmem:[#allocation29_spill] sm:$0xff]  ;;  %v5943_v7 = vld [vmem:[#allocation4 + $0x1e8] sm:$0xf] }
 0x2dd   :  { %3487 = vmatpush.bf16.msra.mxu3 %v6200_v54 }
 0x2de   :  { %3265 = vmatmul.bf16.gmra.mxu2 %v9366_v52  ;;  %3314 = vmatmul.bf16.gmra.mxu3 %v9374_v6  ;;  %v2796_v50 = vpop.f32.mrf.mxu0  ;;  %v5944_v6 = vor.u32 %v7412_v43, %v5943_v7 }
 0x2df   :  { %v2845_v3 = vpop.f32.mrf.mxu1 }
 0x2e0   :  { %v2846_v18 = vadd.f32 %v2845_v3, %v2796_v50  ;;  %3389 = vmatpush.bf16.msra.mxu1 %v5944_v6  ;;  %v2909_v6 = vadd.f32 %v9372_v42, %v2860_v46 }
 0x2e1   :  { %v3070_v51 = vpop.f32.mrf.mxu2  ;;  %v3119_v61 = vpop.f32.mrf.mxu3  ;;  %2991 = vmatmul.bf16.gmra.mxu0 %v11129_v0 }
 0x2e2   :  { %v2895_v48 = vadd.f32 %v9504_v44, %v2846_v18  ;;  %3040 = vmatmul.bf16.gmra.mxu1 %v11130_v1  ;;  %v9571_v62 = vadd.f32 %v3119_v61, %v3070_v51  ;;  %v6055_v51 = vld [vmem:[#allocation4 + $0x2c8] sm:$0xf] }
 0x2e3   :  { %v6056_v54 = vor.u32 %v7440_v55, %v6055_v51  ;;  %v7408_v51 = vld [vmem:[#allocation4 + $0x1d4] sm:$0xf0] }
 0x2e4   :  { %v9574_v50 = vadd.f32 %v9506_v60, %v2895_v48  ;;  %v7376_v60 = vld [vmem:[#allocation4 + $0xd4] sm:$0xf0]  ;;  %v6183_v48 = vld [vmem:[#allocation4 + $0x3c8] sm:$0xf] }
 0x2e5   :  { %3439 = vmatpush.bf16.msra.mxu2 %v6056_v54 }
 0x2e6   :  { %v2798_v3 = vpop.f32.mrf.mxu0 }
 0x2e7   :  { %v2847_v27 = vpop.f32.mrf.mxu1 }
 0x2e8   :  { %v2848_v44 = vadd.f32 %v2847_v27, %v2798_v3  ;;  %v7472_v3 = vld [vmem:[#allocation4 + $0x3d4] sm:$0xf0] }
 0x2e9   :  { %v3072_v18 = vpop.f32.mrf.mxu2  ;;  %v3121_v58 = vpop.f32.mrf.mxu3  ;;  %v6184_v27 = vor.u32 %v7472_v3, %v6183_v48  ;;  %v7436_v3 = vld [vmem:[#allocation4 + $0x2b4] sm:$0xf0] }
 0x2ea   :  { %v2897_v9 = vadd.f32 %v9511_v12, %v2848_v44  ;;  %v9579_v52 = vadd.f32 %v3121_v58, %v3072_v18  ;;  %v5799_v12 = vld [vmem:[#allocation4 + $0xc8] sm:$0xf] }
 0x2eb   :  { %v5800_v43 = vor.u32 %v7376_v60, %v5799_v12  ;;  %v11133_v18 = vld [vmem:[#allocation14_spill] sm:$0xff]  ;;  %3488 = vmatpush.bf16.msra.mxu3 %v6184_v27  ;;  %v7468_v27 = vld [vmem:[#allocation4 + $0x3b4] sm:$0xf0] }
 0x2ec   :  { %v9582_v61 = vadd.f32 %v9513_v41, %v2897_v9  ;;  %v2862_v41 = vadd.f32 %v9376_v59, %v9450_v38  ;;  %v11132_v9 = vld [vmem:[#allocation13_spill] sm:$0xff]  ;;  %v5927_v58 = vld [vmem:[#allocation4 + $0x1c8] sm:$0xf] }
 0x2ed   :  { %3341 = vmatpush.bf16.msra.mxu0 %v5800_v43  ;;  %v5928_v54 = vor.u32 %v7408_v51, %v5927_v58  ;;  %v6023_v58 = vld [vmem:[#allocation4 + $0x288] sm:$0xf]  ;;  %v7432_v51 = vld [vmem:[#allocation4 + $0x294] sm:$0xf0] }
 0x2ee   :  { %3270 = vmatmul.bf16.gmra.mxu2 %v11123_v13  ;;  %3319 = vmatmul.bf16.gmra.mxu3 %v11124_v57  ;;  %v2957_v10 = vpop.f32.mrf.mxu0 }
 0x2ef   :  { %v3006_v24 = vpop.f32.mrf.mxu1  ;;  %v2958_v7 = vadd.f32 %v2957_v10, %v2909_v6  ;;  %3390 = vmatpush.bf16.msra.mxu1 %v5928_v54  ;;  %v2911_v6 = vadd.f32 %v9378_v23, %v2862_v41  ;;  %v6151_v41 = vld [vmem:[#allocation4 + $0x388] sm:$0xf]  ;;  %v7464_v54 = vld [vmem:[#allocation4 + $0x394] sm:$0xf0] }
 0x2f1   :  { %v9589_v44 = vadd.f32 %v3006_v24, %v2958_v7  ;;  %v3075_v42 = vpop.f32.mrf.mxu2  ;;  %v3124_v46 = vpop.f32.mrf.mxu3  ;;  %3152 = vmatmul.bf16.vlgmr.msrb.gmra.mxu0 %v11132_v9  ;;  %v2865_v24 = vadd.f32 %v9388_v28, %v9462_v17  ;;  %v6039_v7 = vld [vmem:[#allocation4 + $0x2a8] sm:$0xf] }
 0x2f2   :  { %3201 = vmatmul.bf16.vlgmr.msrb.gmra.mxu1 %v11133_v18  ;;  %v9593_v55 = vadd.f32 %v3124_v46, %v3075_v42  ;;  %v6167_v42 = vld [vmem:[#allocation4 + $0x3a8] sm:$0xf]  ;;  %v6040_v43 = vor.u32 %v7436_v3, %v6039_v7  ;;  %v2867_v3 = vadd.f32 %v9394_v20, %v9470_v53 }
 0x2f3   :  { %11131 = vst [vmem:[#allocation11_spill] sm:$0xff] %v9589_v44  ;;  %v6168_v23 = vor.u32 %v7468_v27, %v6167_v42  ;;  %v2914_v28 = vadd.f32 %v9390_v63, %v2865_v24  ;;  %v11136_v24 = vld [vmem:[#allocation19_spill] sm:$0xff]  ;;  %v11137_v27 = vld [vmem:[#allocation20_spill] sm:$0xff] }
 0x2f4   :  { %3440 = vmatpush.bf16.msra.mxu2 %v6040_v43 }
 0x2f5   :  { %3489 = vmatpush.bf16.msra.mxu3 %v6168_v23  ;;  %v6135_v23 = vld [vmem:[#allocation4 + $0x368] sm:$0xf] }
 0x2f6   :  { %v2959_v10 = vpop.f32.mrf.mxu0 }
 0x2f7   :  { %v3008_v59 = vpop.f32.mrf.mxu1  ;;  %v2960_v38 = vadd.f32 %v2959_v10, %v2911_v6  ;;  %v6024_v6 = vor.u32 %v7432_v51, %v6023_v58  ;;  %v6007_v58 = vld [vmem:[#allocation4 + $0x268] sm:$0xf]  ;;  %v7428_v51 = vld [vmem:[#allocation4 + $0x274] sm:$0xf0] }
 0x2f9   :  { %v9598_v12 = vadd.f32 %v3008_v59, %v2960_v38  ;;  %v3077_v60 = vpop.f32.mrf.mxu2  ;;  %v3126_v48 = vpop.f32.mrf.mxu3  ;;  %v6152_v59 = vor.u32 %v7464_v54, %v6151_v41  ;;  %v5783_v38 = vld [vmem:[#allocation4 + $0xa8] sm:$0xf]  ;;  %3441 = vmatpush.bf16.msra.mxu2 %v6024_v6  ;;  %v6008_v54 = vor.u32 %v7428_v51, %v6007_v58  ;;  %v7460_v6 = vld [vmem:[#allocation4 + $0x374] sm:$0xf0] }
 0x2fa   :  { %v9600_v46 = vadd.f32 %v3126_v48, %v3077_v60  ;;  %v7372_v60 = vld [vmem:[#allocation4 + $0xb4] sm:$0xf0]  ;;  %v6136_v53 = vor.u32 %v7460_v6, %v6135_v23  ;;  %v5975_v6 = vld [vmem:[#allocation4 + $0x228] sm:$0xf] }
 0x2fb   :  { %11134 = vst [vmem:[#allocation12_spill] sm:$0xff] %v9598_v12  ;;  %v5784_v7 = vor.u32 %v7372_v60, %v5783_v38  ;;  %3490 = vmatpush.bf16.msra.mxu3 %v6152_v59  ;;  %v7424_v38 = vld [vmem:[#allocation4 + $0x254] sm:$0xf0]  ;;  %v6119_v60 = vld [vmem:[#allocation4 + $0x348] sm:$0xf]  ;;  %v2916_v12 = vadd.f32 %v9396_v25, %v2867_v3 }
 0x2fc   :  { %v7452_v3 = vld [vmem:[#allocation4 + $0x334] sm:$0xf0] }
 0x2fd   :  { %3342 = vmatpush.bf16.msra.mxu0 %v5784_v7  ;;  %3442 = vmatpush.bf16.msra.mxu2 %v6008_v54  ;;  %v7420_v54 = vld [vmem:[#allocation4 + $0x234] sm:$0xf0] }
 0x2fe   :  { %3275 = vmatmul.bf16.gmra.mxu2 %v11125_v16  ;;  %3324 = vmatmul.bf16.gmra.mxu3 %v11126_v49  ;;  %v2962_v17 = vpop.f32.mrf.mxu0  ;;  %v5976_v25 = vor.u32 %v7420_v54, %v5975_v6  ;;  %v7390_v16 = vld [vmem:[#allocation4 + $0x14c] sm:$0xf] }
 0x2ff   :  { %v3011_v10 = vpop.f32.mrf.mxu1  ;;  %v2963_v48 = vadd.f32 %v2962_v17, %v2914_v28  ;;  %v5911_v28 = vld [vmem:[#allocation4 + $0x1a8] sm:$0xf]  ;;  %v7404_v17 = vld [vmem:[#allocation4 + $0x1b4] sm:$0xf0]  ;;  %3491 = vmatpush.bf16.msra.mxu3 %v6136_v53 }
 0x300   :  { %v5912_v20 = vor.u32 %v7404_v17, %v5911_v28  ;;  %v6103_v28 = vld [vmem:[#allocation4 + $0x328] sm:$0xf]  ;;  %v7416_v53 = vld [vmem:[#allocation4 + $0x214] sm:$0xf0] }
 0x301   :  { %v9607_v42 = vadd.f32 %v3011_v10, %v2963_v48  ;;  %v3080_v43 = vpop.f32.mrf.mxu2  ;;  %v3129_v63 = vpop.f32.mrf.mxu3  ;;  %3157 = vmatmul.bf16.gmra.mxu0 %v11136_v24  ;;  %v5991_v10 = vld [vmem:[#allocation4 + $0x248] sm:$0xf] }
 0x302   :  { %3206 = vmatmul.bf16.gmra.mxu1 %v11137_v27  ;;  %v9611_v41 = vadd.f32 %v3129_v63, %v3080_v43  ;;  %v5992_v48 = vor.u32 %v7424_v38, %v5991_v10  ;;  %v2870_v63 = vadd.f32 %v9404_v2, %v9482_v14  ;;  %v6087_v10 = vld [vmem:[#allocation4 + $0x308] sm:$0xf]  ;;  %v7448_v2 = vld [vmem:[#allocation4 + $0x314] sm:$0xf0] }
 0x303   :  { %11135 = vst [vmem:[#allocation60_spill] sm:$0xff] %v9607_v42  ;;  %v7456_v42 = vld [vmem:[#allocation4 + $0x354] sm:$0xf0]  ;;  %3391 = vmatpush.bf16.msra.mxu1 %v5912_v20  ;;  %v5959_v20 = vld [vmem:[#allocation4 + $0x208] sm:$0xf] }
 0x304   :  { %v6120_v59 = vor.u32 %v7456_v42, %v6119_v60  ;;  %3443 = vmatpush.bf16.msra.mxu2 %v5992_v48  ;;  %v6104_v42 = vor.u32 %v7452_v3, %v6103_v28  ;;  %v7368_v14 = vld [vmem:[#allocation4 + $0x94] sm:$0xf0]  ;;  %v2919_v38 = vadd.f32 %v9406_v36, %v2870_v63  ;;  %v11140_v36 = vld [vmem:[#allocation25_spill] sm:$0xff]  ;;  %v11141_v63 = vld [vmem:[#allocation26_spill] sm:$0xff] }
 0x305   :  { %v5895_v28 = vld [vmem:[#allocation4 + $0x188] sm:$0xf] }
 0x306   :  { %v2964_v44 = vpop.f32.mrf.mxu0  ;;  %3492 = vmatpush.bf16.msra.mxu3 %v6120_v59 }
 0x307   :  { %v3013_v43 = vpop.f32.mrf.mxu1  ;;  %v2965_v7 = vadd.f32 %v2964_v44, %v2916_v12  ;;  %v5767_v44 = vld [vmem:[#allocation4 + $0x88] sm:$0xf]  ;;  %v5960_v12 = vor.u32 %v7416_v53, %v5959_v20 }
 0x308   :  { %3444 = vmatpush.bf16.msra.mxu2 %v5976_v25  ;;  %v5768_v60 = vor.u32 %v7368_v14, %v5767_v44  ;;  %v7400_v25 = vld [vmem:[#allocation4 + $0x194] sm:$0xf0]  ;;  %v5751_v14 = vld [vmem:[#allocation4 + $0x68] sm:$0xf] }
 0x309   :  { %v9616_v58 = vadd.f32 %v3013_v43, %v2965_v7  ;;  %v3082_v51 = vpop.f32.mrf.mxu2  ;;  %v3131_v23 = vpop.f32.mrf.mxu3  ;;  %v6088_v7 = vor.u32 %v7448_v2, %v6087_v10  ;;  %v5896_v20 = vor.u32 %v7400_v25, %v5895_v28  ;;  %v5879_v28 = vld [vmem:[#allocation4 + $0x168] sm:$0xf]  ;;  %v7396_v25 = vld [vmem:[#allocation4 + $0x174] sm:$0xf0] }
 0x30a   :  { %v9618_v17 = vadd.f32 %v3131_v23, %v3082_v51  ;;  %3493 = vmatpush.bf16.msra.mxu3 %v6104_v42  ;;  %3343 = vmatpush.bf16.msra.mxu0 %v5768_v60  ;;  %v2872_v51 = vadd.f32 %v9416_v22, %v9490_v5  ;;  %v2875_v5 = vadd.f32 %v9422_v35, %v9502_v11 }
 0x30b   :  { %11138 = vst [vmem:[#allocation61_spill] sm:$0xff] %v9616_v58  ;;  %3392 = vmatpush.bf16.msra.mxu1 %v5896_v20 }
 0x30c   :  { %3445 = vmatpush.bf16.msra.mxu2 %v5960_v12  ;;  %v2921_v53 = vadd.f32 %v9418_v8, %v2872_v51 }
 0x30e   :  { %3280 = vmatmul.bf16.gmra.mxu2 %v11127_v37  ;;  %3329 = vmatmul.bf16.gmra.mxu3 %v11128_v30  ;;  %v2967_v48 = vpop.f32.mrf.mxu0  ;;  %v11166_v30 = vld [vmem:[#allocation35_spill] sm:$0xff] }
 0x30f   :  { %v3016_v43 = vpop.f32.mrf.mxu1  ;;  %v2968_v59 = vadd.f32 %v2967_v48, %v2919_v38  ;;  %3494 = vmatpush.bf16.msra.mxu3 %v6088_v7  ;;  %v7364_v38 = vld [vmem:[#allocation4 + $0x74] sm:$0xf0] }
 0x310   :  { %v5752_v48 = vor.u32 %v7364_v38, %v5751_v14  ;;  %v7360_v14 = vld [vmem:[#allocation4 + $0x54] sm:$0xf0] }
 0x311   :  { %v9625_v23 = vadd.f32 %v3016_v43, %v2968_v59  ;;  %v3085_v6 = vpop.f32.mrf.mxu2  ;;  %v3134_v54 = vpop.f32.mrf.mxu3  ;;  %3162 = vmatmul.bf16.gmra.mxu0 %v11140_v36  ;;  %v2924_v43 = vadd.f32 %v9424_v21, %v2875_v5  ;;  %v5880_v21 = vor.u32 %v7396_v25, %v5879_v28  ;;  %v11149_v28 = vld [vmem:[#allocation34_spill] sm:$0xff] }
 0x312   :  { %3211 = vmatmul.bf16.gmra.mxu1 %v11141_v63  ;;  %v9629_v3 = vadd.f32 %v3134_v54, %v3085_v6  ;;  %3344 = vmatpush.bf16.msra.mxu0 %v5752_v48  ;;  %v11144_v6 = vld [vmem:[#allocation31_spill] sm:$0xff]  ;;  %v11145_v54 = vld [vmem:[#allocation32_spill] sm:$0xff]  ;;  %v5863_v25 = vld [vmem:[#allocation4 + $0x148] sm:$0xf] }
 0x313   :  { %11139 = vst [vmem:[#allocation62_spill] sm:$0xff] %v9625_v23  ;;  %3393 = vmatpush.bf16.msra.mxu1 %v5880_v21  ;;  %v7392_v21 = vld [vmem:[#allocation4 + $0x154] sm:$0xf0] }
 0x316   :  { %v2969_v42 = vpop.f32.mrf.mxu0 }
 0x317   :  { %v3018_v44 = vpop.f32.mrf.mxu1  ;;  %v2970_v22 = vadd.f32 %v2969_v42, %v2921_v53 }
 0x319   :  { %v9634_v12 = vadd.f32 %v3018_v44, %v2970_v22  ;;  %v3087_v10 = vpop.f32.mrf.mxu2  ;;  %v3136_v2 = vpop.f32.mrf.mxu3 }
 0x31a   :  { %v9636_v60 = vadd.f32 %v3136_v2, %v3087_v10  ;;  %v5735_v2 = vld [vmem:[#allocation4 + $0x48] sm:$0xf] }
 0x31b   :  { %11142 = vst [vmem:[#allocation63_spill] sm:$0xff] %v9634_v12  ;;  %v5736_v48 = vor.u32 %v7360_v14, %v5735_v2  ;;  %v5719_v14 = vld [vmem:[#allocation4 + $0x28] sm:$0xf] }
 0x31d   :  { %3345 = vmatpush.bf16.msra.mxu0 %v5736_v48  ;;  %v7356_v48 = vld [vmem:[#allocation4 + $0x34] sm:$0xf0] }
 0x31e   :  { %3285 = vmatmul.bf16.gmra.mxu2 %v11129_v0  ;;  %3334 = vmatmul.bf16.gmra.mxu3 %v11130_v1  ;;  %v2972_v8 = vpop.f32.mrf.mxu0 }
 0x31f   :  { %v3021_v59 = vpop.f32.mrf.mxu1  ;;  %v2973_v7 = vadd.f32 %v2972_v8, %v2924_v43 }
 0x321   :  { %v9641_v35 = vadd.f32 %v3021_v59, %v2973_v7  ;;  %v3090_v11 = vpop.f32.mrf.mxu2  ;;  %v3139_v51 = vpop.f32.mrf.mxu3  ;;  %3167 = vmatmul.bf16.gmra.mxu0 %v11144_v6 }
 0x322   :  { %3216 = vmatmul.bf16.gmra.mxu1 %v11145_v54  ;;  %v9645_v20 = vadd.f32 %v3139_v51, %v3090_v11  ;;  %v11148_v51 = vld [vmem:[#allocation33_spill] sm:$0xff] }
 0x323   :  { %11143 = vst [vmem:[#allocation64_spill] sm:$0xff] %v9641_v35 }
 0x326   :  { %v2974_v53 = vpop.f32.mrf.mxu0 }
 0x327   :  { %v3023_v42 = vpop.f32.mrf.mxu1  ;;  %v2975_v44 = vadd.f32 %v2974_v53, %v9516_v32  ;;  %v5864_v53 = vor.u32 %v7392_v21, %v5863_v25 }
 0x329   :  { %v9648_v22 = vadd.f32 %v3023_v42, %v2975_v44  ;;  %v3092_v5 = vpop.f32.mrf.mxu2  ;;  %v3141_v10 = vpop.f32.mrf.mxu3  ;;  %3394 = vmatpush.bf16.msra.mxu1 %v5864_v53 }
 0x32a   :  { %v9650_v38 = vadd.f32 %v3141_v10, %v3092_v5 }
 0x32b   :  { %11146 = vst [vmem:[#allocation65_spill] sm:$0xff] %v9648_v22  ;;  %v7352_v22 = vld [vmem:[#allocation4 + $0x14] sm:$0xf0] }
 0x32e   :  { %3446 = vmatmul.bf16.vlgmr.msra.gmra.mxu2 %v11132_v9  ;;  %3495 = vmatmul.bf16.vlgmr.msra.gmra.mxu3 %v11133_v18  ;;  %v2977_v43 = vpop.f32.mrf.mxu0 }
 0x32f   :  { %v3026_v8 = vpop.f32.mrf.mxu1  ;;  %v2978_v59 = vadd.f32 %v2977_v43, %v9526_v34  ;;  %v5720_v43 = vor.u32 %v7356_v48, %v5719_v14  ;;  %v5847_v14 = vld [vmem:[#allocation4 + $0x128] sm:$0xf]  ;;  %v7388_v48 = vld [vmem:[#allocation4 + $0x134] sm:$0xf0] }
 0x331   :  { %v9655_v7 = vadd.f32 %v3026_v8, %v2978_v59  ;;  %v9657_v32 = vpop.f32.mrf.mxu2  ;;  %v9659_v11 = vpop.f32.mrf.mxu3  ;;  %6535 = vmatmul.msk.bf16.gmra.mxu0 %vm8971_vm13, %v11148_v51 }
 0x332   :  { %6547 = vmatmul.msk.bf16.gmra.mxu1 %vm8971_vm13, %v11149_v28  ;;  %3346 = vmatpush.bf16.msra.mxu0 %v5720_v43  ;;  %v5848_v43 = vor.u32 %v7388_v48, %v5847_v14 }
 0x333   :  { %11147 = vst [vmem:[#allocation66_spill] sm:$0xff] %v9655_v7  ;;  %v5703_v7 = vld [vmem:[#allocation4 + $0x8] sm:$0xf] }
 0x334   :  { %3395 = vmatpush.bf16.msra.mxu1 %v5848_v43  ;;  %v5704_v35 = vor.u32 %v7352_v22, %v5703_v7  ;;  %v11159_v22 = vld [vmem:[#allocation46_spill] sm:$0xff]  ;;  %v7384_v7 = vld [vmem:[#allocation4 + $0x114] sm:$0xf0] }
 0x336   :  { %v2979_v42 = vpop.f32.mrf.mxu0  ;;  %3347 = vmatpush.bf16.msra.mxu0 %v5704_v35  ;;  %v5831_v35 = vld [vmem:[#allocation4 + $0x108] sm:$0xf] }
 0x337   :  { %v3028_v34 = vpop.f32.mrf.mxu1  ;;  %v2980_v44 = vadd.f32 %v2979_v42, %v9532_v31  ;;  %v11152_v42 = vld [vmem:[#allocation38_spill] sm:$0xff] }
 0x339   :  { %v9668_v5 = vadd.f32 %v3028_v34, %v2980_v44  ;;  %v9670_v10 = vpop.f32.mrf.mxu2  ;;  %v9672_v2 = vpop.f32.mrf.mxu3  ;;  %v11154_v44 = vld [vmem:[#allocation39_spill] sm:$0xff]  ;;  %v7557_v34 = vld [vmem:[%s10870_s5 + $0x80] sm:$0xff] }
 0x33b   :  { %11150 = vst [vmem:[#allocation67_spill] sm:$0xff] %v9668_v5 }
 0x33e   :  { %3451 = vmatmul.bf16.gmra.mxu2 %v11136_v24  ;;  %3500 = vmatmul.bf16.gmra.mxu3 %v11137_v27  ;;  %v2982_v8 = vpop.f32.mrf.mxu0  ;;  %v7508_v24 = vld [vmem:[#allocation4 + $0x4f4] sm:$0xf0] }
 0x33f   :  { %v3031_v59 = vpop.f32.mrf.mxu1  ;;  %v2983_v25 = vadd.f32 %v2982_v8, %v9542_v26 }
 0x341   :  { %v9677_v21 = vadd.f32 %v3031_v59, %v2983_v25  ;;  %v9679_v31 = vpop.f32.mrf.mxu2  ;;  %v9681_v53 = vpop.f32.mrf.mxu3  ;;  %6538 = vmatmul.msk.bf16.gmra.mxu0 %vm9116_vm14, %v11152_v42 }
 0x342   :  { %6550 = vmatmul.msk.bf16.gmra.mxu1 %vm9116_vm14, %v11154_v44 }
 0x343   :  { %11151 = vst [vmem:[#allocation68_spill] sm:$0xff] %v9677_v21 }
 0x346   :  { %v2984_v5 = vpop.f32.mrf.mxu0 }
 0x347   :  { %v3033_v26 = vpop.f32.mrf.mxu1  ;;  %v2985_v8 = vadd.f32 %v2984_v5, %v9548_v33 }
 0x349   :  { %v9690_v59 = vadd.f32 %v3033_v26, %v2985_v8  ;;  %v9692_v25 = vpop.f32.mrf.mxu2  ;;  %v9694_v21 = vpop.f32.mrf.mxu3  ;;  %v11157_v26 = vld [vmem:[#allocation45_spill] sm:$0xff] }
 0x34b   :  { %11155 = vst [vmem:[#allocation37_spill] sm:$0xff] %v9690_v59  ;;  %v5832_v59 = vor.u32 %v7384_v7, %v5831_v35  ;;  %v6327_v7 = vld [vmem:[#allocation4 + $0x4e8] sm:$0xf] }
 0x34d   :  { %3396 = vmatpush.bf16.msra.mxu1 %v5832_v59  ;;  %v7410_v59 = vld [vmem:[#allocation4 + $0x1ec] sm:$0xf] }
 0x34e   :  { %3456 = vmatmul.bf16.gmra.mxu2 %v11140_v36  ;;  %3505 = vmatmul.bf16.gmra.mxu3 %v11141_v63  ;;  %v2987_v14 = vpop.f32.mrf.mxu0  ;;  %v5817_v36 = vld [vmem:[#allocation4 + $0xf8] sm:$0xf0] }
 0x34f   :  { %v3036_v48 = vpop.f32.mrf.mxu1  ;;  %v2988_v43 = vadd.f32 %v2987_v14, %v9558_v15 }
 0x351   :  { %v9699_v12 = vadd.f32 %v3036_v48, %v2988_v43  ;;  %v9701_v33 = vpop.f32.mrf.mxu2  ;;  %v9703_v5 = vpop.f32.mrf.mxu3  ;;  %6541 = vmatmul.msk.bf16.gmra.mxu0 %vm9247_vm15, %v11157_v26 }
 0x352   :  { %6553 = vmatmul.msk.bf16.gmra.mxu1 %vm9247_vm15, %v11159_v22 }
 0x353   :  { %11156 = vst [vmem:[#allocation69_spill] sm:$0xff] %v9699_v12  ;;  %v7378_v12 = vld [vmem:[#allocation4 + $0xec] sm:$0xf] }
 0x354   :  { %v5820_v35 = vor.u32 %v7378_v12, %v5817_v36  ;;  %v11164_v36 = vld [vmem:[#allocation54_spill] sm:$0xff] }
 0x356   :  { %v2989_v23 = vpop.f32.mrf.mxu0  ;;  %3634 = vmatpush.bf16.msrb.mxu2 %v5820_v35 }
 0x357   :  { %v3038_v63 = vpop.f32.mrf.mxu1  ;;  %v2990_v15 = vadd.f32 %v2989_v23, %v9564_v29  ;;  %v6328_v23 = vor.u32 %v7508_v24, %v6327_v7  ;;  %v7540_v24 = vld [vmem:[#allocation4 + $0x5f4] sm:$0xf0] }
 0x359   :  { %v9712_v14 = vadd.f32 %v3038_v63, %v2990_v15  ;;  %v9714_v48 = vpop.f32.mrf.mxu2  ;;  %v9716_v43 = vpop.f32.mrf.mxu3  ;;  %v5945_v63 = vld [vmem:[#allocation4 + $0x1f8] sm:$0xf0]  ;;  %3536 = vmatpush.bf16.msrb.mxu0 %v6328_v23 }
 0x35a   :  { %v5948_v15 = vor.u32 %v7410_v59, %v5945_v63  ;;  %v7374_v63 = vld [vmem:[#allocation4 + $0xcc] sm:$0xf] }
 0x35b   :  { %11160 = vst [vmem:[#allocation45_spill] sm:$0xff] %v9712_v14 }
 0x35c   :  { %3683 = vmatpush.bf16.msrb.mxu3 %v5948_v15 }
 0x35e   :  { %3461 = vmatmul.bf16.gmra.mxu2 %v11144_v6  ;;  %3510 = vmatmul.bf16.gmra.mxu3 %v11145_v54  ;;  %v2992_v58 = vpop.f32.mrf.mxu0  ;;  %v11162_v6 = vld [vmem:[#allocation53_spill] sm:$0xff] }
 0x35f   :  { %v3041_v27 = vpop.f32.mrf.mxu1  ;;  %v2993_v29 = vadd.f32 %v2992_v58, %v9574_v50  ;;  %v6455_v50 = vld [vmem:[#allocation4 + $0x5e8] sm:$0xf] }
 0x361   :  { %v9721_v14 = vadd.f32 %v3041_v27, %v2993_v29  ;;  %v9723_v18 = vpop.f32.mrf.mxu2  ;;  %v9725_v9 = vpop.f32.mrf.mxu3  ;;  %6544 = vmatmul.msk.bf16.gmra.mxu0 %vm9338_vm1, %v11162_v6  ;;  %v6456_v27 = vor.u32 %v7540_v24, %v6455_v50  ;;  %v6311_v50 = vld [vmem:[#allocation4 + $0x4c8] sm:$0xf]  ;;  %v7504_v24 = vld [vmem:[#allocation4 + $0x4d4] sm:$0xf0] }
 0x362   :  { %6556 = vmatmul.msk.bf16.gmra.mxu1 %vm9338_vm1, %v11164_v36 }
 0x363   :  { %11161 = vst [vmem:[#allocation44_spill] sm:$0xff] %v9721_v14  ;;  %3585 = vmatpush.bf16.msrb.mxu1 %v6456_v27  ;;  %v5801_v14 = vld [vmem:[#allocation4 + $0xd8] sm:$0xf0]  ;;  %v6312_v27 = vor.u32 %v7504_v24, %v6311_v50 }
 0x365   :  { %3537 = vmatpush.bf16.msrb.mxu0 %v6312_v27  ;;  %v7370_v27 = vld [vmem:[#allocation4 + $0xac] sm:$0xf] }
 0x366   :  { %v2994_v58 = vpop.f32.mrf.mxu0 }
 0x367   :  { %v3043_v12 = vpop.f32.mrf.mxu1  ;;  %v2995_v35 = vadd.f32 %v2994_v58, %v9582_v61  ;;  %v5804_v61 = vor.u32 %v7374_v63, %v5801_v14  ;;  %v7406_v58 = vld [vmem:[#allocation4 + $0x1cc] sm:$0xf] }
 0x369   :  { %v9734_v7 = vadd.f32 %v3043_v12, %v2995_v35  ;;  %v9736_v59 = vpop.f32.mrf.mxu2  ;;  %v9738_v29 = vpop.f32.mrf.mxu3  ;;  %v5929_v35 = vld [vmem:[#allocation4 + $0x1d8] sm:$0xf0]  ;;  %3635 = vmatpush.bf16.msrb.mxu2 %v5804_v61 }
 0x36b   :  { %11165 = vst [vmem:[#allocation46_spill] sm:$0xff] %v9734_v7  ;;  %v5932_v7 = vor.u32 %v7406_v58, %v5929_v35 }
 0x36d   :  { %3684 = vmatpush.bf16.msrb.mxu3 %v5932_v7 }
 0x36e   :  { %6583 = vmatmul.msk.bf16.gmra.mxu2 %vm8971_vm13, %v11148_v51  ;;  %6595 = vmatmul.msk.bf16.gmra.mxu3 %vm8971_vm13, %v11149_v28  ;;  %v3153_v23 = vpop.f32.mrf.mxu0  ;;  %v11167_v28 = vld [vmem:[#allocation36_spill] sm:$0xff] }
 0x36f   :  { %v3202_v15 = vpop.f32.mrf.mxu1  ;;  %v3154_v12 = vadd.f32 %v3153_v23, %v9523_v47  ;;  %v6439_v47 = vld [vmem:[#allocation4 + $0x5c8] sm:$0xf]  ;;  %v7536_v23 = vld [vmem:[#allocation4 + $0x5d4] sm:$0xf0] }
 0x371   :  { %v3203_v1 = vadd.f32 %v3202_v15, %v3154_v12  ;;  %v9747_v0 = vpop.f32.mrf.mxu2  ;;  %v9749_v51 = vpop.f32.mrf.mxu3  ;;  %3348 = vmatmul.bf16.vlgmr.msra.gmra.mxu0 %v11166_v30  ;;  %v6440_v15 = vor.u32 %v7536_v23, %v6439_v47  ;;  %v7366_v47 = vld [vmem:[#allocation4 + $0x8c] sm:$0xf]  ;;  %v5769_v23 = vld [vmem:[#allocation4 + $0x98] sm:$0xf0] }
 0x372   :  { %3397 = vmatmul.bf16.vlgmr.msra.gmra.mxu1 %v11167_v28 }
 0x373   :  { %v3252_v14 = vadd.f32 %v9657_v32, %v3203_v1  ;;  %3586 = vmatpush.bf16.msrb.mxu1 %v6440_v15  ;;  %v5785_v1 = vld [vmem:[#allocation4 + $0xb8] sm:$0xf0]  ;;  %v7402_v32 = vld [vmem:[#allocation4 + $0x1ac] sm:$0xf] }
 0x374   :  { %v5897_v15 = vld [vmem:[#allocation4 + $0x198] sm:$0xf0] }
 0x375   :  { %v9755_v63 = vadd.f32 %v9659_v11, %v3252_v14  ;;  %v5788_v11 = vor.u32 %v7370_v27, %v5785_v1  ;;  %v5913_v14 = vld [vmem:[#allocation4 + $0x1b8] sm:$0xf0] }
 0x376   :  { %v3155_v61 = vpop.f32.mrf.mxu0  ;;  %v5916_v37 = vor.u32 %v7402_v32, %v5913_v14 }
 0x377   :  { %11168 = vst [vmem:[#allocation53_spill] sm:$0xff] %v9755_v63  ;;  %v3204_v50 = vpop.f32.mrf.mxu1  ;;  %v3156_v24 = vadd.f32 %v3155_v61, %v9529_v19  ;;  %v7398_v19 = vld [vmem:[#allocation4 + $0x18c] sm:$0xf]  ;;  %3636 = vmatpush.bf16.msrb.mxu2 %v5788_v11 }
 0x378   :  { %3685 = vmatpush.bf16.msrb.mxu3 %v5916_v37  ;;  %v7394_v11 = vld [vmem:[#allocation4 + $0x16c] sm:$0xf] }
 0x379   :  { %v3205_v58 = vadd.f32 %v3204_v50, %v3156_v24  ;;  %v9758_v12 = vpop.f32.mrf.mxu2  ;;  %v9760_v35 = vpop.f32.mrf.mxu3  ;;  %v5772_v50 = vor.u32 %v7366_v47, %v5769_v23  ;;  %v6295_v24 = vld [vmem:[#allocation4 + $0x4a8] sm:$0xf]  ;;  %v7362_v23 = vld [vmem:[#allocation4 + $0x6c] sm:$0xf] }
 0x37b   :  { %v3254_v7 = vadd.f32 %v9670_v10, %v3205_v58  ;;  %v7500_v58 = vld [vmem:[#allocation4 + $0x4b4] sm:$0xf0]  ;;  %3637 = vmatpush.bf16.msrb.mxu2 %v5772_v50 }
 0x37c   :  { %v6296_v27 = vor.u32 %v7500_v58, %v6295_v24  ;;  %v7532_v24 = vld [vmem:[#allocation4 + $0x5b4] sm:$0xf0]  ;;  %v7358_v58 = vld [vmem:[#allocation4 + $0x4c] sm:$0xf] }
 0x37d   :  { %v9764_v63 = vadd.f32 %v9672_v2, %v3254_v7  ;;  %v5900_v7 = vor.u32 %v7398_v19, %v5897_v15  ;;  %v5881_v19 = vld [vmem:[#allocation4 + $0x178] sm:$0xf0]  ;;  %v6423_v15 = vld [vmem:[#allocation4 + $0x5a8] sm:$0xf] }
 0x37e   :  { %6586 = vmatmul.msk.bf16.gmra.mxu2 %vm9116_vm14, %v11152_v42  ;;  %6598 = vmatmul.msk.bf16.gmra.mxu3 %vm9116_vm14, %v11154_v44  ;;  %v3158_v10 = vpop.f32.mrf.mxu0  ;;  %v11171_v44 = vld [vmem:[#allocation41_spill] sm:$0xff]  ;;  %v6424_v49 = vor.u32 %v7532_v24, %v6423_v15  ;;  %v7386_v15 = vld [vmem:[#allocation4 + $0x12c] sm:$0xf] }
 0x37f   :  { %11169 = vst [vmem:[#allocation55_spill] sm:$0xff] %v9764_v63  ;;  %v3207_v61 = vpop.f32.mrf.mxu1  ;;  %v3159_v2 = vadd.f32 %v3158_v10, %v9539_v4  ;;  %v11170_v63 = vld [vmem:[#allocation40_spill] sm:$0xff]  ;;  %3538 = vmatpush.bf16.msrb.mxu0 %v6296_v27  ;;  %3686 = vmatpush.bf16.msrb.mxu3 %v5900_v7 }
 0x380   :  { %v5753_v4 = vld [vmem:[#allocation4 + $0x78] sm:$0xf0]  ;;  %3587 = vmatpush.bf16.msrb.mxu1 %v6424_v49 }
 0x381   :  { %v3208_v1 = vadd.f32 %v3207_v61, %v3159_v2  ;;  %v9773_v32 = vpop.f32.mrf.mxu2  ;;  %v9775_v14 = vpop.f32.mrf.mxu3  ;;  %3353 = vmatmul.bf16.gmra.mxu0 %v11170_v63  ;;  %v5756_v37 = vor.u32 %v7362_v23, %v5753_v4  ;;  %v5884_v61 = vor.u32 %v7394_v11, %v5881_v19  ;;  %v5737_v27 = vld [vmem:[#allocation4 + $0x58] sm:$0xf0]  ;;  %v7354_v11 = vld [vmem:[#allocation4 + $0x2c] sm:$0xf] }
 0x382   :  { %3402 = vmatmul.bf16.gmra.mxu1 %v11171_v44  ;;  %v5740_v7 = vor.u32 %v7358_v58, %v5737_v27  ;;  %v5721_v19 = vld [vmem:[#allocation4 + $0x38] sm:$0xf0]  ;;  %v6279_v27 = vld [vmem:[#allocation4 + $0x488] sm:$0xf] }
 0x383   :  { %v3257_v47 = vadd.f32 %v9679_v31, %v3208_v1  ;;  %v5865_v31 = vld [vmem:[#allocation4 + $0x158] sm:$0xf0]  ;;  %3638 = vmatpush.bf16.msrb.mxu2 %v5756_v37  ;;  %3687 = vmatpush.bf16.msrb.mxu3 %v5884_v61  ;;  %v5724_v24 = vor.u32 %v7354_v11, %v5721_v19 }
 0x384   :  { %v5868_v1 = vor.u32 %v7390_v16, %v5865_v31  ;;  %v7350_v16 = vld [vmem:[#allocation4 + $0xc] sm:$0xf]  ;;  %v5705_v49 = vld [vmem:[#allocation4 + $0x18] sm:$0xf0]  ;;  %v7496_v31 = vld [vmem:[#allocation4 + $0x494] sm:$0xf0] }
 0x385   :  { %v9781_v10 = vadd.f32 %v9681_v53, %v3257_v47  ;;  %v5708_v58 = vor.u32 %v7350_v16, %v5705_v49  ;;  %v11174_v11 = vld [vmem:[#allocation48_spill] sm:$0xff] }
 0x386   :  { %v3160_v2 = vpop.f32.mrf.mxu0 }
 0x387   :  { %11172 = vst [vmem:[#allocation54_spill] sm:$0xff] %v9781_v10  ;;  %v3209_v42 = vpop.f32.mrf.mxu1  ;;  %v3161_v50 = vadd.f32 %v3160_v2, %v9545_v45  ;;  %3639 = vmatpush.bf16.msrb.mxu2 %v5740_v7  ;;  %3688 = vmatpush.bf16.msrb.mxu3 %v5868_v1  ;;  %v5849_v10 = vld [vmem:[#allocation4 + $0x138] sm:$0xf0] }
 0x388   :  { %v5852_v37 = vor.u32 %v7386_v15, %v5849_v10  ;;  %v5833_v2 = vld [vmem:[#allocation4 + $0x118] sm:$0xf0]  ;;  %v6407_v15 = vld [vmem:[#allocation4 + $0x588] sm:$0xf] }
 0x389   :  { %v3210_v23 = vadd.f32 %v3209_v42, %v3161_v50  ;;  %v9784_v53 = vpop.f32.mrf.mxu2  ;;  %v9786_v47 = vpop.f32.mrf.mxu3  ;;  %v7382_v42 = vld [vmem:[#allocation4 + $0x10c] sm:$0xf]  ;;  %v6280_v50 = vor.u32 %v7496_v31, %v6279_v27  ;;  %v7492_v27 = vld [vmem:[#allocation4 + $0x474] sm:$0xf0] }
 0x38a   :  { %v5836_v10 = vor.u32 %v7382_v42, %v5833_v2 }
 0x38b   :  { %v3259_v4 = vadd.f32 %v9692_v25, %v3210_v23  ;;  %3640 = vmatpush.bf16.msrb.mxu2 %v5724_v24  ;;  %3689 = vmatpush.bf16.msrb.mxu3 %v5852_v37  ;;  %v7528_v24 = vld [vmem:[#allocation4 + $0x594] sm:$0xf0] }
 0x38c   :  { %3539 = vmatpush.bf16.msrb.mxu0 %v6280_v50  ;;  %v6408_v49 = vor.u32 %v7528_v24, %v6407_v15 }
 0x38d   :  { %v9790_v45 = vadd.f32 %v9694_v21, %v3259_v4  ;;  %v11173_v4 = vld [vmem:[#allocation47_spill] sm:$0xff] }
 0x38e   :  { %6589 = vmatmul.msk.bf16.gmra.mxu2 %vm9247_vm15, %v11157_v26  ;;  %6601 = vmatmul.msk.bf16.gmra.mxu3 %vm9247_vm15, %v11159_v22  ;;  %v3163_v25 = vpop.f32.mrf.mxu0 }
 0x38f   :  { %v3212_v61 = vpop.f32.mrf.mxu1  ;;  %v3164_v21 = vadd.f32 %v3163_v25, %v9555_v56  ;;  %3641 = vmatpush.bf16.msrb.mxu2 %v5708_v58  ;;  %3690 = vmatpush.bf16.msrb.mxu3 %v5836_v10 }
 0x390   :  { %3588 = vmatpush.bf16.msrb.mxu1 %v6408_v49 }
 0x391   :  { %v3213_v7 = vadd.f32 %v3212_v61, %v3164_v21  ;;  %v9799_v1 = vpop.f32.mrf.mxu2  ;;  %v9801_v23 = vpop.f32.mrf.mxu3  ;;  %3358 = vmatmul.bf16.gmra.mxu0 %v11173_v4 }
 0x392   :  { %3407 = vmatmul.bf16.gmra.mxu1 %v11174_v11 }
 0x393   :  { %v3262_v19 = vadd.f32 %v9701_v33, %v3213_v7  ;;  %v11175_v7 = vld [vmem:[#allocation56_spill] sm:$0xff] }
 0x395   :  { %v9807_v56 = vadd.f32 %v9703_v5, %v3262_v19  ;;  %v6263_v5 = vld [vmem:[#allocation4 + $0x468] sm:$0xf]  ;;  %v11176_v19 = vld [vmem:[#allocation57_spill] sm:$0xff] }
 0x396   :  { %v3165_v37 = vpop.f32.mrf.mxu0  ;;  %v6264_v21 = vor.u32 %v7492_v27, %v6263_v5 }
 0x397   :  { %v3214_v16 = vpop.f32.mrf.mxu1  ;;  %v3166_v42 = vadd.f32 %v3165_v37, %v9561_v40  ;;  %v6391_v37 = vld [vmem:[#allocation4 + $0x568] sm:$0xf] }
 0x398   :  { %3540 = vmatpush.bf16.msrb.mxu0 %v6264_v21 }
 0x399   :  { %v3215_v25 = vadd.f32 %v3214_v16, %v3166_v42  ;;  %v9810_v61 = vpop.f32.mrf.mxu2  ;;  %v9812_v2 = vpop.f32.mrf.mxu3  ;;  %v7524_v16 = vld [vmem:[#allocation4 + $0x574] sm:$0xf0] }
 0x39b   :  { %v3264_v33 = vadd.f32 %v9714_v48, %v3215_v25 }
 0x39d   :  { %v9816_v58 = vadd.f32 %v9716_v43, %v3264_v33 }
 0x39e   :  { %6592 = vmatmul.msk.bf16.gmra.mxu2 %vm9338_vm1, %v11162_v6  ;;  %6604 = vmatmul.msk.bf16.gmra.mxu3 %vm9338_vm1, %v11164_v36  ;;  %v3168_v40 = vpop.f32.mrf.mxu0 }
 0x39f   :  { %v3217_v31 = vpop.f32.mrf.mxu1  ;;  %v3169_v10 = vadd.f32 %v3168_v40, %v9571_v62  ;;  %v6392_v62 = vor.u32 %v7524_v16, %v6391_v37 }
 0x3a1   :  { %v3218_v48 = vadd.f32 %v3217_v31, %v3169_v10  ;;  %v9825_v50 = vpop.f32.mrf.mxu2  ;;  %v9827_v43 = vpop.f32.mrf.mxu3  ;;  %3363 = vmatmul.bf16.gmra.mxu0 %v11175_v7  ;;  %3589 = vmatpush.bf16.msrb.mxu1 %v6392_v62  ;;  %v7488_v31 = vld [vmem:[#allocation4 + $0x454] sm:$0xf0] }
 0x3a2   :  { %3412 = vmatmul.bf16.gmra.mxu1 %v11176_v19 }
 0x3a3   :  { %v3267_v15 = vadd.f32 %v9723_v18, %v3218_v48 }
 0x3a5   :  { %v9833_v24 = vadd.f32 %v9725_v9, %v3267_v15  ;;  %v6247_v9 = vld [vmem:[#allocation4 + $0x448] sm:$0xf] }
 0x3a6   :  { %v3170_v49 = vpop.f32.mrf.mxu0 }
 0x3a7   :  { %v3219_v42 = vpop.f32.mrf.mxu1  ;;  %v3171_v25 = vadd.f32 %v3170_v49, %v9579_v52  ;;  %v6248_v52 = vor.u32 %v7488_v31, %v6247_v9  ;;  %v7520_v49 = vld [vmem:[#allocation4 + $0x554] sm:$0xf0] }
 0x3a9   :  { %v3220_v33 = vadd.f32 %v3219_v42, %v3171_v25  ;;  %v9836_v5 = vpop.f32.mrf.mxu2  ;;  %v9838_v27 = vpop.f32.mrf.mxu3  ;;  %3541 = vmatpush.bf16.msrb.mxu0 %v6248_v52 }
 0x3ab   :  { %v3269_v40 = vadd.f32 %v9736_v59, %v3220_v33  ;;  %v11177_v59 = vld [vmem:[#allocation9_spill] sm:$0xff] }
 0x3ad   :  { %v9842_v18 = vadd.f32 %v9738_v29, %v3269_v40  ;;  %v11178_v29 = vld [vmem:[#allocation10_spill] sm:$0xff] }
 0x3ae   :  { %3642 = vmatmul.bf16.vlgmr.msrb.gmra.mxu2 %v11166_v30  ;;  %3691 = vmatmul.bf16.vlgmr.msrb.gmra.mxu3 %v11167_v28  ;;  %v3173_v21 = vpop.f32.mrf.mxu0 }
 0x3af   :  { %v3222_v10 = vpop.f32.mrf.mxu1  ;;  %v3174_v48 = vadd.f32 %v3173_v21, %v9593_v55  ;;  %v6375_v55 = vld [vmem:[#allocation4 + $0x548] sm:$0xf] }
 0x3b0   :  { %v6376_v25 = vor.u32 %v7520_v49, %v6375_v55 }
 0x3b1   :  { %v3223_v15 = vadd.f32 %v3222_v10, %v3174_v48  ;;  %v9847_v37 = vpop.f32.mrf.mxu2  ;;  %v9849_v16 = vpop.f32.mrf.mxu3  ;;  %6559 = vmatmul.msk.bf16.gmra.mxu0 %vm8971_vm13, %v11177_v59  ;;  %v7484_v10 = vld [vmem:[#allocation4 + $0x434] sm:$0xf0] }
 0x3b2   :  { %6571 = vmatmul.msk.bf16.gmra.mxu1 %vm8971_vm13, %v11178_v29 }
 0x3b3   :  { %v3272_v30 = vadd.f32 %v9747_v0, %v3223_v15  ;;  %3590 = vmatpush.bf16.msrb.mxu1 %v6376_v25 }
 0x3b5   :  { %v9859_v28 = vadd.f32 %v9749_v51, %v3272_v30  ;;  %v6231_v51 = vld [vmem:[#allocation4 + $0x428] sm:$0xf] }
 0x3b6   :  { %v3175_v42 = vpop.f32.mrf.mxu0 }
 0x3b7   :  { %11179 = vst [vmem:[#allocation35_spill] sm:$0xff] %v9859_v28  ;;  %v3224_v62 = vpop.f32.mrf.mxu1  ;;  %v3176_v33 = vadd.f32 %v3175_v42, %v9600_v46  ;;  %v6232_v46 = vor.u32 %v7484_v10, %v6231_v51  ;;  %v7516_v42 = vld [vmem:[#allocation4 + $0x534] sm:$0xf0] }
 0x3b9   :  { %v3225_v40 = vadd.f32 %v3224_v62, %v3176_v33  ;;  %v9862_v9 = vpop.f32.mrf.mxu2  ;;  %v9864_v31 = vpop.f32.mrf.mxu3  ;;  %3542 = vmatpush.bf16.msrb.mxu0 %v6232_v46 }
 0x3bb   :  { %v3274_v21 = vadd.f32 %v9758_v12, %v3225_v40  ;;  %v11181_v12 = vld [vmem:[#allocation15_spill] sm:$0xff] }
 0x3bd   :  { %v9868_v0 = vadd.f32 %v9760_v35, %v3274_v21  ;;  %v11182_v35 = vld [vmem:[#allocation16_spill] sm:$0xff] }
 0x3be   :  { %3647 = vmatmul.bf16.gmra.mxu2 %v11170_v63  ;;  %3696 = vmatmul.bf16.gmra.mxu3 %v11171_v44  ;;  %v3178_v52 = vpop.f32.mrf.mxu0 }
 0x3bf   :  { %11180 = vst [vmem:[#allocation36_spill] sm:$0xff] %v9868_v0  ;;  %v3227_v48 = vpop.f32.mrf.mxu1  ;;  %v3179_v15 = vadd.f32 %v3178_v52, %v9611_v41  ;;  %v6359_v41 = vld [vmem:[#allocation4 + $0x528] sm:$0xf] }
 0x3c0   :  { %v6360_v33 = vor.u32 %v7516_v42, %v6359_v41 }
 0x3c1   :  { %v3228_v30 = vadd.f32 %v3227_v48, %v3179_v15  ;;  %v9873_v55 = vpop.f32.mrf.mxu2  ;;  %v9875_v49 = vpop.f32.mrf.mxu3  ;;  %6562 = vmatmul.msk.bf16.gmra.mxu0 %vm9116_vm14, %v11181_v12  ;;  %v7480_v48 = vld [vmem:[#allocation4 + $0x414] sm:$0xf0] }
 0x3c2   :  { %6574 = vmatmul.msk.bf16.gmra.mxu1 %vm9116_vm14, %v11182_v35 }
 0x3c3   :  { %v3277_v44 = vadd.f32 %v9773_v32, %v3228_v30  ;;  %3591 = vmatpush.bf16.msrb.mxu1 %v6360_v33 }
 0x3c5   :  { %v9885_v63 = vadd.f32 %v9775_v14, %v3277_v44  ;;  %v6215_v14 = vld [vmem:[#allocation4 + $0x408] sm:$0xf] }
 0x3c6   :  { %v3180_v62 = vpop.f32.mrf.mxu0 }
 0x3c7   :  { %11183 = vst [vmem:[#allocation40_spill] sm:$0xff] %v9885_v63  ;;  %v3229_v25 = vpop.f32.mrf.mxu1  ;;  %v3181_v40 = vadd.f32 %v3180_v62, %v9618_v17  ;;  %v6216_v17 = vor.u32 %v7480_v48, %v6215_v14 }
 0x3c9   :  { %v3230_v21 = vadd.f32 %v3229_v25, %v3181_v40  ;;  %v9888_v51 = vpop.f32.mrf.mxu2  ;;  %v9890_v10 = vpop.f32.mrf.mxu3  ;;  %3543 = vmatpush.bf16.msrb.mxu0 %v6216_v17 }
 0x3cb   :  { %v3279_v52 = vadd.f32 %v9784_v53, %v3230_v21  ;;  %v11185_v53 = vld [vmem:[#allocation21_spill] sm:$0xff] }
 0x3cd   :  { %v9894_v32 = vadd.f32 %v9786_v47, %v3279_v52  ;;  %v11186_v47 = vld [vmem:[#allocation22_spill] sm:$0xff] }
 0x3ce   :  { %3652 = vmatmul.bf16.gmra.mxu2 %v11173_v4  ;;  %3701 = vmatmul.bf16.gmra.mxu3 %v11174_v11  ;;  %v3183_v46 = vpop.f32.mrf.mxu0  ;;  %v6343_v4 = vld [vmem:[#allocation4 + $0x508] sm:$0xf]  ;;  %v7512_v11 = vld [vmem:[#allocation4 + $0x514] sm:$0xf0] }
 0x3cf   :  { %11184 = vst [vmem:[#allocation41_spill] sm:$0xff] %v9894_v32  ;;  %v3232_v15 = vpop.f32.mrf.mxu1  ;;  %v3184_v30 = vadd.f32 %v3183_v46, %v9629_v3  ;;  %v6344_v62 = vor.u32 %v7512_v11, %v6343_v4  ;;  %v7506_v46 = vld [vmem:[#allocation4 + $0x4ec] sm:$0xf]  ;;  %v6073_v4 = vld [vmem:[#allocation4 + $0x2f8] sm:$0xf0] }
 0x3d0   :  { %v7538_v11 = vld [vmem:[#allocation4 + $0x5ec] sm:$0xf] }
 0x3d1   :  { %v3233_v44 = vadd.f32 %v3232_v15, %v3184_v30  ;;  %v9899_v41 = vpop.f32.mrf.mxu2  ;;  %v9901_v42 = vpop.f32.mrf.mxu3  ;;  %6565 = vmatmul.msk.bf16.gmra.mxu0 %vm9247_vm15, %v11185_v53  ;;  %3592 = vmatpush.bf16.msrb.mxu1 %v6344_v62  ;;  %v6329_v15 = vld [vmem:[#allocation4 + $0x4f8] sm:$0xf0] }
 0x3d2   :  { %6577 = vmatmul.msk.bf16.gmra.mxu1 %vm9247_vm15, %v11186_v47  ;;  %v6332_v17 = vor.u32 %v7506_v46, %v6329_v15  ;;  %v6201_v46 = vld [vmem:[#allocation4 + $0x3f8] sm:$0xf0] }
 0x3d3   :  { %v3282_v25 = vadd.f32 %v9799_v1, %v3233_v44  ;;  %v7442_v44 = vld [vmem:[#allocation4 + $0x2ec] sm:$0xf] }
 0x3d4   :  { %3830 = vmatpush.bf16.msra.mxu2 %v6332_v17 }
 0x3d5   :  { %v9911_v3 = vadd.f32 %v9801_v23, %v3282_v25  ;;  %v6076_v25 = vor.u32 %v7442_v44, %v6073_v4 }
 0x3d6   :  { %v3185_v33 = vpop.f32.mrf.mxu0 }
 0x3d7   :  { %11187 = vst [vmem:[#allocation47_spill] sm:$0xff] %v9911_v3  ;;  %v3234_v40 = vpop.f32.mrf.mxu1  ;;  %v3186_v21 = vadd.f32 %v3185_v33, %v9636_v60  ;;  %v6457_v33 = vld [vmem:[#allocation4 + $0x5f8] sm:$0xf0]  ;;  %3732 = vmatpush.bf16.msra.mxu0 %v6076_v25 }
 0x3d8   :  { %v6377_v3 = vld [vmem:[#allocation4 + $0x558] sm:$0xf0] }
 0x3d9   :  { %v3235_v52 = vadd.f32 %v3234_v40, %v3186_v21  ;;  %v9914_v14 = vpop.f32.mrf.mxu2  ;;  %v9916_v48 = vpop.f32.mrf.mxu3  ;;  %v6460_v40 = vor.u32 %v7538_v11, %v6457_v33  ;;  %v6313_v33 = vld [vmem:[#allocation4 + $0x4d8] sm:$0xf0] }
 0x3db   :  { %v3284_v30 = vadd.f32 %v9810_v61, %v3235_v52  ;;  %3879 = vmatpush.bf16.msra.mxu3 %v6460_v40 }
 0x3dd   :  { %v9920_v1 = vadd.f32 %v9812_v2, %v3284_v30  ;;  %v11189_v2 = vld [vmem:[#allocation27_spill] sm:$0xff] }
 0x3de   :  { %3657 = vmatmul.bf16.gmra.mxu2 %v11175_v7  ;;  %3706 = vmatmul.bf16.gmra.mxu3 %v11176_v19  ;;  %v3188_v23 = vpop.f32.mrf.mxu0  ;;  %v11190_v7 = vld [vmem:[#allocation28_spill] sm:$0xff]  ;;  %v7474_v19 = vld [vmem:[#allocation4 + $0x3ec] sm:$0xf] }
 0x3df   :  { %11188 = vst [vmem:[#allocation48_spill] sm:$0xff] %v9920_v1  ;;  %v3237_v60 = vpop.f32.mrf.mxu1  ;;  %v3189_v62 = vadd.f32 %v3188_v23, %v9645_v20  ;;  %v6204_v20 = vor.u32 %v7474_v19, %v6201_v46  ;;  %v6057_v19 = vld [vmem:[#allocation4 + $0x2d8] sm:$0xf0]  ;;  %v7534_v46 = vld [vmem:[#allocation4 + $0x5cc] sm:$0xf] }
 0x3e1   :  { %v3238_v21 = vadd.f32 %v3237_v60, %v3189_v62  ;;  %v9925_v61 = vpop.f32.mrf.mxu2  ;;  %v9927_v52 = vpop.f32.mrf.mxu3  ;;  %6568 = vmatmul.msk.bf16.gmra.mxu0 %vm9338_vm1, %v11189_v2  ;;  %3781 = vmatpush.bf16.msra.mxu1 %v6204_v20  ;;  %v7502_v62 = vld [vmem:[#allocation4 + $0x4cc] sm:$0xf] }
 0x3e2   :  { %6580 = vmatmul.msk.bf16.gmra.mxu1 %vm9338_vm1, %v11190_v7  ;;  %v6316_v25 = vor.u32 %v7502_v62, %v6313_v33  ;;  %v6185_v62 = vld [vmem:[#allocation4 + $0x3d8] sm:$0xf0] }
 0x3e3   :  { %v3287_v15 = vadd.f32 %v9825_v50, %v3238_v21  ;;  %v7438_v21 = vld [vmem:[#allocation4 + $0x2cc] sm:$0xf] }
 0x3e4   :  { %3831 = vmatpush.bf16.msra.mxu2 %v6316_v25 }
 0x3e5   :  { %v9937_v17 = vadd.f32 %v9827_v43, %v3287_v15  ;;  %v6060_v15 = vor.u32 %v7438_v21, %v6057_v19 }
 0x3e6   :  { %v3190_v30 = vpop.f32.mrf.mxu0 }
 0x3e7   :  { %11191 = vst [vmem:[#allocation56_spill] sm:$0xff] %v9937_v17  ;;  %v3239_v23 = vpop.f32.mrf.mxu1  ;;  %v3191_v60 = vadd.f32 %v3190_v30, %v9650_v38  ;;  %3733 = vmatpush.bf16.msra.mxu0 %v6060_v15  ;;  %v6425_v15 = vld [vmem:[#allocation4 + $0x5b8] sm:$0xf0] }
 0x3e9   :  { %v3240_v44 = vadd.f32 %v3239_v23, %v3191_v60  ;;  %v9940_v4 = vpop.f32.mrf.mxu2  ;;  %v9942_v11 = vpop.f32.mrf.mxu3 }
 0x3eb   :  { %v3289_v40 = vadd.f32 %v9836_v5, %v3240_v44  ;;  %v6441_v5 = vld [vmem:[#allocation4 + $0x5d8] sm:$0xf0]  ;;  %v11194_v44 = vld [vmem:[#allocation43_spill] sm:$0xff] }
 0x3ec   :  { %v6444_v30 = vor.u32 %v7534_v46, %v6441_v5  ;;  %v7498_v46 = vld [vmem:[#allocation4 + $0x4ac] sm:$0xf] }
 0x3ed   :  { %v9946_v50 = vadd.f32 %v9838_v27, %v3289_v40  ;;  %v7530_v5 = vld [vmem:[#allocation4 + $0x5ac] sm:$0xf] }
 0x3ee   :  { %6607 = vmatmul.msk.bf16.gmra.mxu2 %vm8971_vm13, %v11177_v59  ;;  %6619 = vmatmul.msk.bf16.gmra.mxu3 %vm8971_vm13, %v11178_v29  ;;  %v3349_v38 = vpop.f32.mrf.mxu0  ;;  %v11193_v59 = vld [vmem:[#allocation42_spill] sm:$0xff] }
 0x3ef   :  { %11192 = vst [vmem:[#allocation57_spill] sm:$0xff] %v9946_v50  ;;  %v3398_v43 = vpop.f32.mrf.mxu1  ;;  %v7470_v29 = vld [vmem:[#allocation4 + $0x3cc] sm:$0xf]  ;;  %3880 = vmatpush.bf16.msra.mxu3 %v6444_v30 }
 0x3f0   :  { %v3399_v20 = vadd.f32 %v3398_v43, %v3349_v38  ;;  %v6188_v33 = vor.u32 %v7470_v29, %v6185_v62  ;;  %v7494_v30 = vld [vmem:[#allocation4 + $0x48c] sm:$0xf]  ;;  %v6281_v29 = vld [vmem:[#allocation4 + $0x498] sm:$0xf0]  ;;  %v6428_v62 = vor.u32 %v7530_v5, %v6425_v15 }
 0x3f1   :  { %v9955_v23 = vpop.f32.mrf.mxu2  ;;  %v9957_v60 = vpop.f32.mrf.mxu3  ;;  %3544 = vmatmul.bf16.vlgmr.msrb.gmra.mxu0 %v11193_v59 }
 0x3f2   :  { %v3448_v27 = vadd.f32 %v9847_v37, %v3399_v20  ;;  %3593 = vmatmul.bf16.vlgmr.msrb.gmra.mxu1 %v11194_v44  ;;  %v6297_v20 = vld [vmem:[#allocation4 + $0x4b8] sm:$0xf0] }
 0x3f3   :  { %3782 = vmatpush.bf16.msra.mxu1 %v6188_v33  ;;  %v6300_v50 = vor.u32 %v7498_v46, %v6297_v20  ;;  %3881 = vmatpush.bf16.msra.mxu3 %v6428_v62  ;;  %v7434_v46 = vld [vmem:[#allocation4 + $0x2ac] sm:$0xf]  ;;  %v6041_v20 = vld [vmem:[#allocation4 + $0x2b8] sm:$0xf0] }
 0x3f4   :  { %v9962_v25 = vadd.f32 %v9849_v16, %v3448_v27  ;;  %v7526_v16 = vld [vmem:[#allocation4 + $0x58c] sm:$0xf]  ;;  %v6409_v27 = vld [vmem:[#allocation4 + $0x598] sm:$0xf0]  ;;  %v6044_v15 = vor.u32 %v7434_v46, %v6041_v20 }
 0x3f5   :  { %3832 = vmatpush.bf16.msra.mxu2 %v6300_v50  ;;  %v7522_v62 = vld [vmem:[#allocation4 + $0x56c] sm:$0xf]  ;;  %v6249_v20 = vld [vmem:[#allocation4 + $0x458] sm:$0xf0] }
 0x3f6   :  { %v3351_v40 = vpop.f32.mrf.mxu0  ;;  %3734 = vmatpush.bf16.msra.mxu0 %v6044_v15 }
 0x3f7   :  { %v3400_v38 = vpop.f32.mrf.mxu1 }
 0x3f8   :  { %v3401_v37 = vadd.f32 %v3400_v38, %v3351_v40  ;;  %v6284_v40 = vor.u32 %v7494_v30, %v6281_v29  ;;  %v11195_v30 = vld [vmem:[#allocation49_spill] sm:$0xff]  ;;  %v7490_v29 = vld [vmem:[#allocation4 + $0x46c] sm:$0xf] }
 0x3f9   :  { %v9965_v21 = vpop.f32.mrf.mxu2  ;;  %v9967_v19 = vpop.f32.mrf.mxu3 }
 0x3fa   :  { %v3450_v43 = vadd.f32 %v9862_v9, %v3401_v37  ;;  %v6412_v37 = vor.u32 %v7526_v16, %v6409_v27  ;;  %3833 = vmatpush.bf16.msra.mxu2 %v6284_v40  ;;  %v6393_v27 = vld [vmem:[#allocation4 + $0x578] sm:$0xf0] }
 0x3fb   :  { %v6396_v40 = vor.u32 %v7522_v62, %v6393_v27  ;;  %v7482_v27 = vld [vmem:[#allocation4 + $0x42c] sm:$0xf] }
 0x3fc   :  { %v9970_v33 = vadd.f32 %v9864_v31, %v3450_v43  ;;  %3882 = vmatpush.bf16.msra.mxu3 %v6412_v37 }
 0x3fe   :  { %6610 = vmatmul.msk.bf16.gmra.mxu2 %vm9116_vm14, %v11181_v12  ;;  %6622 = vmatmul.msk.bf16.gmra.mxu3 %vm9116_vm14, %v11182_v35  ;;  %v3354_v9 = vpop.f32.mrf.mxu0  ;;  %v11196_v12 = vld [vmem:[#allocation50_spill] sm:$0xff]  ;;  %v6265_v35 = vld [vmem:[#allocation4 + $0x478] sm:$0xf0] }
 0x3ff   :  { %v3403_v38 = vpop.f32.mrf.mxu1  ;;  %v6268_v16 = vor.u32 %v7490_v29, %v6265_v35 }
 0x400   :  { %v3404_v5 = vadd.f32 %v3403_v38, %v3354_v9  ;;  %v7466_v9 = vld [vmem:[#allocation4 + $0x3ac] sm:$0xf]  ;;  %v6169_v38 = vld [vmem:[#allocation4 + $0x3b8] sm:$0xf0]  ;;  %3883 = vmatpush.bf16.msra.mxu3 %v6396_v40 }
 0x401   :  { %v9979_v50 = vpop.f32.mrf.mxu2  ;;  %v9981_v43 = vpop.f32.mrf.mxu3  ;;  %3549 = vmatmul.bf16.gmra.mxu0 %v11195_v30  ;;  %v6172_v46 = vor.u32 %v7466_v9, %v6169_v38  ;;  %3834 = vmatpush.bf16.msra.mxu2 %v6268_v16  ;;  %v6233_v9 = vld [vmem:[#allocation4 + $0x438] sm:$0xf0]  ;;  %v7478_v38 = vld [vmem:[#allocation4 + $0x40c] sm:$0xf] }
 0x402   :  { %v3453_v31 = vadd.f32 %v9873_v55, %v3404_v5  ;;  %3598 = vmatmul.bf16.gmra.mxu1 %v11196_v12  ;;  %v7486_v55 = vld [vmem:[#allocation4 + $0x44c] sm:$0xf]  ;;  %v6361_v16 = vld [vmem:[#allocation4 + $0x538] sm:$0xf0] }
 0x403   :  { %v7518_v5 = vld [vmem:[#allocation4 + $0x54c] sm:$0xf]  ;;  %v6252_v1 = vor.u32 %v7486_v55, %v6249_v20  ;;  %3783 = vmatpush.bf16.msra.mxu1 %v6172_v46  ;;  %v6217_v46 = vld [vmem:[#allocation4 + $0x418] sm:$0xf0] }
 0x404   :  { %v9986_v17 = vadd.f32 %v9875_v49, %v3453_v31  ;;  %v6380_v37 = vor.u32 %v7518_v5, %v6377_v3  ;;  %v7514_v49 = vld [vmem:[#allocation4 + $0x52c] sm:$0xf]  ;;  %v6236_v31 = vor.u32 %v7482_v27, %v6233_v9 }
 0x405   :  { %3835 = vmatpush.bf16.msra.mxu2 %v6252_v1  ;;  %v6364_v55 = vor.u32 %v7514_v49, %v6361_v16  ;;  %v7430_v20 = vld [vmem:[#allocation4 + $0x28c] sm:$0xf]  ;;  %v6025_v1 = vld [vmem:[#allocation4 + $0x298] sm:$0xf0]  ;;  %v11197_v49 = vld [vmem:[#allocation51_spill] sm:$0xff] }
 0x406   :  { %v3356_v32 = vpop.f32.mrf.mxu0  ;;  %3884 = vmatpush.bf16.msra.mxu3 %v6380_v37  ;;  %v6028_v40 = vor.u32 %v7430_v20, %v6025_v1  ;;  %v6153_v16 = vld [vmem:[#allocation4 + $0x398] sm:$0xf0] }
 0x407   :  { %v3405_v63 = vpop.f32.mrf.mxu1  ;;  %v6009_v1 = vld [vmem:[#allocation4 + $0x278] sm:$0xf0] }
 0x408   :  { %v3406_v15 = vadd.f32 %v3405_v63, %v3356_v32  ;;  %v6220_v63 = vor.u32 %v7478_v38, %v6217_v46  ;;  %v6345_v32 = vld [vmem:[#allocation4 + $0x518] sm:$0xf0]  ;;  %3735 = vmatpush.bf16.msra.mxu0 %v6028_v40 }
 0x409   :  { %v9989_v35 = vpop.f32.mrf.mxu2  ;;  %v9991_v62 = vpop.f32.mrf.mxu3  ;;  %3836 = vmatpush.bf16.msra.mxu2 %v6236_v31  ;;  %v7462_v31 = vld [vmem:[#allocation4 + $0x38c] sm:$0xf] }
 0x40a   :  { %v3455_v29 = vadd.f32 %v9888_v51, %v3406_v15  ;;  %v7510_v51 = vld [vmem:[#allocation4 + $0x50c] sm:$0xf]  ;;  %3885 = vmatpush.bf16.msra.mxu3 %v6364_v55 }
 0x40c   :  { %v9994_v3 = vadd.f32 %v9890_v10, %v3455_v29  ;;  %v6348_v10 = vor.u32 %v7510_v51, %v6345_v32  ;;  %v7426_v32 = vld [vmem:[#allocation4 + $0x26c] sm:$0xf] }
 0x40d   :  { %3837 = vmatpush.bf16.msra.mxu2 %v6220_v63  ;;  %v6012_v40 = vor.u32 %v7426_v32, %v6009_v1  ;;  %v7422_v1 = vld [vmem:[#allocation4 + $0x24c] sm:$0xf] }
 0x40e   :  { %6613 = vmatmul.msk.bf16.gmra.mxu2 %vm9247_vm15, %v11185_v53  ;;  %6625 = vmatmul.msk.bf16.gmra.mxu3 %vm9247_vm15, %v11186_v47  ;;  %v3359_v5 = vpop.f32.mrf.mxu0  ;;  %v11198_v53 = vld [vmem:[#allocation52_spill] sm:$0xff]  ;;  %v6156_v47 = vor.u32 %v7462_v31, %v6153_v16  ;;  %v11200_v31 = vld [vmem:[#allocation59_spill] sm:$0xff]  ;;  %v7458_v16 = vld [vmem:[#allocation4 + $0x36c] sm:$0xf] }
 0x40f   :  { %v3408_v37 = vpop.f32.mrf.mxu1  ;;  %3886 = vmatpush.bf16.msra.mxu3 %v6348_v10  ;;  %3736 = vmatpush.bf16.msra.mxu0 %v6012_v40  ;;  %v5993_v40 = vld [vmem:[#allocation4 + $0x258] sm:$0xf0] }
 0x410   :  { %v3409_v15 = vadd.f32 %v3408_v37, %v3359_v5  ;;  %3784 = vmatpush.bf16.msra.mxu1 %v6156_v47  ;;  %v6137_v47 = vld [vmem:[#allocation4 + $0x378] sm:$0xf0] }
 0x411   :  { %v10003_v27 = vpop.f32.mrf.mxu2  ;;  %v10005_v9 = vpop.f32.mrf.mxu3  ;;  %3554 = vmatmul.bf16.gmra.mxu0 %v11197_v49 }
 0x412   :  { %v3458_v29 = vadd.f32 %v9899_v41, %v3409_v15  ;;  %3603 = vmatmul.bf16.gmra.mxu1 %v11198_v53 }
 0x414   :  { %v10010_v38 = vadd.f32 %v9901_v42, %v3458_v29 }
 0x416   :  { %v3361_v46 = vpop.f32.mrf.mxu0 }
 0x417   :  { %v3410_v55 = vpop.f32.mrf.mxu1 }
 0x418   :  { %v3411_v20 = vadd.f32 %v3410_v55, %v3361_v46 }
 0x419   :  { %v10013_v63 = vpop.f32.mrf.mxu2  ;;  %v10015_v51 = vpop.f32.mrf.mxu3 }
 0x41a   :  { %v3460_v41 = vadd.f32 %v9914_v14, %v3411_v20 }
 0x41c   :  { %v10018_v5 = vadd.f32 %v9916_v48, %v3460_v41  ;;  %v11199_v48 = vld [vmem:[#allocation58_spill] sm:$0xff] }
 0x41e   :  { %6616 = vmatmul.msk.bf16.gmra.mxu2 %vm9338_vm1, %v11189_v2  ;;  %6628 = vmatmul.msk.bf16.gmra.mxu3 %vm9338_vm1, %v11190_v7  ;;  %v3364_v42 = vpop.f32.mrf.mxu0  ;;  %v6140_v2 = vor.u32 %v7458_v16, %v6137_v47 }
 0x41f   :  { %v3413_v14 = vpop.f32.mrf.mxu1 }
 0x420   :  { %v3414_v37 = vadd.f32 %v3413_v14, %v3364_v42  ;;  %3785 = vmatpush.bf16.msra.mxu1 %v6140_v2  ;;  %v5996_v42 = vor.u32 %v7422_v1, %v5993_v40  ;;  %v7454_v2 = vld [vmem:[#allocation4 + $0x34c] sm:$0xf] }
 0x421   :  { %v10027_v10 = vpop.f32.mrf.mxu2  ;;  %v10029_v29 = vpop.f32.mrf.mxu3  ;;  %3559 = vmatmul.bf16.gmra.mxu0 %v11199_v48 }
 0x422   :  { %v3463_v15 = vadd.f32 %v9925_v61, %v3414_v37  ;;  %3608 = vmatmul.bf16.gmra.mxu1 %v11200_v31  ;;  %3737 = vmatpush.bf16.msra.mxu0 %v5996_v42 }
 0x424   :  { %v10034_v46 = vadd.f32 %v9927_v52, %v3463_v15 }
 0x426   :  { %v3366_v7 = vpop.f32.mrf.mxu0 }
 0x427   :  { %v3415_v55 = vpop.f32.mrf.mxu1 }
 0x428   :  { %v3416_v20 = vadd.f32 %v3415_v55, %v3366_v7  ;;  %v6121_v7 = vld [vmem:[#allocation4 + $0x358] sm:$0xf0] }
 0x429   :  { %v10037_v41 = vpop.f32.mrf.mxu2  ;;  %v10039_v32 = vpop.f32.mrf.mxu3  ;;  %v6124_v55 = vor.u32 %v7454_v2, %v6121_v7 }
 0x42a   :  { %v3465_v61 = vadd.f32 %v9940_v4, %v3416_v20 }
 0x42b   :  { %3786 = vmatpush.bf16.msra.mxu1 %v6124_v55  ;;  %v11201_v55 = vld [vmem:[#allocation17_spill] sm:$0xff] }
 0x42c   :  { %v10042_v14 = vadd.f32 %v9942_v11, %v3465_v61 }
 0x42e   :  { %3838 = vmatmul.bf16.vlgmr.msra.gmra.mxu2 %v11193_v59  ;;  %3887 = vmatmul.bf16.vlgmr.msra.gmra.mxu3 %v11194_v44  ;;  %v3369_v52 = vpop.f32.mrf.mxu0 }
 0x42f   :  { %v3418_v37 = vpop.f32.mrf.mxu1 }
 0x430   :  { %v3419_v15 = vadd.f32 %v3418_v37, %v3369_v52  ;;  %v7418_v52 = vld [vmem:[#allocation4 + $0x22c] sm:$0xf]  ;;  %v5977_v37 = vld [vmem:[#allocation4 + $0x238] sm:$0xf0] }
 0x431   :  { %v3643_v16 = vpop.f32.mrf.mxu2  ;;  %v3692_v47 = vpop.f32.mrf.mxu3  ;;  %3564 = vmatmul.bf16.gmra.mxu0 %v11123_v13 }
 0x432   :  { %v3468_v4 = vadd.f32 %v9955_v23, %v3419_v15  ;;  %3613 = vmatmul.bf16.gmra.mxu1 %v11124_v57  ;;  %v10049_v11 = vadd.f32 %v3692_v47, %v3643_v16  ;;  %v5980_v15 = vor.u32 %v7418_v52, %v5977_v37 }
 0x434   :  { %v10052_v59 = vadd.f32 %v9957_v60, %v3468_v4  ;;  %3738 = vmatpush.bf16.msra.mxu0 %v5980_v15 }
 0x436   :  { %v3371_v44 = vpop.f32.mrf.mxu0 }
 0x437   :  { %v3420_v20 = vpop.f32.mrf.mxu1 }
 0x438   :  { %v3421_v61 = vadd.f32 %v3420_v20, %v3371_v44  ;;  %v11202_v44 = vld [vmem:[#allocation18_spill] sm:$0xff] }
 0x439   :  { %v3645_v1 = vpop.f32.mrf.mxu2  ;;  %v3694_v40 = vpop.f32.mrf.mxu3  ;;  %v7450_v20 = vld [vmem:[#allocation4 + $0x32c] sm:$0xf] }
 0x43a   :  { %v3470_v23 = vadd.f32 %v9965_v21, %v3421_v61  ;;  %v10055_v42 = vadd.f32 %v3694_v40, %v3645_v1  ;;  %v6105_v61 = vld [vmem:[#allocation4 + $0x338] sm:$0xf0] }
 0x43c   :  { %v10058_v16 = vadd.f32 %v9967_v19, %v3470_v23  ;;  %v6108_v23 = vor.u32 %v7450_v20, %v6105_v61 }
 0x43e   :  { %3843 = vmatmul.bf16.gmra.mxu2 %v11195_v30  ;;  %3892 = vmatmul.bf16.gmra.mxu3 %v11196_v12  ;;  %v3374_v60 = vpop.f32.mrf.mxu0 }
 0x43f   :  { %v3423_v4 = vpop.f32.mrf.mxu1  ;;  %3787 = vmatpush.bf16.msra.mxu1 %v6108_v23  ;;  %v11203_v23 = vld [vmem:[#allocation23_spill] sm:$0xff] }
 0x440   :  { %v3424_v47 = vadd.f32 %v3423_v4, %v3374_v60  ;;  %v7414_v60 = vld [vmem:[#allocation4 + $0x20c] sm:$0xf]  ;;  %v5961_v4 = vld [vmem:[#allocation4 + $0x218] sm:$0xf0] }
 0x441   :  { %v3648_v2 = vpop.f32.mrf.mxu2  ;;  %v3697_v7 = vpop.f32.mrf.mxu3  ;;  %3569 = vmatmul.bf16.gmra.mxu0 %v11201_v55 }
 0x442   :  { %v3473_v21 = vadd.f32 %v9979_v50, %v3424_v47  ;;  %3618 = vmatmul.bf16.gmra.mxu1 %v11202_v44  ;;  %v10065_v19 = vadd.f32 %v3697_v7, %v3648_v2  ;;  %v5964_v47 = vor.u32 %v7414_v60, %v5961_v4 }
 0x444   :  { %v10068_v30 = vadd.f32 %v9981_v43, %v3473_v21  ;;  %3739 = vmatpush.bf16.msra.mxu0 %v5964_v47 }
 0x446   :  { %v3376_v12 = vpop.f32.mrf.mxu0 }
 0x447   :  { %v3425_v1 = vpop.f32.mrf.mxu1 }
 0x448   :  { %v3426_v40 = vadd.f32 %v3425_v1, %v3376_v12  ;;  %v11204_v12 = vld [vmem:[#allocation24_spill] sm:$0xff] }
 0x449   :  { %v3650_v52 = vpop.f32.mrf.mxu2  ;;  %v3699_v37 = vpop.f32.mrf.mxu3 }
 0x44a   :  { %v3475_v50 = vadd.f32 %v9989_v35, %v3426_v40  ;;  %v10071_v15 = vadd.f32 %v3699_v37, %v3650_v52  ;;  %v6089_v40 = vld [vmem:[#allocation4 + $0x318] sm:$0xf0] }
 0x44c   :  { %v10074_v2 = vadd.f32 %v9991_v62, %v3475_v50  ;;  %v7446_v62 = vld [vmem:[#allocation4 + $0x30c] sm:$0xf] }
 0x44e   :  { %3848 = vmatmul.bf16.gmra.mxu2 %v11197_v49  ;;  %3897 = vmatmul.bf16.gmra.mxu3 %v11198_v53  ;;  %v3379_v43 = vpop.f32.mrf.mxu0  ;;  %v6092_v49 = vor.u32 %v7446_v62, %v6089_v40  ;;  %v11205_v62 = vld [vmem:[#allocation29_spill] sm:$0xff] }
 0x44f   :  { %v3428_v21 = vpop.f32.mrf.mxu1 }
 0x450   :  { %v3429_v7 = vadd.f32 %v3428_v21, %v3379_v43  ;;  %3788 = vmatpush.bf16.msra.mxu1 %v6092_v49 }
 0x451   :  { %v3653_v20 = vpop.f32.mrf.mxu2  ;;  %v3702_v61 = vpop.f32.mrf.mxu3  ;;  %3574 = vmatmul.bf16.gmra.mxu0 %v11203_v23 }
 0x452   :  { %v3478_v35 = vadd.f32 %v10003_v27, %v3429_v7  ;;  %3623 = vmatmul.bf16.gmra.mxu1 %v11204_v12  ;;  %v10081_v1 = vadd.f32 %v3702_v61, %v3653_v20 }
 0x454   :  { %v10084_v50 = vadd.f32 %v10005_v9, %v3478_v35 }
 0x456   :  { %v3381_v53 = vpop.f32.mrf.mxu0 }
 0x457   :  { %v3430_v52 = vpop.f32.mrf.mxu1 }
 0x458   :  { %v3431_v37 = vadd.f32 %v3430_v52, %v3381_v53 }
 0x459   :  { %v3655_v60 = vpop.f32.mrf.mxu2  ;;  %v3704_v4 = vpop.f32.mrf.mxu3 }
 0x45a   :  { %v3480_v27 = vadd.f32 %v10013_v63, %v3431_v37  ;;  %v10087_v47 = vadd.f32 %v3704_v4, %v3655_v60  ;;  %v11206_v63 = vld [vmem:[#allocation30_spill] sm:$0xff] }
 0x45c   :  { %v10090_v43 = vadd.f32 %v10015_v51, %v3480_v27 }
 0x45e   :  { %3853 = vmatmul.bf16.gmra.mxu2 %v11199_v48  ;;  %3902 = vmatmul.bf16.gmra.mxu3 %v11200_v31  ;;  %v3384_v9 = vpop.f32.mrf.mxu0 }
 0x45f   :  { %v3433_v21 = vpop.f32.mrf.mxu1 }
 0x460   :  { %v3434_v7 = vadd.f32 %v3433_v21, %v3384_v9 }
 0x461   :  { %v3658_v20 = vpop.f32.mrf.mxu2  ;;  %v3707_v61 = vpop.f32.mrf.mxu3  ;;  %3579 = vmatmul.bf16.gmra.mxu0 %v11205_v62 }
 0x462   :  { %v3483_v35 = vadd.f32 %v10027_v10, %v3434_v7  ;;  %3628 = vmatmul.bf16.gmra.mxu1 %v11206_v63  ;;  %v10097_v40 = vadd.f32 %v3707_v61, %v3658_v20 }
 0x464   :  { %v10100_v51 = vadd.f32 %v10029_v29, %v3483_v35  ;;  %v11208_v35 = vld [vmem:[#allocation14_spill] sm:$0xff] }
 0x466   :  { %v3386_v49 = vpop.f32.mrf.mxu0 }
 0x467   :  { %v3435_v48 = vpop.f32.mrf.mxu1 }
 0x468   :  { %v3436_v53 = vadd.f32 %v3435_v48, %v3386_v49 }
 0x469   :  { %v3660_v52 = vpop.f32.mrf.mxu2  ;;  %v3709_v37 = vpop.f32.mrf.mxu3 }
 0x46a   :  { %v3485_v31 = vadd.f32 %v10037_v41, %v3436_v53  ;;  %v10103_v27 = vadd.f32 %v3709_v37, %v3660_v52  ;;  %v11207_v41 = vld [vmem:[#allocation13_spill] sm:$0xff] }
 0x46c   :  { %v10106_v10 = vadd.f32 %v10039_v32, %v3485_v31  ;;  %v11209_v32 = vld [vmem:[#allocation11_spill] sm:$0xff]  ;;  %v11210_v31 = vld [vmem:[#allocation12_spill] sm:$0xff] }
 0x46e   :  { %3858 = vmatmul.bf16.gmra.mxu2 %v11123_v13  ;;  %3907 = vmatmul.bf16.gmra.mxu3 %v11124_v57  ;;  %v3545_v60 = vpop.f32.mrf.mxu0 }
 0x46f   :  { %v3594_v4 = vpop.f32.mrf.mxu1  ;;  %v3546_v29 = vadd.f32 %v3545_v60, %v9962_v25 }
 0x471   :  { %v10111_v9 = vadd.f32 %v3594_v4, %v3546_v29  ;;  %v3663_v21 = vpop.f32.mrf.mxu2  ;;  %v3712_v7 = vpop.f32.mrf.mxu3  ;;  %3740 = vmatmul.bf16.vlgmr.msra.gmra.mxu0 %v11207_v41  ;;  %v11212_v41 = vld [vmem:[#allocation20_spill] sm:$0xff] }
 0x472   :  { %3789 = vmatmul.bf16.vlgmr.msra.gmra.mxu1 %v11208_v35  ;;  %v10115_v20 = vadd.f32 %v3712_v7, %v3663_v21  ;;  %v11211_v7 = vld [vmem:[#allocation19_spill] sm:$0xff] }
 0x476   :  { %v3547_v13 = vpop.f32.mrf.mxu0 }
 0x477   :  { %v3596_v49 = vpop.f32.mrf.mxu1  ;;  %v3548_v57 = vadd.f32 %v3547_v13, %v9970_v33  ;;  %v11214_v13 = vld [vmem:[#allocation60_spill] sm:$0xff] }
 0x479   :  { %v10120_v48 = vadd.f32 %v3596_v49, %v3548_v57  ;;  %v10122_v25 = vpop.f32.mrf.mxu2  ;;  %v10124_v53 = vpop.f32.mrf.mxu3 }
 0x47e   :  { %3863 = vmatmul.bf16.gmra.mxu2 %v11201_v55  ;;  %3912 = vmatmul.bf16.gmra.mxu3 %v11202_v44  ;;  %v3550_v37 = vpop.f32.mrf.mxu0 }
 0x47f   :  { %v3599_v60 = vpop.f32.mrf.mxu1  ;;  %v3551_v4 = vadd.f32 %v3550_v37, %v9986_v17 }
 0x481   :  { %v10131_v29 = vadd.f32 %v3599_v60, %v3551_v4  ;;  %v3668_v33 = vpop.f32.mrf.mxu2  ;;  %v3717_v21 = vpop.f32.mrf.mxu3  ;;  %3745 = vmatmul.bf16.gmra.mxu0 %v11211_v7  ;;  %v11217_v60 = vld [vmem:[#allocation61_spill] sm:$0xff]  ;;  %v11221_v4 = vld [vmem:[#allocation62_spill] sm:$0xff] }
 0x482   :  { %3794 = vmatmul.bf16.gmra.mxu1 %v11212_v41  ;;  %v10135_v35 = vadd.f32 %v3717_v21, %v3668_v33 }
 0x484   :  { %11213 = vst [vmem:[#allocation9_spill] sm:$0xff] %v10135_v35 }
 0x486   :  { %v3552_v55 = vpop.f32.mrf.mxu0 }
 0x487   :  { %v3601_v57 = vpop.f32.mrf.mxu1  ;;  %v3553_v44 = vadd.f32 %v3552_v55, %v9994_v3 }
 0x489   :  { %v10140_v52 = vadd.f32 %v3601_v57, %v3553_v44  ;;  %v10142_v17 = vpop.f32.mrf.mxu2  ;;  %v10144_v37 = vpop.f32.mrf.mxu3  ;;  %v11218_v57 = vld [vmem:[#allocation25_spill] sm:$0xff]  ;;  %v11219_v44 = vld [vmem:[#allocation26_spill] sm:$0xff] }
 0x48a   :  { %11215 = vst [vmem:[#allocation10_spill] sm:$0xff] %v10142_v17 }
 0x48b   :  { %11216 = vst [vmem:[#allocation15_spill] sm:$0xff] %v10144_v37 }
 0x48e   :  { %3868 = vmatmul.bf16.gmra.mxu2 %v11203_v23  ;;  %3917 = vmatmul.bf16.gmra.mxu3 %v11204_v12  ;;  %v3555_v33 = vpop.f32.mrf.mxu0 }
 0x48f   :  { %v3604_v21 = vpop.f32.mrf.mxu1  ;;  %v3556_v7 = vadd.f32 %v3555_v33, %v10010_v38 }
 0x491   :  { %v10151_v41 = vadd.f32 %v3604_v21, %v3556_v7  ;;  %v3673_v3 = vpop.f32.mrf.mxu2  ;;  %v3722_v55 = vpop.f32.mrf.mxu3  ;;  %3750 = vmatmul.bf16.gmra.mxu0 %v11218_v57  ;;  %v11224_v21 = vld [vmem:[#allocation63_spill] sm:$0xff]  ;;  %v11228_v7 = vld [vmem:[#allocation64_spill] sm:$0xff] }
 0x492   :  { %3799 = vmatmul.bf16.gmra.mxu1 %v11219_v44  ;;  %v10155_v49 = vadd.f32 %v3722_v55, %v3673_v3 }
 0x494   :  { %11220 = vst [vmem:[#allocation16_spill] sm:$0xff] %v10155_v49 }
 0x496   :  { %v3557_v23 = vpop.f32.mrf.mxu0 }
 0x497   :  { %v3606_v37 = vpop.f32.mrf.mxu1  ;;  %v3558_v12 = vadd.f32 %v3557_v23, %v10018_v5  ;;  %v11225_v23 = vld [vmem:[#allocation31_spill] sm:$0xff] }
 0x499   :  { %v10160_v17 = vadd.f32 %v3606_v37, %v3558_v12  ;;  %v10162_v38 = vpop.f32.mrf.mxu2  ;;  %v10164_v33 = vpop.f32.mrf.mxu3  ;;  %v11226_v12 = vld [vmem:[#allocation32_spill] sm:$0xff] }
 0x49a   :  { %11222 = vst [vmem:[#allocation21_spill] sm:$0xff] %v10162_v38 }
 0x49b   :  { %11223 = vst [vmem:[#allocation22_spill] sm:$0xff] %v10164_v33  ;;  %v11231_v33 = vld [vmem:[#allocation34_spill] sm:$0xff] }
 0x49e   :  { %3873 = vmatmul.bf16.gmra.mxu2 %v11205_v62  ;;  %3922 = vmatmul.bf16.gmra.mxu3 %v11206_v63  ;;  %v3560_v3 = vpop.f32.mrf.mxu0 }
 0x49f   :  { %v3609_v55 = vpop.f32.mrf.mxu1  ;;  %v3561_v57 = vadd.f32 %v3560_v3, %v10034_v46  ;;  %v7564_v46 = vld [vmem:[%s10870_s5 + $0xb8] sm:$0xff] }
 0x4a0   :  { %4294 = vmatpush.bf16.msrb.mxu0 %v7564_v46  ;;  %v7562_v46 = vld [vmem:[%s10870_s5 + $0xa8] sm:$0xff] }
 0x4a1   :  { %v10171_v44 = vadd.f32 %v3609_v55, %v3561_v57  ;;  %v3678_v5 = vpop.f32.mrf.mxu2  ;;  %v3727_v37 = vpop.f32.mrf.mxu3  ;;  %3755 = vmatmul.bf16.gmra.mxu0 %v11225_v23  ;;  %v7548_v55 = vld [vmem:[%s10870_s5 + $0x38] sm:$0xff]  ;;  %v11229_v57 = vld [vmem:[#allocation65_spill] sm:$0xff] }
 0x4a2   :  { %3804 = vmatmul.bf16.gmra.mxu1 %v11226_v12  ;;  %v10175_v61 = vadd.f32 %v3727_v37, %v3678_v5  ;;  %4448 = vmatpush.bf16.msrb.mxu2 %v7548_v55  ;;  %v10193_v37 = vld [vmem:[%s10869_s4] sm:$0x3] }
 0x4a3   :  { %v11230_v5 = vld [vmem:[#allocation33_spill] sm:$0xff] }
 0x4a4   :  { %11227 = vst [vmem:[#allocation27_spill] sm:$0xff] %v10175_v61 }
 0x4a6   :  { %v3562_v62 = vpop.f32.mrf.mxu0 }
 0x4a7   :  { %v3611_v38 = vpop.f32.mrf.mxu1  ;;  %v3563_v63 = vadd.f32 %v3562_v62, %v10042_v14  ;;  %v7563_v14 = vld [vmem:[%s10870_s5 + $0xb0] sm:$0xff]  ;;  %v10202_v62 = vperm.slane %v10193_v37, 0 }
 0x4a8   :  { %4295 = vmatpush.bf16.msrb.mxu0 %v7563_v14  ;;  %v7546_v14 = vld [vmem:[%s10870_s5 + $0x28] sm:$0xff] }
 0x4a9   :  { %v10183_v3 = vadd.f32 %v3611_v38, %v3563_v63  ;;  %v7547_v38 = vld [vmem:[%s10870_s5 + $0x30] sm:$0xff]  ;;  %v10287_v35 = vpop.f32.mrf.mxu2 }
 0x4aa   :  { %4449 = vmatpush.bf16.msrb.mxu2 %v7547_v38  ;;  %11241 = vst [vmem:[#allocation28_spill] sm:$0xff] %v10287_v35 }
 0x4ac   :  { %4296 = vmatpush.bf16.msrb.mxu0 %v7562_v46 }
 0x4ae   :  { %v3565_v23 = vpop.f32.mrf.mxu0  ;;  %4450 = vmatpush.bf16.msrb.mxu2 %v7546_v14 }
 0x4af   :  { %v3614_v12 = vpop.f32.mrf.mxu1  ;;  %v3566_v63 = vadd.f32 %v3565_v23, %v10052_v59  ;;  %v11232_v59 = vmax.f32 %v11209_v32, %v10111_v9  ;;  %v11233_v23 = vld [vmem:[#allocation66_spill] sm:$0xff] }
 0x4b1   :  { %v3615_v55 = vadd.f32 %v3614_v12, %v3566_v63  ;;  %6631 = vmatmul.msk.bf16.gmra.mxu0 %vm8971_vm13, %v11230_v5  ;;  %v3966_v38 = vadd.f32 %v10202_v62, %v11232_v59  ;;  %v7561_v5 = vld [vmem:[%s10870_s5 + $0xa0] sm:$0xff] }
 0x4b2   :  { %6643 = vmatmul.msk.bf16.gmra.mxu1 %vm8971_vm13, %v11231_v33  ;;  %v7545_v33 = vld [vmem:[%s10870_s5 + $0x20] sm:$0xff]  ;;  %4297 = vmatpush.bf16.msrb.mxu0 %v7561_v5  ;;  %v11235_v5 = vld [vmem:[#allocation67_spill] sm:$0xff] }
 0x4b3   :  { %v3944_v12 = vmax.f32 %v11233_v23, %v3615_v55  ;;  %v3998_v61 = vmax.f32 %v3966_v38, 0.0  ;;  %4451 = vmatpush.bf16.msrb.mxu2 %v7545_v33  ;;  %v7560_v55 = vld [vmem:[%s10870_s5 + $0x98] sm:$0xff] }
 0x4b4   :  { %v7544_v23 = vld [vmem:[%s10870_s5 + $0x18] sm:$0xff] }
 0x4b5   :  { %v3982_v39 = vadd.f32 %v10202_v62, %v3944_v12  ;;  %v11234_v12 = vmax.f32 %v11210_v31, %v10120_v48 }
 0x4b6   :  { %v3567_v63 = vpop.f32.mrf.mxu0  ;;  %4298 = vmatpush.bf16.msrb.mxu0 %v7560_v55  ;;  %v11236_v55 = vmax.f32 %v11214_v13, %v10131_v29  ;;  %v11239_v13 = vld [vmem:[#allocation68_spill] sm:$0xff] }
 0x4b7   :  { %v3616_v46 = vpop.f32.mrf.mxu1  ;;  %v4014_v9 = vmax.f32 %v3982_v39, 0.0  ;;  %v3568_v32 = vadd.f32 %v3567_v63, %v10058_v16  ;;  %v3968_v38 = vadd.f32 %v10202_v62, %v11234_v12  ;;  %4452 = vmatpush.bf16.msrb.mxu2 %v7544_v23  ;;  %v7559_v16 = vld [vmem:[%s10870_s5 + $0x90] sm:$0xff] }
 0x4b8   :  { %v7543_v63 = vld [vmem:[%s10870_s5 + $0x10] sm:$0xff] }
 0x4b9   :  { %v4030_v14 = vmax.f32 %v3998_v61, %v4014_v9  ;;  %v3617_v59 = vadd.f32 %v3616_v46, %v3568_v32  ;;  %v4000_v48 = vmax.f32 %v3968_v38, 0.0  ;;  %v11238_v38 = vld [vmem:[#allocation39_spill] sm:$0xff] }
 0x4ba   :  { %4299 = vmatpush.bf16.msrb.mxu0 %v7559_v16 }
 0x4bb   :  { %v3946_v39 = vmax.f32 %v11235_v5, %v3617_v59  ;;  %v4046_v33 = vpack.c.bf16 %v4030_v14, %v4030_v14  ;;  %4453 = vmatpush.bf16.msrb.mxu2 %v7543_v63  ;;  %v3970_v59 = vadd.f32 %v10202_v62, %v11236_v55  ;;  %v7558_v14 = vld [vmem:[%s10870_s5 + $0x88] sm:$0xff] }
 0x4bd   :  { %v3984_v61 = vadd.f32 %v10202_v62, %v3946_v39  ;;  %v4143_v23 = vunpack.c.l.b16 %v4046_v33  ;;  %v11237_v39 = vld [vmem:[#allocation38_spill] sm:$0xff]  ;;  %v4002_v33 = vmax.f32 %v3970_v59, 0.0  ;;  %v7596_v59 = vld [vmem:[%s10870_s5 + $0x1b8] sm:$0xff] }
 0x4be   :  { %v3570_v46 = vpop.f32.mrf.mxu0  ;;  %4300 = vmatpush.bf16.msrb.mxu0 %v7558_v14 }
 0x4bf   :  { %v3619_v9 = vpop.f32.mrf.mxu1  ;;  %v4016_v31 = vmax.f32 %v3984_v61, 0.0  ;;  %v3571_v32 = vadd.f32 %v3570_v46, %v10068_v30  ;;  %v7542_v30 = vld [vmem:[%s10870_s5 + $0x8] sm:$0xff]  ;;  %v11240_v61 = vmax.f32 %v11217_v60, %v10140_v52  ;;  %v4159_v52 = vrot.slane %v4143_v23, 1 }
 0x4c0   :  { %4454 = vmatpush.bf16.msrb.mxu2 %v7542_v30  ;;  %v4507_v60 = vrot.slane %v4143_v23, 2  ;;  %v4695_v14 = vrot.slane %v4143_v23, 3 }
 0x4c1   :  { %v4032_v12 = vmax.f32 %v4000_v48, %v4016_v31  ;;  %v3620_v5 = vadd.f32 %v3619_v9, %v3571_v32  ;;  %6634 = vmatmul.msk.bf16.gmra.mxu0 %vm9116_vm14, %v11237_v39  ;;  %v10270_v63 = vadd.f32 %v10202_v62, %v11240_v61  ;;  %v7541_v48 = vld [vmem:[%s10870_s5] sm:$0xff]  ;;  %v7580_v31 = vld [vmem:[%s10870_s5 + $0x138] sm:$0xff]  ;;  %v5259_v39 = vrot.slane %v4143_v23, 6 }
 0x4c2   :  { %6646 = vmatmul.msk.bf16.gmra.mxu1 %vm9116_vm14, %v11238_v38  ;;  %4301 = vmatpush.bf16.msrb.mxu0 %v7557_v34 }
 0x4c3   :  { %v4048_v29 = vpack.c.bf16 %v4032_v12, %v4032_v12  ;;  %v3948_v16 = vmax.f32 %v11239_v13, %v3620_v5  ;;  %v4883_v12 = vrot.slane %v4143_v23, 4  ;;  %v5071_v5 = vrot.slane %v4143_v23, 5 }
 0x4c4   :  { %4455 = vmatpush.bf16.msrb.mxu2 %v7541_v48 }
 0x4c5   :  { %v4145_v46 = vunpack.c.l.b16 %v4048_v29  ;;  %v3986_v9 = vadd.f32 %v10202_v62, %v3948_v16 }
 0x4c6   :  { %v3572_v32 = vpop.f32.mrf.mxu0  ;;  %4635 = vmatpush.bf16.msra.mxu0 %v7580_v31  ;;  %v7595_v31 = vld [vmem:[%s10870_s5 + $0x1b0] sm:$0xff] }
 0x4c7   :  { %v3621_v55 = vpop.f32.mrf.mxu1  ;;  %v4018_v38 = vmax.f32 %v3986_v9, 0.0  ;;  %v3573_v30 = vadd.f32 %v3572_v32, %v10074_v2  ;;  %v4161_v29 = vsel %vm4160_vm0, %v4145_v46, %v4159_v52  ;;  %v4320_v13 = vrot.slane %v4145_v46, 7  ;;  %v7579_v9 = vld [vmem:[%s10870_s5 + $0x130] sm:$0xff] }
 0x4c8   :  { %4823 = vmatpush.bf16.msra.mxu2 %v7596_v59  ;;  %v4508_v16 = vrot.slane %v4145_v46, 1  ;;  %v4696_v61 = vrot.slane %v4145_v46, 2  ;;  %v4884_v34 = vrot.slane %v4145_v46, 3  ;;  %v5072_v49 = vrot.slane %v4145_v46, 4 }
 0x4c9   :  { %v4034_v0 = vmax.f32 %v4002_v33, %v4018_v38  ;;  %v3622_v28 = vadd.f32 %v3621_v55, %v3573_v30  ;;  %v4321_v2 = vsel %vm4160_vm0, %v4320_v13, %v4143_v23  ;;  %v5260_v48 = vrot.slane %v4145_v46, 5  ;;  %v10300_v55 = vpop.f32.mrf.mxu3  ;;  %v11242_v30 = vld [vmem:[#allocation37_spill] sm:$0xff] }
 0x4ca   :  { %v4509_v52 = vsel %vm4160_vm0, %v4508_v16, %v4507_v60  ;;  %v4697_v32 = vsel %vm4160_vm0, %v4696_v61, %v4695_v14  ;;  %v4885_v59 = vsel %vm4160_vm0, %v4884_v34, %v4883_v12  ;;  %v5073_v33 = vsel %vm4160_vm0, %v5072_v49, %v5071_v5  ;;  %4636 = vmatpush.bf16.msra.mxu0 %v7579_v9  ;;  %v7578_v60 = vld [vmem:[%s10870_s5 + $0x128] sm:$0xff] }
 0x4cb   :  { %v4050_v38 = vpack.c.bf16 %v4034_v0, %v4034_v0  ;;  %v3950_v35 = vmax.f32 %v11242_v30, %v3622_v28  ;;  %v5261_v23 = vsel %vm4160_vm0, %v5260_v48, %v5259_v39  ;;  %v4004_v14 = vmax.f32 %v10270_v63, 0.0  ;;  %v7594_v5 = vld [vmem:[%s10870_s5 + $0x1a8] sm:$0xff] }
 0x4cc   :  { %4824 = vmatpush.bf16.msra.mxu2 %v7595_v31  ;;  %v11243_v49 = vmax.f32 %v11221_v4, %v10151_v41 }
 0x4cd   :  { %v4147_v46 = vunpack.c.l.b16 %v4050_v38  ;;  %v3988_v13 = vadd.f32 %v10202_v62, %v3950_v35  ;;  %v7593_v38 = vld [vmem:[%s10870_s5 + $0x1a0] sm:$0xff] }
 0x4ce   :  { %v3974_v0 = vadd.f32 %v10202_v62, %v11243_v49  ;;  %v3575_v28 = vpop.f32.mrf.mxu0  ;;  %4637 = vmatpush.bf16.msra.mxu0 %v7578_v60 }
 0x4cf   :  { %v3624_v12 = vpop.f32.mrf.mxu1  ;;  %v4020_v39 = vmax.f32 %v3988_v13, 0.0  ;;  %v3576_v35 = vadd.f32 %v3575_v28, %v10084_v50  ;;  %v4162_v16 = vrot.slane %v4147_v46, 7  ;;  %v4322_v61 = vrot.slane %v4147_v46, 6  ;;  %v7577_v50 = vld [vmem:[%s10870_s5 + $0x120] sm:$0xff] }
 0x4d0   :  { %4825 = vmatpush.bf16.msra.mxu2 %v7594_v5  ;;  %v4510_v63 = vsel %vm4163_vm2, %v4147_v46, %v4509_v52  ;;  %v4698_v34 = vrot.slane %v4147_v46, 1  ;;  %v4886_v9 = vrot.slane %v4147_v46, 2  ;;  %v5074_v4 = vrot.slane %v4147_v46, 3 }
 0x4d1   :  { %v4036_v41 = vmax.f32 %v4004_v14, %v4020_v39  ;;  %v3625_v48 = vadd.f32 %v3624_v12, %v3576_v35  ;;  %6637 = vmatmul.msk.bf16.gmra.mxu0 %vm9247_vm15, %v11157_v26  ;;  %v4164_v31 = vsel %vm4163_vm2, %v4162_v16, %v4161_v29  ;;  %v5262_v52 = vrot.slane %v4147_v46, 4  ;;  %v11244_v14 = vld [vmem:[#allocation69_spill] sm:$0xff]  ;;  %v10339_v46 = vpop.f32.mrf.mxu3 }
 0x4d2   :  { %6649 = vmatmul.msk.bf16.gmra.mxu1 %vm9247_vm15, %v11159_v22  ;;  %v4323_v30 = vsel %vm4163_vm2, %v4322_v61, %v4321_v2  ;;  %v4699_v13 = vsel %vm4163_vm2, %v4698_v34, %v4697_v32  ;;  %v4887_v26 = vsel %vm4163_vm2, %v4886_v9, %v4885_v59  ;;  %v5075_v8 = vsel %vm4163_vm2, %v5074_v4, %v5073_v33  ;;  %v10335_v22 = vpop.f32.mrf.mxu2  ;;  %v7576_v32 = vld [vmem:[%s10870_s5 + $0x118] sm:$0xff] }
 0x4d3   :  { %v4052_v60 = vpack.c.bf16 %v4036_v41, %v4036_v41  ;;  %v3952_v49 = vmax.f32 %v11244_v14, %v3625_v48  ;;  %4638 = vmatpush.bf16.msra.mxu0 %v7577_v50  ;;  %v5263_v29 = vsel %vm4163_vm2, %v5262_v52, %v5261_v23  ;;  %v4006_v59 = vmax.f32 %v3974_v0, 0.0  ;;  %v7592_v23 = vld [vmem:[%s10870_s5 + $0x198] sm:$0xff]  ;;  %v7575_v48 = vld [vmem:[%s10870_s5 + $0x110] sm:$0xff] }
 0x4d4   :  { %4826 = vmatpush.bf16.msra.mxu2 %v7593_v38  ;;  %v11245_v33 = vmax.f32 %v11224_v21, %v10160_v17 }
 0x4d5   :  { %v4149_v28 = vunpack.c.l.b16 %v4052_v60  ;;  %v3990_v2 = vadd.f32 %v10202_v62, %v3952_v49 }
 0x4d6   :  { %v3976_v12 = vadd.f32 %v10202_v62, %v11245_v33  ;;  %v3577_v5 = vpop.f32.mrf.mxu0 }
 0x4d7   :  { %v3626_v39 = vpop.f32.mrf.mxu1  ;;  %v4022_v35 = vmax.f32 %v3990_v2, 0.0  ;;  %v3578_v16 = vadd.f32 %v3577_v5, %v10090_v43  ;;  %4639 = vmatpush.bf16.msra.mxu0 %v7576_v32  ;;  %v4165_v61 = vrot.slane %v4149_v28, 6  ;;  %v4324_v34 = vrot.slane %v4149_v28, 5  ;;  %v7591_v43 = vld [vmem:[%s10870_s5 + $0x190] sm:$0xff]  ;;  %v11246_v2 = vld [vmem:[#allocation45_spill] sm:$0xff]  ;;  %v7590_v5 = vld [vmem:[%s10870_s5 + $0x188] sm:$0xff] }
 0x4d8   :  { %4827 = vmatpush.bf16.msra.mxu2 %v7592_v23  ;;  %v4511_v9 = vrot.slane %v4149_v28, 7  ;;  %v4700_v0 = vsel %vm4166_vm3, %v4149_v28, %v4699_v13  ;;  %v4888_v4 = vrot.slane %v4149_v28, 1  ;;  %v5076_v17 = vrot.slane %v4149_v28, 2 }
 0x4d9   :  { %v4038_v21 = vmax.f32 %v4006_v59, %v4022_v35  ;;  %v3627_v41 = vadd.f32 %v3626_v39, %v3578_v16  ;;  %v4167_v50 = vsel %vm4166_vm3, %v4165_v61, %v4164_v31  ;;  %v4325_v52 = vsel %vm4166_vm3, %v4324_v34, %v4323_v30  ;;  %v10376_v39 = vpop.f32.mrf.mxu3 }
 0x4da   :  { %v4512_v38 = vsel %vm4166_vm3, %v4511_v9, %v4510_v63  ;;  %v4889_v13 = vsel %vm4166_vm3, %v4888_v4, %v4887_v26  ;;  %v5077_v60 = vsel %vm4166_vm3, %v5076_v17, %v5075_v8  ;;  %v5264_v14 = vrot.slane %v4149_v28, 3  ;;  %v10367_v59 = vpop.f32.mrf.mxu2  ;;  %v7574_v63 = vld [vmem:[%s10870_s5 + $0x108] sm:$0xff] }
 0x4db   :  { %v4054_v49 = vpack.c.bf16 %v4038_v21, %v4038_v21  ;;  %v3954_v32 = vmax.f32 %v11246_v2, %v3627_v41  ;;  %4640 = vmatpush.bf16.msra.mxu0 %v7575_v48  ;;  %v4008_v26 = vmax.f32 %v3976_v12, 0.0  ;;  %v11247_v61 = vmax.f32 %v11228_v7, %v10171_v44  ;;  %v7589_v48 = vld [vmem:[%s10870_s5 + $0x180] sm:$0xff] }
 0x4dc   :  { %4828 = vmatpush.bf16.msra.mxu2 %v7591_v43  ;;  %v5265_v31 = vsel %vm4166_vm3, %v5264_v14, %v5263_v29 }
 0x4dd   :  { %v4151_v30 = vunpack.c.l.b16 %v4054_v49  ;;  %v3992_v33 = vadd.f32 %v10202_v62, %v3954_v32  ;;  %v3978_v34 = vadd.f32 %v10202_v62, %v11247_v61 }
 0x4de   :  { %v3580_v8 = vpop.f32.mrf.mxu0 }
 0x4df   :  { %v3629_v28 = vpop.f32.mrf.mxu1  ;;  %v4024_v29 = vmax.f32 %v3992_v33, 0.0  ;;  %v3581_v23 = vadd.f32 %v3580_v8, %v10100_v51  ;;  %4641 = vmatpush.bf16.msra.mxu0 %v7574_v63  ;;  %v4168_v35 = vrot.slane %v4151_v30, 5  ;;  %v4326_v16 = vrot.slane %v4151_v30, 4  ;;  %v7573_v51 = vld [vmem:[%s10870_s5 + $0x100] sm:$0xff] }
 0x4e0   :  { %4829 = vmatpush.bf16.msra.mxu2 %v7590_v5  ;;  %v4513_v12 = vrot.slane %v4151_v30, 6  ;;  %v4701_v9 = vrot.slane %v4151_v30, 7  ;;  %v4890_v4 = vsel %vm4169_vm4, %v4151_v30, %v4889_v13  ;;  %v5078_v44 = vrot.slane %v4151_v30, 1 }
 0x4e1   :  { %v4040_v17 = vmax.f32 %v4008_v26, %v4024_v29  ;;  %v3630_v21 = vadd.f32 %v3629_v28, %v3581_v23  ;;  %6640 = vmatmul.msk.bf16.gmra.mxu0 %vm9338_vm1, %v11162_v6  ;;  %v4170_v7 = vsel %vm4169_vm4, %v4168_v35, %v4167_v50  ;;  %v4327_v41 = vsel %vm4169_vm4, %v4326_v16, %v4325_v52  ;;  %v10412_v35 = vpop.f32.mrf.mxu3 }
 0x4e2   :  { %6652 = vmatmul.msk.bf16.gmra.mxu1 %vm9338_vm1, %v11164_v36  ;;  %v4514_v43 = vsel %vm4169_vm4, %v4513_v12, %v4512_v38  ;;  %v4702_v6 = vsel %vm4169_vm4, %v4701_v9, %v4700_v0  ;;  %v5266_v13 = vrot.slane %v4151_v30, 2  ;;  %v11248_v36 = vld [vmem:[#allocation44_spill] sm:$0xff]  ;;  %v5079_v49 = vsel %vm4169_vm4, %v5078_v44, %v5077_v60  ;;  %v10408_v63 = vpop.f32.mrf.mxu2 }
 0x4e3   :  { %v4056_v54 = vpack.c.bf16 %v4040_v17, %v4040_v17  ;;  %v3956_v14 = vmax.f32 %v11248_v36, %v3630_v21  ;;  %4642 = vmatpush.bf16.msra.mxu0 %v7573_v51  ;;  %v4010_v32 = vmax.f32 %v3978_v34, 0.0  ;;  %v11249_v38 = vmax.f32 %v11229_v57, %v10183_v3  ;;  %v11250_v21 = vld [vmem:[#allocation46_spill] sm:$0xff] }
 0x4e4   :  { %4830 = vmatpush.bf16.msra.mxu2 %v7589_v48  ;;  %v5267_v50 = vsel %vm4169_vm4, %v5266_v13, %v5265_v31 }
 0x4e5   :  { %v4153_v2 = vunpack.c.l.b16 %v4056_v54  ;;  %v3994_v52 = vadd.f32 %v10202_v62, %v3956_v14  ;;  %v3980_v0 = vadd.f32 %v10202_v62, %v11249_v38 }
 0x4e6   :  { %v3582_v30 = vpop.f32.mrf.mxu0 }
 0x4e7   :  { %v3631_v33 = vpop.f32.mrf.mxu1  ;;  %v4026_v26 = vmax.f32 %v3994_v52, 0.0  ;;  %v3583_v60 = vadd.f32 %v3582_v30, %v10106_v10  ;;  %v4171_v8 = vrot.slane %v4153_v2, 4  ;;  %v4328_v28 = vrot.slane %v4153_v2, 3 }
 0x4e8   :  { %v4515_v31 = vrot.slane %v4153_v2, 5  ;;  %v4703_v5 = vrot.slane %v4153_v2, 6  ;;  %v4891_v29 = vrot.slane %v4153_v2, 7  ;;  %v5080_v23 = vsel %vm4172_vm5, %v4153_v2, %v5079_v49 }
 0x4e9   :  { %v4042_v16 = vmax.f32 %v4010_v32, %v4026_v26  ;;  %v3632_v3 = vadd.f32 %v3631_v33, %v3583_v60  ;;  %v4173_v57 = vsel %vm4172_vm5, %v4171_v8, %v4170_v7  ;;  %v4329_v61 = vsel %vm4172_vm5, %v4328_v28, %v4327_v41  ;;  %v10431_v60 = vpop.f32.mrf.mxu3 }
 0x4ea   :  { %v4516_v34 = vsel %vm4172_vm5, %v4515_v31, %v4514_v43  ;;  %v4704_v12 = vsel %vm4172_vm5, %v4703_v5, %v4702_v6  ;;  %v4892_v10 = vsel %vm4172_vm5, %v4891_v29, %v4890_v4  ;;  %v5268_v9 = vrot.slane %v4153_v2, 1  ;;  %v10423_v32 = vpop.f32.mrf.mxu2  ;;  %v7572_v31 = vld [vmem:[%s10870_s5 + $0xf8] sm:$0xff] }
 0x4eb   :  { %v4058_v17 = vpack.c.bf16 %v4042_v16, %v4042_v16  ;;  %v3958_v51 = vmax.f32 %v11250_v21, %v3632_v3  ;;  %v4012_v54 = vmax.f32 %v3980_v0, 0.0  ;;  %v10439_v29 = vperm.slane %v10193_v37, 1  ;;  %4307 = vmatpush.bf16.msrb.mxu1 %v7572_v31  ;;  %v7626_v31 = vld [vmem:[%s10870_s5 + $0x2a8] sm:$0xff] }
 0x4ec   :  { %v5269_v44 = vsel %vm4172_vm5, %v5268_v9, %v5267_v50 }
 0x4ed   :  { %v4155_v48 = vunpack.c.l.b16 %v4058_v17  ;;  %v3996_v13 = vadd.f32 %v10202_v62, %v3958_v51 }
 0x4ee   :  { %v3741_v36 = vpop.f32.mrf.mxu0 }
 0x4ef   :  { %v3790_v7 = vpop.f32.mrf.mxu1  ;;  %v4028_v41 = vmax.f32 %v3996_v13, 0.0  ;;  %v3742_v43 = vadd.f32 %v3741_v36, %v10049_v11  ;;  %v4174_v14 = vrot.slane %v4155_v48, 3  ;;  %v4330_v6 = vrot.slane %v4155_v48, 2  ;;  %v7612_v13 = vld [vmem:[%s10870_s5 + $0x238] sm:$0xff] }
 0x4f0   :  { %v4517_v49 = vrot.slane %v4155_v48, 4  ;;  %v4705_v4 = vrot.slane %v4155_v48, 5  ;;  %v4893_v2 = vrot.slane %v4155_v48, 6  ;;  %v5081_v52 = vrot.slane %v4155_v48, 7 }
 0x4f1   :  { %v4044_v38 = vmax.f32 %v4012_v54, %v4028_v41  ;;  %v3791_v50 = vadd.f32 %v3790_v7, %v3742_v43  ;;  %v4176_v30 = vsel %vm4175_vm6, %v4174_v14, %v4173_v57  ;;  %v4331_v62 = vsel %vm4175_vm6, %v4330_v6, %v4329_v61  ;;  %v11251_v61 = vld [vmem:[#allocation53_spill] sm:$0xff]  ;;  %v7556_v6 = vld [vmem:[%s10870_s5 + $0x78] sm:$0xff] }
 0x4f2   :  { %v4518_v0 = vsel %vm4175_vm6, %v4517_v49, %v4516_v34  ;;  %v4706_v33 = vsel %vm4175_vm6, %v4705_v4, %v4704_v12  ;;  %v4894_v11 = vsel %vm4175_vm6, %v4893_v2, %v4892_v10  ;;  %v5082_v26 = vsel %vm4175_vm6, %v5081_v52, %v5080_v23  ;;  %v10457_v43 = vpop.f32.mrf.mxu2  ;;  %v10469_v52 = vpop.f32.mrf.mxu3  ;;  %4461 = vmatpush.bf16.msrb.mxu3 %v7556_v6 }
 0x4f3   :  { %v4060_v8 = vpack.c.bf16 %v4044_v38, %v4044_v38  ;;  %v3840_v28 = vadd.f32 %v10335_v22, %v3791_v50  ;;  %v5270_v5 = vsel %vm4175_vm6, %v4155_v48, %v5269_v44  ;;  %v7627_v50 = vld [vmem:[%s10870_s5 + $0x2b0] sm:$0xff] }
 0x4f5   :  { %v4157_v16 = vunpack.c.l.b16 %v4060_v8  ;;  %v3889_v3 = vadd.f32 %v10339_v46, %v3840_v28  ;;  %v7610_v28 = vld [vmem:[%s10870_s5 + $0x228] sm:$0xff] }
 0x4f6   :  { %v3743_v57 = vpop.f32.mrf.mxu0 }
 0x4f7   :  { %v3792_v23 = vpop.f32.mrf.mxu1  ;;  %v3929_v34 = vmax.f32 %v11251_v61, %v3889_v3  ;;  %v3744_v22 = vadd.f32 %v3743_v57, %v10055_v42  ;;  %v4177_v12 = vrot.slane %v4157_v16, 2  ;;  %v4332_v10 = vrot.slane %v4157_v16, 1  ;;  %v7628_v42 = vld [vmem:[%s10870_s5 + $0x2b8] sm:$0xff]  ;;  %v7609_v57 = vld [vmem:[%s10870_s5 + $0x220] sm:$0xff] }
 0x4f8   :  { %v4519_v9 = vrot.slane %v4157_v16, 3  ;;  %v4707_v17 = vrot.slane %v4157_v16, 4  ;;  %v4895_v21 = vrot.slane %v4157_v16, 5  ;;  %v5083_v51 = vrot.slane %v4157_v16, 6 }
 0x4f9   :  { %v10445_v37 = vadd.f32 %v10439_v29, %v3929_v34  ;;  %v3793_v44 = vadd.f32 %v3792_v23, %v3744_v22  ;;  %v4179_v46 = vsel %vm4178_vm7, %v4177_v12, %v4176_v30  ;;  %v4333_v48 = vsel %vm4178_vm7, %v4332_v10, %v4331_v62  ;;  %v7625_v23 = vld [vmem:[%s10870_s5 + $0x2a0] sm:$0xff]  ;;  %v11253_v22 = vld [vmem:[#allocation54_spill] sm:$0xff] }
 0x4fa   :  { %v4194_v54 = vpack.c.b16 %v4179_v46, %v4179_v46  ;;  %v4348_v36 = vpack.c.b16 %v4333_v48, %v4333_v48  ;;  %v4520_v7 = vsel %vm4178_vm7, %v4519_v9, %v4518_v0  ;;  %v4708_v41 = vsel %vm4178_vm7, %v4707_v17, %v4706_v33  ;;  %v11252_v33 = vld [vmem:[#allocation55_spill] sm:$0xff]  ;;  %v3900_v34 = vpop.f32.mrf.mxu3  ;;  %v7608_v17 = vld [vmem:[%s10870_s5 + $0x218] sm:$0xff] }
 0x4fb   :  { %v3842_v14 = vadd.f32 %v10367_v59, %v3793_v44  ;;  %v10464_v49 = vsel %vm4178_vm7, %v4895_v21, %v4894_v11  ;;  %v10467_v4 = vsel %vm4178_vm7, %v5083_v51, %v5082_v26  ;;  %v5271_v2 = vrot.slane %v4157_v16, 7  ;;  %v7611_v59 = vld [vmem:[%s10870_s5 + $0x230] sm:$0xff]  ;;  %v10496_v16 = vpop.f32.mrf.mxu2  ;;  %v7624_v21 = vld [vmem:[%s10870_s5 + $0x298] sm:$0xff] }
 0x4fc   :  { %4302 = vmatmul.bf16.vlgmr.msrb.gmra.mxu0 %v4194_v54  ;;  %4456 = vmatmul.bf16.vlgmr.msrb.gmra.mxu2 %v4348_v36  ;;  %v4535_v51 = vpack.c.b16 %v4520_v7, %v4520_v7  ;;  %v4723_v44 = vpack.c.b16 %v4708_v41, %v4708_v41 }
 0x4fd   :  { %v3891_v38 = vadd.f32 %v10376_v39, %v3842_v14  ;;  %5011 = vmatpush.bf16.msrb.mxu0 %v7612_v13  ;;  %5199 = vmatpush.bf16.msrb.mxu2 %v7628_v42  ;;  %v10479_v0 = vsel %vm4178_vm7, %v5271_v2, %v5270_v5  ;;  %v7607_v13 = vld [vmem:[%s10870_s5 + $0x210] sm:$0xff]  ;;  %v7606_v2 = vld [vmem:[%s10870_s5 + $0x208] sm:$0xff] }
 0x4fe   :  { %v3746_v30 = vpop.f32.mrf.mxu0  ;;  %v7623_v42 = vld [vmem:[%s10870_s5 + $0x290] sm:$0xff] }
 0x4ff   :  { %v3795_v62 = vpop.f32.mrf.mxu1  ;;  %v3931_v11 = vmax.f32 %v11252_v33, %v3891_v38  ;;  %v3747_v39 = vadd.f32 %v3746_v30, %v10065_v19  ;;  %v7571_v19 = vld [vmem:[%s10870_s5 + $0xf0] sm:$0xff]  ;;  %v7622_v38 = vld [vmem:[%s10870_s5 + $0x288] sm:$0xff]  ;;  %v7621_v30 = vld [vmem:[%s10870_s5 + $0x280] sm:$0xff] }
 0x500   :  { %4308 = vmatpush.bf16.msrb.mxu1 %v7571_v19 }
 0x501   :  { %v10484_v26 = vadd.f32 %v10439_v29, %v3931_v11  ;;  %v3796_v8 = vadd.f32 %v3795_v62, %v3747_v39  ;;  %5012 = vmatpush.bf16.msrb.mxu0 %v7611_v59  ;;  %5200 = vmatpush.bf16.msrb.mxu2 %v7627_v50  ;;  %v7605_v50 = vld [vmem:[%s10870_s5 + $0x200] sm:$0xff] }
 0x502   :  { %v3903_v14 = vpop.f32.mrf.mxu3 }
 0x503   :  { %v3845_v5 = vadd.f32 %v10408_v63, %v3796_v8  ;;  %v3854_v36 = vpop.f32.mrf.mxu2 }
 0x505   :  { %v3894_v3 = vadd.f32 %v10412_v35, %v3845_v5  ;;  %5013 = vmatpush.bf16.msrb.mxu0 %v7610_v28  ;;  %5201 = vmatpush.bf16.msrb.mxu2 %v7626_v31  ;;  %v4911_v31 = vpack.c.b16 %v10464_v49, %v10464_v49  ;;  %v5099_v5 = vpack.c.b16 %v10467_v4, %v10467_v4  ;;  %v7642_v49 = vld [vmem:[%s10870_s5 + $0x328] sm:$0xff] }
 0x506   :  { %v3748_v61 = vpop.f32.mrf.mxu0 }
 0x507   :  { %v3797_v63 = vpop.f32.mrf.mxu1  ;;  %v3933_v12 = vmax.f32 %v11253_v22, %v3894_v3  ;;  %v3749_v10 = vadd.f32 %v3748_v61, %v10071_v15  ;;  %v7555_v15 = vld [vmem:[%s10870_s5 + $0x70] sm:$0xff] }
 0x508   :  { %4462 = vmatpush.bf16.msrb.mxu3 %v7555_v15 }
 0x509   :  { %v10508_v35 = vadd.f32 %v10439_v29, %v3933_v12  ;;  %v3798_v9 = vadd.f32 %v3797_v63, %v3749_v10  ;;  %5014 = vmatpush.bf16.msrb.mxu0 %v7609_v57  ;;  %5202 = vmatpush.bf16.msrb.mxu2 %v7625_v23 }
 0x50a   :  { %v3905_v19 = vpop.f32.mrf.mxu3 }
 0x50b   :  { %v3847_v46 = vadd.f32 %v10423_v32, %v3798_v9  ;;  %v3856_v39 = vpop.f32.mrf.mxu2 }
 0x50c   :  { %4643 = vmatmul.bf16.vlgmr.msra.gmra.mxu0 %v4535_v51  ;;  %4831 = vmatmul.bf16.vlgmr.msra.gmra.mxu2 %v4723_v44 }
 0x50d   :  { %v3896_v48 = vadd.f32 %v10431_v60, %v3847_v46  ;;  %5015 = vmatpush.bf16.msrb.mxu0 %v7608_v17  ;;  %5203 = vmatpush.bf16.msrb.mxu2 %v7624_v21  ;;  %v7640_v21 = vld [vmem:[%s10870_s5 + $0x318] sm:$0xff] }
 0x50e   :  { %v3751_v54 = vpop.f32.mrf.mxu0 }
 0x50f   :  { %v3800_v32 = vpop.f32.mrf.mxu1  ;;  %v3935_v7 = vmax.f32 %v9790_v45, %v3896_v48  ;;  %v3752_v41 = vadd.f32 %v3751_v54, %v10081_v1  ;;  %v7570_v45 = vld [vmem:[%s10870_s5 + $0xe8] sm:$0xff]  ;;  %v7569_v48 = vld [vmem:[%s10870_s5 + $0xe0] sm:$0xff] }
 0x510   :  { %4309 = vmatpush.bf16.msrb.mxu1 %v7570_v45 }
 0x511   :  { %v10530_v60 = vadd.f32 %v10439_v29, %v3935_v7  ;;  %v3801_v6 = vadd.f32 %v3800_v32, %v3752_v41  ;;  %5016 = vmatpush.bf16.msrb.mxu0 %v7607_v13  ;;  %5204 = vmatpush.bf16.msrb.mxu2 %v7623_v42  ;;  %v7639_v13 = vld [vmem:[%s10870_s5 + $0x310] sm:$0xff] }
 0x512   :  { %v3908_v9 = vpop.f32.mrf.mxu3 }
 0x513   :  { %v3850_v59 = vadd.f32 %v10457_v43, %v3801_v6  ;;  %v7644_v43 = vld [vmem:[%s10870_s5 + $0x338] sm:$0xff]  ;;  %v3859_v12 = vpop.f32.mrf.mxu2 }
 0x514   :  { %4310 = vmatpush.bf16.msrb.mxu1 %v7569_v48 }
 0x515   :  { %v3899_v1 = vadd.f32 %v10469_v52, %v3850_v59  ;;  %5017 = vmatpush.bf16.msrb.mxu0 %v7606_v2  ;;  %5205 = vmatpush.bf16.msrb.mxu2 %v7622_v38  ;;  %v7553_v38 = vld [vmem:[%s10870_s5 + $0x60] sm:$0xff] }
 0x516   :  { %v3753_v62 = vpop.f32.mrf.mxu0  ;;  %v7637_v59 = vld [vmem:[%s10870_s5 + $0x300] sm:$0xff] }
 0x517   :  { %v3802_v33 = vpop.f32.mrf.mxu1  ;;  %v3937_v11 = vmax.f32 %v9807_v56, %v3899_v1  ;;  %v3754_v52 = vadd.f32 %v3753_v62, %v10087_v47  ;;  %v7643_v56 = vld [vmem:[%s10870_s5 + $0x330] sm:$0xff] }
 0x518   :  { %v11254_v62 = vld [vmem:[#allocation35_spill] sm:$0xff] }
 0x519   :  { %v10555_v8 = vadd.f32 %v10439_v29, %v3937_v11  ;;  %v3803_v28 = vadd.f32 %v3802_v33, %v3754_v52  ;;  %5018 = vmatpush.bf16.msrb.mxu0 %v7605_v50  ;;  %5206 = vmatpush.bf16.msrb.mxu2 %v7621_v30  ;;  %v5287_v11 = vpack.c.b16 %v10479_v0, %v10479_v0  ;;  %v7552_v0 = vld [vmem:[%s10870_s5 + $0x58] sm:$0xff] }
 0x51a   :  { %v3910_v7 = vpop.f32.mrf.mxu3 }
 0x51b   :  { %v3852_v47 = vadd.f32 %v10496_v16, %v3803_v28  ;;  %v7554_v16 = vld [vmem:[%s10870_s5 + $0x68] sm:$0xff]  ;;  %v3861_v54 = vpop.f32.mrf.mxu2 }
 0x51c   :  { %5019 = vmatmul.bf16.vlgmr.msrb.gmra.mxu0 %v4911_v31  ;;  %5207 = vmatmul.bf16.vlgmr.msrb.gmra.mxu2 %v5099_v5 }
 0x51d   :  { %5387 = vmatpush.bf16.msra.mxu0 %v7644_v43  ;;  %v3901_v3 = vadd.f32 %v3900_v34, %v3852_v47  ;;  %v7641_v34 = vld [vmem:[%s10870_s5 + $0x320] sm:$0xff]  ;;  %4463 = vmatpush.bf16.msrb.mxu3 %v7554_v16 }
 0x51e   :  { %v3756_v57 = vpop.f32.mrf.mxu0 }
 0x51f   :  { %v3805_v23 = vpop.f32.mrf.mxu1  ;;  %v3939_v61 = vmax.f32 %v9816_v58, %v3901_v3  ;;  %v3757_v4 = vadd.f32 %v3756_v57, %v10097_v40  ;;  %v11255_v57 = vld [vmem:[#allocation36_spill] sm:$0xff] }
 0x521   :  { %5388 = vmatpush.bf16.msra.mxu0 %v7643_v56  ;;  %v10571_v63 = vadd.f32 %v10439_v29, %v3939_v61  ;;  %v3806_v22 = vadd.f32 %v3805_v23, %v3757_v4  ;;  %4464 = vmatpush.bf16.msrb.mxu3 %v7553_v38 }
 0x522   :  { %v3913_v52 = vpop.f32.mrf.mxu3 }
 0x523   :  { %v3855_v10 = vadd.f32 %v3854_v36, %v3806_v22  ;;  %v7638_v36 = vld [vmem:[%s10870_s5 + $0x308] sm:$0xff]  ;;  %v3864_v30 = vpop.f32.mrf.mxu2 }
 0x525   :  { %5389 = vmatpush.bf16.msra.mxu0 %v7642_v49  ;;  %v3904_v58 = vadd.f32 %v3903_v14, %v3855_v10  ;;  %v11256_v49 = vld [vmem:[#allocation9_spill] sm:$0xff]  ;;  %4465 = vmatpush.bf16.msrb.mxu3 %v7552_v0  ;;  %v4001_v10 = vmax.f32 %v10484_v26, 0.0  ;;  %v7587_v0 = vld [vmem:[%s10870_s5 + $0x170] sm:$0xff] }
 0x526   :  { %v3758_v40 = vpop.f32.mrf.mxu0 }
 0x527   :  { %v3807_v17 = vpop.f32.mrf.mxu1  ;;  %v3941_v51 = vmax.f32 %v9833_v24, %v3904_v58  ;;  %v3759_v44 = vadd.f32 %v3758_v40, %v10103_v27 }
 0x529   :  { %5390 = vmatpush.bf16.msra.mxu0 %v7641_v34  ;;  %v10585_v46 = vadd.f32 %v10439_v29, %v3941_v51  ;;  %v3808_v15 = vadd.f32 %v3807_v17, %v3759_v44  ;;  %v11257_v51 = vld [vmem:[#allocation10_spill] sm:$0xff]  ;;  %v11258_v44 = vld [vmem:[#allocation15_spill] sm:$0xff] }
 0x52b   :  { %v3857_v42 = vadd.f32 %v3856_v39, %v3808_v15  ;;  %v3866_v22 = vpop.f32.mrf.mxu2  ;;  %v3720_v15 = vadd.f32 %v11258_v44, %v11257_v51  ;;  %v7586_v51 = vld [vmem:[%s10870_s5 + $0x168] sm:$0xff]  ;;  %v11262_v44 = vld [vmem:[#allocation21_spill] sm:$0xff] }
 0x52d   :  { %5391 = vmatpush.bf16.msra.mxu0 %v7640_v21  ;;  %v3906_v32 = vadd.f32 %v3905_v19, %v3857_v42  ;;  %v7566_v21 = vld [vmem:[%s10870_s5 + $0xc8] sm:$0xff] }
 0x52e   :  { %v3761_v24 = vpop.f32.mrf.mxu0  ;;  %v7550_v42 = vld [vmem:[%s10870_s5 + $0x48] sm:$0xff] }
 0x52f   :  { %v3810_v27 = vpop.f32.mrf.mxu1  ;;  %v3943_v41 = vmax.f32 %v9842_v18, %v3906_v32  ;;  %v3762_v14 = vadd.f32 %v3761_v24, %v10115_v20  ;;  %v3715_v18 = vadd.f32 %v10124_v53, %v10122_v25  ;;  %v7568_v25 = vld [vmem:[%s10870_s5 + $0xd8] sm:$0xff]  ;;  %v3999_v53 = vmax.f32 %v10445_v37, 0.0  ;;  %v7567_v37 = vld [vmem:[%s10870_s5 + $0xd0] sm:$0xff] }
 0x530   :  { %4311 = vmatpush.bf16.msrb.mxu1 %v7568_v25  ;;  %v11259_v24 = vld [vmem:[#allocation40_spill] sm:$0xff] }
 0x531   :  { %5392 = vmatpush.bf16.msra.mxu0 %v7639_v13  ;;  %v10599_v6 = vadd.f32 %v10439_v29, %v3943_v41  ;;  %v3811_v2 = vadd.f32 %v3810_v27, %v3762_v14  ;;  %v7565_v41 = vld [vmem:[%s10870_s5 + $0xc0] sm:$0xff] }
 0x533   :  { %v3860_v45 = vadd.f32 %v3859_v12, %v3811_v2  ;;  %v7551_v12 = vld [vmem:[%s10870_s5 + $0x50] sm:$0xff] }
 0x534   :  { %4312 = vmatpush.bf16.msrb.mxu1 %v7567_v37  ;;  %4466 = vmatpush.bf16.msrb.mxu3 %v7551_v12 }
 0x535   :  { %5393 = vmatpush.bf16.msra.mxu0 %v7638_v36  ;;  %v3909_v1 = vadd.f32 %v3908_v9, %v3860_v45  ;;  %v3915_v9 = vpop.f32.mrf.mxu3  ;;  %v7549_v45 = vld [vmem:[%s10870_s5 + $0x40] sm:$0xff] }
 0x536   :  { %v3763_v20 = vpop.f32.mrf.mxu0 }
 0x537   :  { %v3812_v50 = vpop.f32.mrf.mxu1  ;;  %v3945_v33 = vmax.f32 %v11254_v62, %v3909_v1  ;;  %v3764_v43 = vadd.f32 %v3763_v20, %v3715_v18  ;;  %v7588_v18 = vld [vmem:[%s10870_s5 + $0x178] sm:$0xff] }
 0x538   :  { %4313 = vmatpush.bf16.msrb.mxu1 %v7566_v21  ;;  %4467 = vmatpush.bf16.msrb.mxu3 %v7550_v42  ;;  %v7602_v42 = vld [vmem:[%s10870_s5 + $0x1e8] sm:$0xff] }
 0x539   :  { %5394 = vmatpush.bf16.msra.mxu0 %v7637_v59  ;;  %v3983_v39 = vadd.f32 %v10439_v29, %v3945_v33  ;;  %v3813_v28 = vadd.f32 %v3812_v50, %v3764_v43  ;;  %v3869_v33 = vpop.f32.mrf.mxu2 }
 0x53b   :  { %v4015_v31 = vmax.f32 %v3983_v39, 0.0  ;;  %v3862_v5 = vadd.f32 %v3861_v54, %v3813_v28 }
 0x53c   :  { %5395 = vmatmul.bf16.vlgmr.msra.gmra.mxu0 %v5287_v11  ;;  %4314 = vmatpush.bf16.msrb.mxu1 %v7565_v41 }
 0x53d   :  { %v4031_v56 = vmax.f32 %v3999_v53, %v4015_v31  ;;  %v3911_v19 = vadd.f32 %v3910_v7, %v3862_v5  ;;  %v4003_v7 = vmax.f32 %v10508_v35, 0.0  ;;  %v7604_v35 = vld [vmem:[%s10870_s5 + $0x1f8] sm:$0xff]  ;;  %4468 = vmatpush.bf16.msrb.mxu3 %v7549_v45  ;;  %v3918_v5 = vpop.f32.mrf.mxu3 }
 0x53e   :  { %v3766_v47 = vpop.f32.mrf.mxu0 }
 0x53f   :  { %v3815_v3 = vpop.f32.mrf.mxu1  ;;  %v3947_v23 = vmax.f32 %v11255_v57, %v3911_v19  ;;  %v3767_v61 = vadd.f32 %v3766_v47, %v11256_v49  ;;  %v4047_v4 = vpack.c.bf16 %v4031_v56, %v4031_v56  ;;  %v7603_v49 = vld [vmem:[%s10870_s5 + $0x1f0] sm:$0xff] }
 0x540   :  { %4648 = vmatpush.bf16.msra.mxu1 %v7588_v18 }
 0x541   :  { %v3985_v16 = vadd.f32 %v10439_v29, %v3947_v23  ;;  %v3816_v34 = vadd.f32 %v3815_v3, %v3767_v61  ;;  %v4144_v17 = vunpack.c.l.b16 %v4047_v4  ;;  %4836 = vmatpush.bf16.msra.mxu3 %v7604_v35  ;;  %v7601_v35 = vld [vmem:[%s10870_s5 + $0x1e0] sm:$0xff] }
 0x543   :  { %v4017_v58 = vmax.f32 %v3985_v16, 0.0  ;;  %v3865_v40 = vadd.f32 %v3864_v30, %v3816_v34  ;;  %v4180_v14 = vrot.slane %v4144_v17, 1  ;;  %v4521_v1 = vrot.slane %v4144_v17, 2  ;;  %v11260_v34 = vld [vmem:[#allocation41_spill] sm:$0xff] }
 0x544   :  { %v4709_v20 = vrot.slane %v4144_v17, 3  ;;  %v4897_v50 = vrot.slane %v4144_v17, 4  ;;  %v5085_v30 = vrot.slane %v4144_v17, 5  ;;  %v5273_v62 = vrot.slane %v4144_v17, 6  ;;  %4649 = vmatpush.bf16.msra.mxu1 %v7587_v0 }
 0x545   :  { %v4033_v48 = vmax.f32 %v4001_v10, %v4017_v58  ;;  %v3914_v13 = vadd.f32 %v3913_v52, %v3865_v40  ;;  %v11261_v10 = vld [vmem:[#allocation16_spill] sm:$0xff]  ;;  %4837 = vmatpush.bf16.msra.mxu3 %v7603_v49  ;;  %v7599_v49 = vld [vmem:[%s10870_s5 + $0x1d0] sm:$0xff] }
 0x546   :  { %v3768_v54 = vpop.f32.mrf.mxu0 }
 0x547   :  { %v3817_v26 = vpop.f32.mrf.mxu1  ;;  %v4049_v32 = vpack.c.bf16 %v4033_v48, %v4033_v48  ;;  %v3949_v27 = vmax.f32 %v11259_v24, %v3914_v13  ;;  %v3769_v36 = vadd.f32 %v3768_v54, %v3720_v15  ;;  %v11263_v15 = vld [vmem:[#allocation22_spill] sm:$0xff]  ;;  %v4005_v13 = vmax.f32 %v10530_v60, 0.0  ;;  %v7585_v60 = vld [vmem:[%s10870_s5 + $0x160] sm:$0xff] }
 0x548   :  { %v3725_v48 = vadd.f32 %v11263_v15, %v11262_v44  ;;  %4650 = vmatpush.bf16.msra.mxu1 %v7586_v51  ;;  %v11265_v44 = vld [vmem:[#allocation48_spill] sm:$0xff] }
 0x549   :  { %v4146_v2 = vunpack.c.l.b16 %v4049_v32  ;;  %v3987_v38 = vadd.f32 %v10439_v29, %v3949_v27  ;;  %v3818_v59 = vadd.f32 %v3817_v26, %v3769_v36  ;;  %4838 = vmatpush.bf16.msra.mxu3 %v7602_v42  ;;  %v7582_v42 = vld [vmem:[%s10870_s5 + $0x148] sm:$0xff] }
 0x54b   :  { %v4019_v43 = vmax.f32 %v3987_v38, 0.0  ;;  %v3867_v11 = vadd.f32 %v3866_v22, %v3818_v59  ;;  %v4181_v52 = vsel %vm4160_vm0, %v4146_v2, %v4180_v14  ;;  %v4334_v39 = vrot.slane %v4146_v2, 7  ;;  %v3871_v14 = vpop.f32.mrf.mxu2 }
 0x54c   :  { %v4522_v28 = vrot.slane %v4146_v2, 1  ;;  %v4710_v25 = vrot.slane %v4146_v2, 2  ;;  %v4898_v53 = vrot.slane %v4146_v2, 3  ;;  %v5086_v31 = vrot.slane %v4146_v2, 4  ;;  %4651 = vmatpush.bf16.msra.mxu1 %v7585_v60 }
 0x54d   :  { %v4035_v56 = vmax.f32 %v4003_v7, %v4019_v43  ;;  %v3916_v19 = vadd.f32 %v3915_v9, %v3867_v11  ;;  %v4335_v47 = vsel %vm4160_vm0, %v4334_v39, %v4144_v17  ;;  %v5274_v3 = vrot.slane %v4146_v2, 5  ;;  %v11264_v43 = vld [vmem:[#allocation47_spill] sm:$0xff]  ;;  %4839 = vmatpush.bf16.msra.mxu3 %v7601_v35 }
 0x54e   :  { %v3771_v57 = vpop.f32.mrf.mxu0  ;;  %v4523_v61 = vsel %vm4160_vm0, %v4522_v28, %v4521_v1  ;;  %v4711_v4 = vsel %vm4160_vm0, %v4710_v25, %v4709_v20  ;;  %v4899_v37 = vsel %vm4160_vm0, %v4898_v53, %v4897_v50  ;;  %v5087_v22 = vsel %vm4160_vm0, %v5086_v31, %v5085_v30 }
 0x54f   :  { %v3820_v23 = vpop.f32.mrf.mxu1  ;;  %v4051_v16 = vpack.c.bf16 %v4035_v56, %v4035_v56  ;;  %v3951_v12 = vmax.f32 %v11260_v34, %v3916_v19  ;;  %v3772_v9 = vadd.f32 %v3771_v57, %v11261_v10  ;;  %v5275_v58 = vsel %vm4160_vm0, %v5274_v3, %v5273_v62  ;;  %v7600_v56 = vld [vmem:[%s10870_s5 + $0x1d8] sm:$0xff]  ;;  %v7583_v3 = vld [vmem:[%s10870_s5 + $0x150] sm:$0xff] }
 0x550   :  { %v4007_v19 = vmax.f32 %v10555_v8, 0.0 }
 0x551   :  { %v4148_v40 = vunpack.c.l.b16 %v4051_v16  ;;  %v3989_v17 = vadd.f32 %v10439_v29, %v3951_v12  ;;  %v3821_v21 = vadd.f32 %v3820_v23, %v3772_v9  ;;  %4840 = vmatpush.bf16.msra.mxu3 %v7600_v56 }
 0x553   :  { %v4021_v54 = vmax.f32 %v3989_v17, 0.0  ;;  %v3870_v26 = vadd.f32 %v3869_v33, %v3821_v21  ;;  %v4182_v32 = vrot.slane %v4148_v40, 7  ;;  %v4336_v24 = vrot.slane %v4148_v40, 6 }
 0x554   :  { %v4524_v27 = vsel %vm4163_vm2, %v4148_v40, %v4523_v61  ;;  %v4712_v36 = vrot.slane %v4148_v40, 1  ;;  %v4900_v7 = vrot.slane %v4148_v40, 2  ;;  %v5088_v41 = vrot.slane %v4148_v40, 3 }
 0x555   :  { %v4037_v2 = vmax.f32 %v4005_v13, %v4021_v54  ;;  %v3919_v38 = vadd.f32 %v3918_v5, %v3870_v26  ;;  %v4183_v59 = vsel %vm4163_vm2, %v4182_v32, %v4181_v52  ;;  %v4337_v45 = vsel %vm4163_vm2, %v4336_v24, %v4335_v47  ;;  %v3920_v52 = vpop.f32.mrf.mxu3  ;;  %v7584_v5 = vld [vmem:[%s10870_s5 + $0x158] sm:$0xff]  ;;  %v3874_v54 = vpop.f32.mrf.mxu2  ;;  %4841 = vmatpush.bf16.msra.mxu3 %v7599_v49  ;;  %v7598_v26 = vld [vmem:[%s10870_s5 + $0x1c8] sm:$0xff] }
 0x556   :  { %v3773_v18 = vpop.f32.mrf.mxu0  ;;  %v4713_v20 = vsel %vm4163_vm2, %v4712_v36, %v4711_v4  ;;  %v4901_v50 = vsel %vm4163_vm2, %v4900_v7, %v4899_v37  ;;  %v5089_v30 = vsel %vm4163_vm2, %v5088_v41, %v5087_v22  ;;  %v5276_v62 = vrot.slane %v4148_v40, 4  ;;  %4652 = vmatpush.bf16.msra.mxu1 %v7584_v5  ;;  %v11267_v7 = vld [vmem:[#allocation28_spill] sm:$0xff] }
 0x557   :  { %v3822_v1 = vpop.f32.mrf.mxu1  ;;  %v4053_v33 = vpack.c.bf16 %v4037_v2, %v4037_v2  ;;  %v3953_v11 = vmax.f32 %v11264_v43, %v3919_v38  ;;  %v3774_v39 = vadd.f32 %v3773_v18, %v3725_v48  ;;  %v11266_v48 = vld [vmem:[#allocation27_spill] sm:$0xff]  ;;  %v3730_v41 = vadd.f32 %v10300_v55, %v11267_v7 }
 0x558   :  { %v5277_v28 = vsel %vm4163_vm2, %v5276_v62, %v5275_v58 }
 0x559   :  { %v4150_v25 = vunpack.c.l.b16 %v4053_v33  ;;  %v3991_v53 = vadd.f32 %v10439_v29, %v3953_v11  ;;  %v3823_v31 = vadd.f32 %v3822_v1, %v3774_v39  ;;  %4842 = vmatpush.bf16.msra.mxu3 %v7598_v26  ;;  %v7597_v1 = vld [vmem:[%s10870_s5 + $0x1c0] sm:$0xff]  ;;  %v4013_v26 = vmax.f32 %v10599_v6, 0.0 }
 0x55a   :  { %4653 = vmatpush.bf16.msra.mxu1 %v7583_v3 }
 0x55b   :  { %v4023_v0 = vmax.f32 %v3991_v53, 0.0  ;;  %v3872_v47 = vadd.f32 %v3871_v14, %v3823_v31  ;;  %v4184_v57 = vrot.slane %v4150_v25, 6  ;;  %v4338_v23 = vrot.slane %v4150_v25, 5  ;;  %v11268_v53 = vld [vmem:[#allocation56_spill] sm:$0xff] }
 0x55c   :  { %v4525_v61 = vrot.slane %v4150_v25, 7  ;;  %v4714_v4 = vsel %vm4166_vm3, %v4150_v25, %v4713_v20  ;;  %v4902_v37 = vrot.slane %v4150_v25, 1  ;;  %v5090_v22 = vrot.slane %v4150_v25, 2 }
 0x55d   :  { %v4039_v8 = vmax.f32 %v4007_v19, %v4023_v0  ;;  %v3921_v16 = vadd.f32 %v3920_v52, %v3872_v47  ;;  %v4185_v34 = vsel %vm4166_vm3, %v4184_v57, %v4183_v59  ;;  %v4339_v12 = vsel %vm4166_vm3, %v4338_v23, %v4337_v45  ;;  %v3923_v2 = vpop.f32.mrf.mxu3  ;;  %v7581_v59 = vld [vmem:[%s10870_s5 + $0x140] sm:$0xff]  ;;  %4843 = vmatpush.bf16.msra.mxu3 %v7597_v1  ;;  %v3876_v23 = vpop.f32.mrf.mxu2 }
 0x55e   :  { %v3776_v10 = vpop.f32.mrf.mxu0  ;;  %v4526_v58 = vsel %vm4166_vm3, %v4525_v61, %v4524_v27  ;;  %v4903_v40 = vsel %vm4166_vm3, %v4902_v37, %v4901_v50  ;;  %v5091_v17 = vsel %vm4166_vm3, %v5090_v22, %v5089_v30  ;;  %v5278_v21 = vrot.slane %v4150_v25, 3  ;;  %4654 = vmatpush.bf16.msra.mxu1 %v7582_v42 }
 0x55f   :  { %v3825_v9 = vpop.f32.mrf.mxu1  ;;  %v4055_v51 = vpack.c.bf16 %v4039_v8, %v4039_v8  ;;  %v3955_v15 = vmax.f32 %v11265_v44, %v3921_v16  ;;  %v3777_v13 = vadd.f32 %v3776_v10, %v11266_v48  ;;  %v4009_v14 = vmax.f32 %v10571_v63, 0.0 }
 0x560   :  { %v5279_v32 = vsel %vm4166_vm3, %v5278_v21, %v5277_v28  ;;  %v4011_v57 = vmax.f32 %v10585_v46, 0.0 }
 0x561   :  { %v4152_v24 = vunpack.c.l.b16 %v4055_v51  ;;  %v3993_v27 = vadd.f32 %v10439_v29, %v3955_v15  ;;  %v3826_v36 = vadd.f32 %v3825_v9, %v3777_v13  ;;  %v11269_v15 = vld [vmem:[#allocation57_spill] sm:$0xff] }
 0x562   :  { %4655 = vmatpush.bf16.msra.mxu1 %v7581_v59 }
 0x563   :  { %v4025_v38 = vmax.f32 %v3993_v27, 0.0  ;;  %v3875_v60 = vadd.f32 %v3874_v54, %v3826_v36  ;;  %v4186_v45 = vrot.slane %v4152_v24, 5  ;;  %v4340_v18 = vrot.slane %v4152_v24, 4 }
 0x564   :  { %v4527_v35 = vrot.slane %v4152_v24, 6  ;;  %v4715_v20 = vrot.slane %v4152_v24, 7  ;;  %v4904_v55 = vsel %vm4169_vm4, %v4152_v24, %v4903_v40  ;;  %v5092_v63 = vrot.slane %v4152_v24, 1 }
 0x565   :  { %v4041_v50 = vmax.f32 %v4009_v14, %v4025_v38  ;;  %v3924_v30 = vadd.f32 %v3923_v2, %v3875_v60  ;;  %v4187_v62 = vsel %vm4169_vm4, %v4186_v45, %v4185_v34  ;;  %v4341_v33 = vsel %vm4169_vm4, %v4340_v18, %v4339_v12  ;;  %v3925_v22 = vpop.f32.mrf.mxu3 }
 0x566   :  { %v3778_v43 = vpop.f32.mrf.mxu0  ;;  %v4528_v11 = vsel %vm4169_vm4, %v4527_v35, %v4526_v58  ;;  %v4716_v39 = vsel %vm4169_vm4, %v4715_v20, %v4714_v4  ;;  %v5093_v52 = vsel %vm4169_vm4, %v5092_v63, %v5091_v17  ;;  %v5280_v28 = vrot.slane %v4152_v24, 2 }
 0x567   :  { %v4057_v25 = vpack.c.bf16 %v4041_v50, %v4041_v50  ;;  %v3957_v31 = vmax.f32 %v11268_v53, %v3924_v30  ;;  %v3779_v5 = vadd.f32 %v3778_v43, %v3730_v41  ;;  %v3827_v56 = vpop.f32.mrf.mxu1 }
 0x568   :  { %v5281_v19 = vsel %vm4169_vm4, %v5280_v28, %v5279_v32  ;;  %v7636_v28 = vld [vmem:[%s10870_s5 + $0x2f8] sm:$0xff] }
 0x569   :  { %v4154_v0 = vunpack.c.l.b16 %v4057_v25  ;;  %v3995_v47 = vadd.f32 %v10439_v29, %v3957_v31  ;;  %v3828_v3 = vadd.f32 %v3827_v56, %v3779_v5 }
 0x56b   :  { %v4027_v49 = vmax.f32 %v3995_v47, 0.0  ;;  %v3877_v61 = vadd.f32 %v3876_v23, %v3828_v3  ;;  %v4188_v4 = vrot.slane %v4154_v0, 4  ;;  %v4342_v37 = vrot.slane %v4154_v0, 3  ;;  %v7635_v23 = vld [vmem:[%s10870_s5 + $0x2f0] sm:$0xff] }
 0x56c   :  { %v4529_v8 = vrot.slane %v4154_v0, 5  ;;  %v4717_v16 = vrot.slane %v4154_v0, 6  ;;  %v4905_v34 = vrot.slane %v4154_v0, 7  ;;  %v5094_v12 = vsel %vm4172_vm5, %v4154_v0, %v5093_v52  ;;  %v7620_v52 = vld [vmem:[%s10870_s5 + $0x278] sm:$0xff] }
 0x56d   :  { %v4043_v10 = vmax.f32 %v4011_v57, %v4027_v49  ;;  %v3926_v9 = vadd.f32 %v3925_v22, %v3877_v61  ;;  %v4189_v58 = vsel %vm4172_vm5, %v4188_v4, %v4187_v62  ;;  %v4343_v40 = vsel %vm4172_vm5, %v4342_v37, %v4341_v33  ;;  %v7619_v57 = vld [vmem:[%s10870_s5 + $0x270] sm:$0xff]  ;;  %v7618_v49 = vld [vmem:[%s10870_s5 + $0x268] sm:$0xff]  ;;  %v7617_v22 = vld [vmem:[%s10870_s5 + $0x260] sm:$0xff] }
 0x56e   :  { %v4530_v17 = vsel %vm4172_vm5, %v4529_v8, %v4528_v11  ;;  %v4718_v46 = vsel %vm4172_vm5, %v4717_v16, %v4716_v39  ;;  %v4906_v21 = vsel %vm4172_vm5, %v4905_v34, %v4904_v55  ;;  %v5282_v51 = vrot.slane %v4154_v0, 1  ;;  %v7634_v61 = vld [vmem:[%s10870_s5 + $0x2e8] sm:$0xff]  ;;  %v7633_v8 = vld [vmem:[%s10870_s5 + $0x2e0] sm:$0xff]  ;;  %v7616_v16 = vld [vmem:[%s10870_s5 + $0x258] sm:$0xff] }
 0x56f   :  { %v4059_v44 = vpack.c.bf16 %v4043_v10, %v4043_v10  ;;  %v3959_v48 = vmax.f32 %v11269_v15, %v3926_v9  ;;  %v7632_v34 = vld [vmem:[%s10870_s5 + $0x2d8] sm:$0xff]  ;;  %v7613_v15 = vld [vmem:[%s10870_s5 + $0x240] sm:$0xff] }
 0x570   :  { %v5283_v13 = vsel %vm4172_vm5, %v5282_v51, %v5281_v19 }
 0x571   :  { %v4156_v42 = vunpack.c.l.b16 %v4059_v44  ;;  %v3997_v54 = vadd.f32 %v10439_v29, %v3959_v48  ;;  %v7629_v48 = vld [vmem:[%s10870_s5 + $0x2c0] sm:$0xff] }
 0x573   :  { %v4029_v32 = vmax.f32 %v3997_v54, 0.0  ;;  %v4190_v24 = vrot.slane %v4156_v42, 3  ;;  %v4344_v27 = vrot.slane %v4156_v42, 2  ;;  %v4531_v36 = vrot.slane %v4156_v42, 4 }
 0x574   :  { %v4719_v7 = vrot.slane %v4156_v42, 5  ;;  %v4907_v41 = vrot.slane %v4156_v42, 6  ;;  %v5095_v14 = vrot.slane %v4156_v42, 7  ;;  %v5284_v2 = vsel %vm4175_vm6, %v4156_v42, %v5283_v13  ;;  %v7652_v13 = vld [vmem:[%s10870_s5 + $0x378] sm:$0xff] }
 0x575   :  { %v4045_v38 = vmax.f32 %v4013_v26, %v4029_v32  ;;  %v4191_v60 = vsel %vm4175_vm6, %v4190_v24, %v4189_v58  ;;  %v4345_v59 = vsel %vm4175_vm6, %v4344_v27, %v4343_v40  ;;  %v4532_v45 = vsel %vm4175_vm6, %v4531_v36, %v4530_v17  ;;  %v7615_v40 = vld [vmem:[%s10870_s5 + $0x250] sm:$0xff]  ;;  %v7650_v27 = vld [vmem:[%s10870_s5 + $0x368] sm:$0xff]  ;;  %v7649_v36 = vld [vmem:[%s10870_s5 + $0x360] sm:$0xff] }
 0x576   :  { %v4720_v29 = vsel %vm4175_vm6, %v4719_v7, %v4718_v46  ;;  %v4908_v6 = vsel %vm4175_vm6, %v4907_v41, %v4906_v21  ;;  %v5096_v18 = vsel %vm4175_vm6, %v5095_v14, %v5094_v12  ;;  %v7631_v17 = vld [vmem:[%s10870_s5 + $0x2d0] sm:$0xff]  ;;  %v7614_v46 = vld [vmem:[%s10870_s5 + $0x248] sm:$0xff]  ;;  %v7648_v41 = vld [vmem:[%s10870_s5 + $0x358] sm:$0xff] }
 0x577   :  { %v4061_v1 = vpack.c.bf16 %v4045_v38, %v4045_v38  ;;  %v7630_v21 = vld [vmem:[%s10870_s5 + $0x2c8] sm:$0xff]  ;;  %v7651_v26 = vld [vmem:[%s10870_s5 + $0x370] sm:$0xff] }
 0x578   :  { %v7647_v14 = vld [vmem:[%s10870_s5 + $0x350] sm:$0xff] }
 0x579   :  { %v4158_v35 = vunpack.c.l.b16 %v4061_v1  ;;  %v10758_v20 = vpop.f32.mrf.mxu0  ;;  %v7660_v1 = vld [vmem:[#allocation6 + $0x38] sm:$0xff] }
 0x57a   :  { %5489 = vmatpush.bf16.msra.mxu2 %v7660_v1 }
 0x57b   :  { %v4192_v55 = vrot.slane %v4158_v35, 2  ;;  %v4346_v63 = vrot.slane %v4158_v35, 1  ;;  %v4533_v50 = vrot.slane %v4158_v35, 3  ;;  %v4721_v30 = vrot.slane %v4158_v35, 4 }
 0x57c   :  { %v4909_v62 = vrot.slane %v4158_v35, 5  ;;  %v5097_v33 = vrot.slane %v4158_v35, 6  ;;  %v5285_v43 = vrot.slane %v4158_v35, 7  ;;  %v7659_v35 = vld [vmem:[#allocation6 + $0x30] sm:$0xff] }
 0x57d   :  { %v4193_v11 = vsel %vm4178_vm7, %v4192_v55, %v4191_v60  ;;  %v4347_v39 = vsel %vm4178_vm7, %v4346_v63, %v4345_v59  ;;  %v4534_v25 = vsel %vm4178_vm7, %v4533_v50, %v4532_v45  ;;  %v4722_v53 = vsel %vm4178_vm7, %v4721_v30, %v4720_v29  ;;  %v7645_v60 = vld [vmem:[%s10870_s5 + $0x340] sm:$0xff]  ;;  %v7658_v63 = vld [vmem:[#allocation6 + $0x28] sm:$0xff] }
 0x57e   :  { %v4195_v31 = vpack.c.b16 %v4193_v11, %v4193_v11  ;;  %v4349_v5 = vpack.c.b16 %v4347_v39, %v4347_v39  ;;  %v4910_v19 = vsel %vm4178_vm7, %v4909_v62, %v4908_v6  ;;  %v5098_v0 = vsel %vm4178_vm7, %v5097_v33, %v5096_v18  ;;  %5490 = vmatpush.bf16.msra.mxu2 %v7659_v35  ;;  %v7657_v30 = vld [vmem:[#allocation6 + $0x20] sm:$0xff]  ;;  %v7656_v33 = vld [vmem:[#allocation6 + $0x18] sm:$0xff] }
 0x57f   :  { %v10770_v56 = vpop.f32.mrf.mxu2  ;;  %v10775_v47 = vsel %vm4178_vm7, %v5285_v43, %v5284_v2  ;;  %v4536_v12 = vpack.c.b16 %v4534_v25, %v4534_v25  ;;  %v4724_v10 = vpack.c.b16 %v4722_v53, %v4722_v53  ;;  %v4912_v42 = vpack.c.b16 %v4910_v19, %v4910_v19  ;;  %v7646_v2 = vld [vmem:[%s10870_s5 + $0x348] sm:$0xff] }
 0x580   :  { %4315 = vmatmul.bf16.vlgmr.msrb.gmra.mxu1 %v4195_v31  ;;  %4469 = vmatmul.bf16.vlgmr.msrb.gmra.mxu3 %v4349_v5  ;;  %v5100_v54 = vpack.c.b16 %v5098_v0, %v5098_v0  ;;  %v5288_v59 = vpack.c.b16 %v10775_v47, %v10775_v47  ;;  %v7654_v25 = vld [vmem:[#allocation6 + $0x8] sm:$0xff]  ;;  %v7653_v31 = vld [vmem:[#allocation6] sm:$0xff] }
 0x581   :  { %5024 = vmatpush.bf16.msrb.mxu1 %v7620_v52  ;;  %v4305_v3 = vpop.f32.mrf.mxu0  ;;  %5212 = vmatpush.bf16.msrb.mxu3 %v7636_v28  ;;  %v7655_v52 = vld [vmem:[#allocation6 + $0x10] sm:$0xff] }
 0x582   :  { %5491 = vmatpush.bf16.msra.mxu2 %v7658_v63 }
 0x585   :  { %5025 = vmatpush.bf16.msrb.mxu1 %v7619_v57  ;;  %5213 = vmatpush.bf16.msrb.mxu3 %v7635_v23 }
 0x586   :  { %5492 = vmatpush.bf16.msra.mxu2 %v7657_v30 }
 0x587   :  { %v4459_v4 = vpop.f32.mrf.mxu2 }
 0x589   :  { %5026 = vmatpush.bf16.msrb.mxu1 %v7618_v49  ;;  %v10789_v37 = vpop.f32.mrf.mxu0  ;;  %5214 = vmatpush.bf16.msrb.mxu3 %v7634_v61 }
 0x58a   :  { %5493 = vmatpush.bf16.msra.mxu2 %v7656_v33 }
 0x58d   :  { %5027 = vmatpush.bf16.msrb.mxu1 %v7617_v22  ;;  %5215 = vmatpush.bf16.msrb.mxu3 %v7633_v8 }
 0x58e   :  { %5494 = vmatpush.bf16.msra.mxu2 %v7655_v52 }
 0x58f   :  { %v10803_v9 = vpop.f32.mrf.mxu2 }
 0x590   :  { %4656 = vmatmul.bf16.vlgmr.msra.gmra.mxu1 %v4536_v12  ;;  %4844 = vmatmul.bf16.vlgmr.msra.gmra.mxu3 %v4724_v10 }
 0x591   :  { %5028 = vmatpush.bf16.msrb.mxu1 %v7616_v16  ;;  %v4646_v58 = vpop.f32.mrf.mxu0  ;;  %5216 = vmatpush.bf16.msrb.mxu3 %v7632_v34 }
 0x592   :  { %5495 = vmatpush.bf16.msra.mxu2 %v7654_v25 }
 0x595   :  { %5029 = vmatpush.bf16.msrb.mxu1 %v7615_v40  ;;  %5217 = vmatpush.bf16.msrb.mxu3 %v7631_v17 }
 0x596   :  { %5496 = vmatpush.bf16.msra.mxu2 %v7653_v31 }
 0x597   :  { %v4834_v51 = vpop.f32.mrf.mxu2 }
 0x599   :  { %5030 = vmatpush.bf16.msrb.mxu1 %v7614_v46  ;;  %v10817_v44 = vpop.f32.mrf.mxu0  ;;  %5218 = vmatpush.bf16.msrb.mxu3 %v7630_v21 }
 0x59d   :  { %5031 = vmatpush.bf16.msrb.mxu1 %v7613_v15  ;;  %5219 = vmatpush.bf16.msrb.mxu3 %v7629_v48 }
 0x59f   :  { %v5208_v32 = vpop.f32.mrf.mxu2 }
 0x5a0   :  { %5032 = vmatmul.bf16.vlgmr.msrb.gmra.mxu1 %v4912_v42  ;;  %5220 = vmatmul.bf16.vlgmr.msrb.gmra.mxu3 %v5100_v54 }
 0x5a1   :  { %5400 = vmatpush.bf16.msra.mxu1 %v7652_v13  ;;  %v5022_v24 = vpop.f32.mrf.mxu0 }
 0x5a5   :  { %5401 = vmatpush.bf16.msra.mxu1 %v7651_v26 }
 0x5a7   :  { %v5210_v7 = vpop.f32.mrf.mxu2 }
 0x5a9   :  { %5402 = vmatpush.bf16.msra.mxu1 %v7650_v27 }
 0x5ad   :  { %5403 = vmatpush.bf16.msra.mxu1 %v7649_v36 }
 0x5b1   :  { %5404 = vmatpush.bf16.msra.mxu1 %v7648_v41 }
 0x5b5   :  { %5405 = vmatpush.bf16.msra.mxu1 %v7647_v14 }
 0x5b9   :  { %v5396_v38 = vpop.f32.mrf.mxu0  ;;  %5406 = vmatpush.bf16.msra.mxu1 %v7646_v2 }
 0x5bd   :  { %5407 = vmatpush.bf16.msra.mxu1 %v7645_v60 }
 0x5c0   :  { %5408 = vmatmul.bf16.vlgmr.msra.gmra.mxu1 %v5288_v59 }
 0x5c1   :  { %v5398_v45 = vpop.f32.mrf.mxu0 }
 0x5fd   :  { %v4316_v29 = vpop.f32.mrf.mxu1 }
 0x5fe   :  { %v4317_v19 = vadd.f32 %v4316_v29, %v10758_v20  ;;  %v7830_v20 = vld [vmem:[%s10871_s6] ss:$0 sm:$0xff] }
 0x600   :  { %v4458_v0 = vadd.f32 %v10770_v56, %v4317_v19 }
 0x603   :  { %v4470_v6 = vpop.f32.mrf.mxu3 }
 0x604   :  { %v4471_v3 = vadd.f32 %v4470_v6, %v4458_v0 }
 0x605   :  { %v4318_v18 = vpop.f32.mrf.mxu1 }
 0x60b   :  { %v4472_v55 = vpop.f32.mrf.mxu3 }
 0x60d   :  { %v4657_v50 = vpop.f32.mrf.mxu1 }
 0x60e   :  { %v4658_v47 = vadd.f32 %v4657_v50, %v10789_v37 }
 0x610   :  { %v4661_v23 = vadd.f32 %v4658_v47, %v4471_v3 }
 0x613   :  { %v4845_v62 = vpop.f32.mrf.mxu3 }
 0x614   :  { %v4846_v57 = vadd.f32 %v4845_v62, %v10803_v9  ;;  %v7831_v9 = vld [vmem:[%s10873_s8] ss:$0 sm:$0xff] }
 0x615   :  { %v4659_v43 = vpop.f32.mrf.mxu1 }
 0x616   :  { %v4849_v61 = vadd.f32 %v4846_v57, %v4661_v23 }
 0x61b   :  { %v4847_v11 = vpop.f32.mrf.mxu3 }
 0x61d   :  { %v5033_v39 = vpop.f32.mrf.mxu1 }
 0x61e   :  { %v5034_v49 = vadd.f32 %v5033_v39, %v10817_v44 }
 0x620   :  { %v5037_v22 = vadd.f32 %v5034_v49, %v4849_v61 }
 0x623   :  { %v5221_v28 = vpop.f32.mrf.mxu3 }
 0x624   :  { %v5222_v4 = vadd.f32 %v5221_v28, %v5208_v32 }
 0x625   :  { %v5035_v53 = vpop.f32.mrf.mxu1 }
 0x626   :  { %v5225_v16 = vadd.f32 %v5222_v4, %v5037_v22 }
 0x62b   :  { %v5223_v5 = vpop.f32.mrf.mxu3 }
 0x63d   :  { %v5409_v8 = vpop.f32.mrf.mxu1 }
 0x63e   :  { %v5410_v34 = vadd.f32 %v5409_v8, %v5396_v38 }
 0x640   :  { %v5413_v12 = vadd.f32 %v5410_v34, %v5225_v16 }
 0x642   :  { %v5418_v56 = vadd.f32 %v7830_v20, %v5413_v12 }
 0x644   :  { %v5419_v10 = vmax.f32 %v5418_v56, 0.0 }
 0x645   :  { %v5411_v37 = vpop.f32.mrf.mxu1 }
 0x646   :  { %v5420_v58 = vpack.c.bf16 %v5419_v10, %v5419_v10 }
 0x648   :  { %5497 = vmatmul.bf16.vlgmr.msra.gmra.mxu2 %v5420_v58 }
 0x6cb   :  { %v5498_v40 = vpop.f32.mrf.mxu2 }
 0x6cc   :  { %v5499_v17 = vadd.f32 %v7831_v9, %v5498_v40 }
 0x6ce   :  { %5502 = vst [vmem:[%s10874_s9] sm:$0xff] %v5499_v17 }
 0x6d3   :  { %v5500_v46 = vpop.f32.mrf.mxu2 }
 0x6d4   :  { %5507 = vsyncpa [#allocation3], 1 }
 0x6d5   :  { %5508 = vsyncpa [#allocation5], 1 }

</bundles_post_ra>
